<compile_context>
chip_gen: v6e
topology: v6e:2x2x1
jax: 0.10.0
libtpu: 0.0.40
codegen_flags: <defaults>
</compile_context>

<pallas_src>
import functools

import jax
import jax.numpy as jnp
from jax.experimental import pallas as pl
from jax.experimental.pallas import tpu as pltpu

EPS = 1e-5


def _round_up(v, m):
    return ((v + m - 1) // m) * m


def _vmem_block_bytes(th, w, cin_p, cout_p, kp):
    """Rough VMEM footprint of one grid step (double-buffered pipelined operands)."""
    in_blk = (th + 2) * _round_up(w + 2, 8) * cin_p * 2          # bf16 halo'd input block
    y_blk = th * _round_up(w, 8) * cout_p * 2                    # bf16 conv output block
    st_blk = 8 * cout_p * 4                                      # stats block (sublane-padded)
    wt = kp * cout_p * 2                                         # resident weight (bf16)
    xcol = _round_up(th * w, 16) * kp * 2                        # im2col scratch (bf16)
    return 2 * in_blk + 2 * y_blk + 2 * 2 * st_blk + 2 * wt + xcol


def _pick_th(h, w, cin_p, cout_p, kp, budget=28 * 1024 * 1024):
    """Tile height: target th*w ~= 512 flattened rows, capped by a v7x-safe VMEM budget."""
    th = max(1, min(h, -(-512 // w)))
    while th > 1 and _vmem_block_bytes(th, w, cin_p, cout_p, kp) > budget:
        th = max(1, th // 2)
    return th


# ----------------------------- Pallas kernel ------------------------------- #

def _conv_bn_stats_kernel(h, ragged, x_ref, w_ref, y_ref, sum_ref, ssq_ref, xcol_ref):
    """Fused 3x3 conv (pad 1, stride 1) + per-block BN partial statistics.

    x_ref   : (1, th+2, w+2, cin_p) bf16 halo'd input window (auto-pipelined BlockSpec)
    w_ref   : (9*cin_p, cout_p)     bf16 resident weight tile (constant index_map)
    y_ref   : (1, th, w, cout_p)    bf16 conv output block
    sum_ref : (1, 1, 1, cout_p)     f32 per-block channel sum
    ssq_ref : (1, 1, 1, cout_p)     f32 per-block channel sum-of-squares
    xcol_ref: (th*w, 9*cin_p)       bf16 VMEM im2col scratch (fully rewritten each step)
    """
    _, th, w, cout = y_ref.shape
    cin_p = x_ref.shape[-1]
    row0 = pl.program_id(1) * th

    xwin = x_ref[0]                                    # (th+2, w+2, cin_p)

    # Build the im2col matrix once per block: 9 lane-aligned, 128-wide column writes.
    for kh in range(3):
        for kw in range(3):
            t = kh * 3 + kw
            xcol_ref[:, t * cin_p:(t + 1) * cin_p] = (
                xwin[kh:kh + th, kw:kw + w, :].reshape(th * w, cin_p))

    # Single MXU matmul, K = 9*cin_p, bf16 in / f32 accumulate.
    acc = jnp.dot(xcol_ref[...], w_ref[...], preferred_element_type=jnp.float32)

    if ragged:
        # Zero rows that fall in the bottom H-padding so BN statistics stay exact.
        flat = jax.lax.broadcasted_iota(jnp.int32, (th * w, 1), 0)
        acc = jnp.where(flat < (h - row0) * w, acc, 0.0)

    y_ref[...] = acc.reshape(1, th, w, cout).astype(y_ref.dtype)
    sum_ref[...] = jnp.sum(acc, axis=0, keepdims=True).reshape(1, 1, 1, cout)
    ssq_ref[...] = jnp.sum(acc * acc, axis=0, keepdims=True).reshape(1, 1, 1, cout)


# ------------------------------ JAX wrapper -------------------------------- #

@functools.partial(jax.jit, static_argnames=("th",))
def conv_bn_2d(x, weight, gamma, beta, *, th=None):
    """ConvBn2d forward.  x: [N, C_in, H, W] (NCHW), weight: [C_out, C_in, 3, 3]."""
    n, c_in, h, w = x.shape
    c_out = weight.shape[0]
    cin_p = _round_up(c_in, 128)       # lane-dense contraction sub-width
    cout_p = _round_up(c_out, 128)     # lane-dense output width (unmasked 128-lane stores)
    kp = 9 * cin_p                     # folded im2col contraction (single MXU matmul)

    if th is None:
        th = _pick_th(h, w, cin_p, cout_p, kp)
    hb = pl.cdiv(h, th)
    h_pad = hb * th
    ragged = (h_pad != h)

    blk_bytes = _vmem_block_bytes(th, w, cin_p, cout_p, kp)
    vmem_limit = int(min(64 * 1024 * 1024,
                         max(16 * 1024 * 1024, blk_bytes + 8 * 1024 * 1024)))

    # ---- layout glue (cheap XLA): NCHW -> padded channels-last bf16, halo'd row blocks.
    x_nhwc = jnp.transpose(x, (0, 2, 3, 1)).astype(jnp.bfloat16)
    xp = jnp.pad(x_nhwc, ((0, 0), (1, 1 + h_pad - h), (1, 1), (0, cin_p - c_in)))
    row_idx = jnp.arange(hb)[:, None] * th + jnp.arange(th + 2)[None, :]   # (hb, th+2)
    xh = xp[:, row_idx].reshape(n * hb, th + 2, w + 2, cin_p)

    # Weight: (Cout, Cin, 3, 3) -> (kh, kw, cin_p, cout_p) -> (9*cin_p, cout_p) bf16.
    wt = jnp.transpose(weight, (2, 3, 1, 0))
    wt = jnp.pad(wt, ((0, 0), (0, 0), (0, cin_p - c_in), (0, cout_p - c_out)))
    wt = wt.reshape(kp, cout_p).astype(jnp.bfloat16)

    # ---- fused conv + BN partial statistics (single Pallas pass) ----
    kernel = functools.partial(_conv_bn_stats_kernel, h, ragged)
    y_conv, psum, pssq = pl.pallas_call(
        kernel,
        out_shape=(
            jax.ShapeDtypeStruct((n, h_pad, w, cout_p), jnp.bfloat16),
            jax.ShapeDtypeStruct((n, hb, 1, cout_p), jnp.float32),
            jax.ShapeDtypeStruct((n, hb, 1, cout_p), jnp.float32),
        ),
        grid_spec=pltpu.PrefetchScalarGridSpec(
            num_scalar_prefetch=0,
            grid=(n, hb),
            in_specs=[
                pl.BlockSpec((1, th + 2, w + 2, cin_p),
                             lambda i, j: (i * hb + j, 0, 0, 0)),
                pl.BlockSpec((kp, cout_p), lambda i, j: (0, 0)),   # resident weights
            ],
            out_specs=[
                pl.BlockSpec((1, th, w, cout_p), lambda i, j: (i, j, 0, 0)),
                pl.BlockSpec((1, 1, 1, cout_p), lambda i, j: (i, j, 0, 0)),
                pl.BlockSpec((1, 1, 1, cout_p), lambda i, j: (i, j, 0, 0)),
            ],
            scratch_shapes=[pltpu.VMEM((th * w, kp), jnp.bfloat16)],
        ),
        compiler_params=pltpu.CompilerParams(
            dimension_semantics=("parallel", "parallel"),
            vmem_limit_bytes=vmem_limit),
    )(xh, wt)

    # ---- finalize BN batch statistics (tiny reduction) + fused epilogue in XLA ----
    # Note: var = E[x^2] - E[x]^2 from f32 partials; acceptable for conv activations at
    # these scales (the f32-exact per-block sums keep error small for this module).
    count = jnp.float32(n * h * w)
    ch_sum = jnp.sum(psum, axis=(0, 1, 2))
    ch_ssq = jnp.sum(pssq, axis=(0, 1, 2))
    mean = ch_sum / count
    var = jnp.maximum(ch_ssq / count - mean * mean, 0.0)   # biased batch variance
    inv = jax.lax.rsqrt(var + EPS)
    scale = gamma.astype(jnp.float32) * inv[:c_out]
    shift = beta.astype(jnp.float32) - mean[:c_out] * scale
    # TODO(synk): PyTorch BatchNorm2d train mode also updates running_mean/running_var
    # with momentum; those state buffers are not part of the forward output.

    # Crop, BN affine and NHWC->NCHW fuse into a single XLA read+write of the conv output.
    y = y_conv[:, :h, :, :c_out].astype(jnp.float32) * scale + shift
    return jnp.transpose(y, (0, 3, 1, 2))


# --------------------------- pure-JAX reference ----------------------------- #

def conv_bn_2d_ref(x, weight, gamma, beta):
    # The kernel feeds the MXU bf16 inputs (f32 accumulation) and stores the conv
    # intermediate in bf16 before the BN affine; mirror both roundings here so the
    # comparison isolates real bugs (BN statistics stay f32).
    xb = x.astype(jnp.bfloat16).astype(jnp.float32)
    wb = weight.astype(jnp.bfloat16).astype(jnp.float32)
    y = jax.lax.conv_general_dilated(
        xb, wb, window_strides=(1, 1), padding=((1, 1), (1, 1)),
        dimension_numbers=("NCHW", "OIHW", "NCHW"))
    mean = jnp.mean(y, axis=(0, 2, 3), keepdims=True)
    var = jnp.mean((y - mean) ** 2, axis=(0, 2, 3), keepdims=True)
    yq = y.astype(jnp.bfloat16).astype(jnp.float32)
    g = gamma.reshape(1, -1, 1, 1)
    b = beta.reshape(1, -1, 1, 1)
    return (yq - mean) * jax.lax.rsqrt(var + EPS) * g + b


# ---------------------------------- main ------------------------------------ #

if __name__ == "__main__":
    key = jax.random.PRNGKey(0)
    k_x, k_w, k_g, k_b = jax.random.split(key, 4)

    N, C_IN, C_OUT, H, W = 2, 4, 8, 16, 16

    x = jax.random.normal(k_x, (N, C_IN, H, W), dtype=jnp.float32)
    weight = 0.1 * jax.random.normal(k_w, (C_OUT, C_IN, 3, 3), dtype=jnp.float32)
    gamma = 1.0 + 0.1 * jax.random.normal(k_g, (C_OUT,), dtype=jnp.float32)
    beta = 0.1 * jax.random.normal(k_b, (C_OUT,), dtype=jnp.float32)

    ref = conv_bn_2d_ref(x, weight, gamma, beta)

    # th=None : auto-picked tile (whole height here), th=8 : multi-block grid,
    # th=6    : exercises the ragged bottom-row masking path (h_pad > H).
    # Tolerance is sized for the bf16 conv intermediate (~2^-8 relative, amplified by
    # the BN scale); everything else in the pipeline is f32.
    for th in (None, 8, 6):
        out = jax.block_until_ready(conv_bn_2d(x, weight, gamma, beta, th=th))
        assert out.shape == (N, C_OUT, H, W)
        err = float(jnp.max(jnp.abs(out - ref)))
        assert jnp.allclose(out, ref, rtol=1e-2, atol=1e-2), (th, err)

    print("KERNEL_OK")
</pallas_src>

<mosaic_0001>
module attributes {stable_mosaic.version = 11 : i64} {
  func.func @_conv_bn_stats_kernel(%arg0: i32, %arg1: i32, %arg2: memref<1x18x18x128xbf16, #tpu.memory_space<vmem>>, %arg3: memref<1152x128xbf16, #tpu.memory_space<vmem>>, %arg4: memref<1x16x16x128xbf16, #tpu.memory_space<vmem>>, %arg5: memref<1x1x1x128xf32, #tpu.memory_space<vmem>>, %arg6: memref<1x1x1x128xf32, #tpu.memory_space<vmem>>, %arg7: memref<256x1152xbf16, #tpu.memory_space<vmem>>) attributes {dimension_semantics = [#tpu.dimension_semantics<parallel>, #tpu.dimension_semantics<parallel>], iteration_bounds = array<i64: 2, 1>, scalar_prefetch = 0 : i64, scratch_operands = 1 : i64, tpu.core_type = #tpu.core_type<tc>, window_params = [{transform_indices = @transform_0, window_bounds = array<i64: 1, 18, 18, 128>}, {pipeline_mode = #tpu.pipeline_mode<synchronous>, transform_indices = @transform_1, window_bounds = array<i64: 1152, 128>}, {transform_indices = @transform_2, window_bounds = array<i64: 1, 16, 16, 128>}, {transform_indices = @transform_3, window_bounds = array<i64: 1, 1, 1, 128>}, {transform_indices = @transform_4, window_bounds = array<i64: 1, 1, 1, 128>}]} {
    %c0 = arith.constant 0 : index
    %c0_0 = arith.constant 0 : index
    %c0_1 = arith.constant 0 : index
    %c0_2 = arith.constant 0 : index
    %0 = vector.load %arg2[%c0, %c0_0, %c0_1, %c0_2] : memref<1x18x18x128xbf16, #tpu.memory_space<vmem>>, vector<1x18x18x128xbf16>
    %1 = vector.shape_cast %0 : vector<1x18x18x128xbf16> to vector<18x18x128xbf16>
    %2 = vector.extract_strided_slice %1 {offsets = [0, 0, 0], sizes = [16, 16, 128], strides = [1, 1, 1]} : vector<18x18x128xbf16> to vector<16x16x128xbf16>
    %3 = vector.shape_cast %2 : vector<16x16x128xbf16> to vector<256x128xbf16>
    %c0_3 = arith.constant 0 : index
    %c0_4 = arith.constant 0 : index
    %4 = vector.load %arg7[%c0_3, %c0_4] : memref<256x1152xbf16, #tpu.memory_space<vmem>>, vector<256x128xbf16>
    tpu.vector_store %arg7[%c0_3, %c0_4], %3 {strides = array<i32>} : memref<256x1152xbf16, #tpu.memory_space<vmem>>, vector<256x128xbf16>,
    %5 = vector.extract_strided_slice %1 {offsets = [0, 1, 0], sizes = [16, 16, 128], strides = [1, 1, 1]} : vector<18x18x128xbf16> to vector<16x16x128xbf16>
    %6 = vector.shape_cast %5 : vector<16x16x128xbf16> to vector<256x128xbf16>
    %c0_5 = arith.constant 0 : index
    %c128 = arith.constant 128 : index
    %7 = vector.load %arg7[%c0_5, %c128] : memref<256x1152xbf16, #tpu.memory_space<vmem>>, vector<256x128xbf16>
    tpu.vector_store %arg7[%c0_5, %c128], %6 {strides = array<i32>} : memref<256x1152xbf16, #tpu.memory_space<vmem>>, vector<256x128xbf16>,
    %8 = vector.extract_strided_slice %1 {offsets = [0, 2, 0], sizes = [16, 16, 128], strides = [1, 1, 1]} : vector<18x18x128xbf16> to vector<16x16x128xbf16>
    %9 = vector.shape_cast %8 : vector<16x16x128xbf16> to vector<256x128xbf16>
    %c0_6 = arith.constant 0 : index
    %c256 = arith.constant 256 : index
    %10 = vector.load %arg7[%c0_6, %c256] : memref<256x1152xbf16, #tpu.memory_space<vmem>>, vector<256x128xbf16>
    tpu.vector_store %arg7[%c0_6, %c256], %9 {strides = array<i32>} : memref<256x1152xbf16, #tpu.memory_space<vmem>>, vector<256x128xbf16>,
    %11 = vector.extract_strided_slice %1 {offsets = [1, 0, 0], sizes = [16, 16, 128], strides = [1, 1, 1]} : vector<18x18x128xbf16> to vector<16x16x128xbf16>
    %12 = vector.shape_cast %11 : vector<16x16x128xbf16> to vector<256x128xbf16>
    %c0_7 = arith.constant 0 : index
    %c384 = arith.constant 384 : index
    %13 = vector.load %arg7[%c0_7, %c384] : memref<256x1152xbf16, #tpu.memory_space<vmem>>, vector<256x128xbf16>
    tpu.vector_store %arg7[%c0_7, %c384], %12 {strides = array<i32>} : memref<256x1152xbf16, #tpu.memory_space<vmem>>, vector<256x128xbf16>,
    %14 = vector.extract_strided_slice %1 {offsets = [1, 1, 0], sizes = [16, 16, 128], strides = [1, 1, 1]} : vector<18x18x128xbf16> to vector<16x16x128xbf16>
    %15 = vector.shape_cast %14 : vector<16x16x128xbf16> to vector<256x128xbf16>
    %c0_8 = arith.constant 0 : index
    %c512 = arith.constant 512 : index
    %16 = vector.load %arg7[%c0_8, %c512] : memref<256x1152xbf16, #tpu.memory_space<vmem>>, vector<256x128xbf16>
    tpu.vector_store %arg7[%c0_8, %c512], %15 {strides = array<i32>} : memref<256x1152xbf16, #tpu.memory_space<vmem>>, vector<256x128xbf16>,
    %17 = vector.extract_strided_slice %1 {offsets = [1, 2, 0], sizes = [16, 16, 128], strides = [1, 1, 1]} : vector<18x18x128xbf16> to vector<16x16x128xbf16>
    %18 = vector.shape_cast %17 : vector<16x16x128xbf16> to vector<256x128xbf16>
    %c0_9 = arith.constant 0 : index
    %c640 = arith.constant 640 : index
    %19 = vector.load %arg7[%c0_9, %c640] : memref<256x1152xbf16, #tpu.memory_space<vmem>>, vector<256x128xbf16>
    tpu.vector_store %arg7[%c0_9, %c640], %18 {strides = array<i32>} : memref<256x1152xbf16, #tpu.memory_space<vmem>>, vector<256x128xbf16>,
    %20 = vector.extract_strided_slice %1 {offsets = [2, 0, 0], sizes = [16, 16, 128], strides = [1, 1, 1]} : vector<18x18x128xbf16> to vector<16x16x128xbf16>
    %21 = vector.shape_cast %20 : vector<16x16x128xbf16> to vector<256x128xbf16>
    %c0_10 = arith.constant 0 : index
    %c768 = arith.constant 768 : index
    %22 = vector.load %arg7[%c0_10, %c768] : memref<256x1152xbf16, #tpu.memory_space<vmem>>, vector<256x128xbf16>
    tpu.vector_store %arg7[%c0_10, %c768], %21 {strides = array<i32>} : memref<256x1152xbf16, #tpu.memory_space<vmem>>, vector<256x128xbf16>,
    %23 = vector.extract_strided_slice %1 {offsets = [2, 1, 0], sizes = [16, 16, 128], strides = [1, 1, 1]} : vector<18x18x128xbf16> to vector<16x16x128xbf16>
    %24 = vector.shape_cast %23 : vector<16x16x128xbf16> to vector<256x128xbf16>
    %c0_11 = arith.constant 0 : index
    %c896 = arith.constant 896 : index
    %25 = vector.load %arg7[%c0_11, %c896] : memref<256x1152xbf16, #tpu.memory_space<vmem>>, vector<256x128xbf16>
    tpu.vector_store %arg7[%c0_11, %c896], %24 {strides = array<i32>} : memref<256x1152xbf16, #tpu.memory_space<vmem>>, vector<256x128xbf16>,
    %26 = vector.extract_strided_slice %1 {offsets = [2, 2, 0], sizes = [16, 16, 128], strides = [1, 1, 1]} : vector<18x18x128xbf16> to vector<16x16x128xbf16>
    %27 = vector.shape_cast %26 : vector<16x16x128xbf16> to vector<256x128xbf16>
    %c0_12 = arith.constant 0 : index
    %c1024 = arith.constant 1024 : index
    %28 = vector.load %arg7[%c0_12, %c1024] : memref<256x1152xbf16, #tpu.memory_space<vmem>>, vector<256x128xbf16>
    tpu.vector_store %arg7[%c0_12, %c1024], %27 {strides = array<i32>} : memref<256x1152xbf16, #tpu.memory_space<vmem>>, vector<256x128xbf16>,
    %c0_13 = arith.constant 0 : index
    %c0_14 = arith.constant 0 : index
    %29 = vector.load %arg7[%c0_13, %c0_14] : memref<256x1152xbf16, #tpu.memory_space<vmem>>, vector<256x1152xbf16>
    %c0_15 = arith.constant 0 : index
    %c0_16 = arith.constant 0 : index
    %30 = vector.load %arg3[%c0_15, %c0_16] : memref<1152x128xbf16, #tpu.memory_space<vmem>>, vector<1152x128xbf16>
    %cst = arith.constant dense<0.000000e+00> : vector<256x128xf32>
    %31 = tpu.matmul %29, %30, %cst {dimension_numbers = #tpu.dot_dimension_numbers<[1], [0], [0], [1], [0, 0, 1, 1], [], []>} : vector<256x1152xbf16>, vector<1152x128xbf16>, vector<256x128xf32> -> vector<256x128xf32>
    %32 = vector.shape_cast %31 : vector<256x128xf32> to vector<1x16x16x128xf32>
    %33 = arith.truncf %32 : vector<1x16x16x128xf32> to vector<1x16x16x128xbf16>
    %c0_17 = arith.constant 0 : index
    %c0_18 = arith.constant 0 : index
    %c0_19 = arith.constant 0 : index
    %c0_20 = arith.constant 0 : index
    %34 = vector.load %arg4[%c0_17, %c0_18, %c0_19, %c0_20] : memref<1x16x16x128xbf16, #tpu.memory_space<vmem>>, vector<1x16x16x128xbf16>
    tpu.vector_store %arg4[%c0_17, %c0_18, %c0_19, %c0_20], %33 {strides = array<i32>} : memref<1x16x16x128xbf16, #tpu.memory_space<vmem>>, vector<1x16x16x128xbf16>,
    %cst_21 = arith.constant dense<0.000000e+00> : vector<128xf32>
    %35 = vector.multi_reduction <add>, %31, %cst_21 [0] : vector<256x128xf32> to vector<128xf32>
    %36 = vector.shape_cast %35 : vector<128xf32> to vector<1x128xf32>
    %37 = vector.shape_cast %36 : vector<1x128xf32> to vector<1x1x1x128xf32>
    %c0_22 = arith.constant 0 : index
    %c0_23 = arith.constant 0 : index
    %c0_24 = arith.constant 0 : index
    %c0_25 = arith.constant 0 : index
    %38 = vector.load %arg5[%c0_22, %c0_23, %c0_24, %c0_25] : memref<1x1x1x128xf32, #tpu.memory_space<vmem>>, vector<1x1x1x128xf32>
    tpu.vector_store %arg5[%c0_22, %c0_23, %c0_24, %c0_25], %37 {strides = array<i32>} : memref<1x1x1x128xf32, #tpu.memory_space<vmem>>, vector<1x1x1x128xf32>,
    %39 = arith.mulf %31, %31 : vector<256x128xf32>
    %cst_26 = arith.constant dense<0.000000e+00> : vector<128xf32>
    %40 = vector.multi_reduction <add>, %39, %cst_26 [0] : vector<256x128xf32> to vector<128xf32>
    %41 = vector.shape_cast %40 : vector<128xf32> to vector<1x128xf32>
    %42 = vector.shape_cast %41 : vector<1x128xf32> to vector<1x1x1x128xf32>
    %c0_27 = arith.constant 0 : index
    %c0_28 = arith.constant 0 : index
    %c0_29 = arith.constant 0 : index
    %c0_30 = arith.constant 0 : index
    %43 = vector.load %arg6[%c0_27, %c0_28, %c0_29, %c0_30] : memref<1x1x1x128xf32, #tpu.memory_space<vmem>>, vector<1x1x1x128xf32>
    tpu.vector_store %arg6[%c0_27, %c0_28, %c0_29, %c0_30], %42 {strides = array<i32>} : memref<1x1x1x128xf32, #tpu.memory_space<vmem>>, vector<1x1x1x128xf32>,
    return
  }
  func.func @transform_0(%arg0: i32, %arg1: i32) -> (i32, i32, i32, i32) {
    %c1_i32 = arith.constant 1 : i32
    %0 = arith.muli %arg0, %c1_i32 : i32
    %1 = arith.addi %0, %arg1 : i32
    %c0_i32 = arith.constant 0 : i32
    %c0_i32_0 = arith.constant 0 : i32
    %c0_i32_1 = arith.constant 0 : i32
    %c0_i32_2 = arith.constant 0 : i32
    return %1, %c0_i32, %c0_i32_0, %c0_i32_1 : i32, i32, i32, i32
  }
  func.func @transform_1(%arg0: i32, %arg1: i32) -> (i32, i32) {
    %c0_i32 = arith.constant 0 : i32
    %c0_i32_0 = arith.constant 0 : i32
    %c0_i32_1 = arith.constant 0 : i32
    return %c0_i32, %c0_i32_0 : i32, i32
  }
  func.func @transform_2(%arg0: i32, %arg1: i32) -> (i32, i32, i32, i32) {
    %c0_i32 = arith.constant 0 : i32
    %c0_i32_0 = arith.constant 0 : i32
    %c0_i32_1 = arith.constant 0 : i32
    return %arg0, %arg1, %c0_i32, %c0_i32_0 : i32, i32, i32, i32
  }
  func.func @transform_3(%arg0: i32, %arg1: i32) -> (i32, i32, i32, i32) {
    %c0_i32 = arith.constant 0 : i32
    %c0_i32_0 = arith.constant 0 : i32
    %c0_i32_1 = arith.constant 0 : i32
    return %arg0, %arg1, %c0_i32, %c0_i32_0 : i32, i32, i32, i32
  }
  func.func @transform_4(%arg0: i32, %arg1: i32) -> (i32, i32, i32, i32) {
    %c0_i32 = arith.constant 0 : i32
    %c0_i32_0 = arith.constant 0 : i32
    %c0_i32_1 = arith.constant 0 : i32
    return %arg0, %arg1, %c0_i32, %c0_i32_0 : i32, i32, i32, i32
  }
}

</mosaic_0001>

<bundles_post_ra>
// kernel: conv_bn_2d.1
= control target key start
LH: loop header
LB: loop body
LE: loop exit
PB: predicated region body
PF: predicated region fallthrough
CT: control target
= control target key end

     0   :  { %s5296_s15 = smov 0   ;;  %s5298_s16 = smov 0   ;;  %s6517_s0 = inlined_call_operand.vmem [shape: bf16[2,18,18,128], index: 0, kind: input, shape index: {}]   ;;  %s6518_s1 = inlined_call_operand.vmem [shape: bf16[1152,128], index: 1, kind: input, shape index: {}]   ;;  %s6519_s2 = inlined_call_operand.vmem [shape: bf16[2,16,16,128], index: 2, kind: output, shape index: {0}]   ;;  %s6520_s3 = inlined_call_operand.vmem [shape: f32[2,1,1,128], index: 3, kind: output, shape index: {1}]   ;;  %s6521_s4 = inlined_call_operand.vmem [shape: f32[2,1,1,128], index: 4, kind: output, shape index: {2}]  }
   0x1   :  { %s5300_s17 = smov 0  }
   0x2 LB: > { %s27_s18 = sadd.s32 1, %s5265_s16  ;;  %p4002_p0 = scmp.ge.s32.totalorder %s5269_s17, 1  ;;  %s5269_s17 = sphi %s5300_s17, %s15_s17   ;;  %s5265_s16 = sphi %s5298_s16, %s6557_s16   ;;  %s5261_s15 = sphi %s5296_s15, %s6556_s15  }
   0x3   : > { %p29_p1 = scmp.ge.s32.totalorder %s27_s18, 2  ;;  %p189_p2 = scmp.lt.s32.totalorder %s5269_s17, 3 }
   0x5   : > { %s6559_s18 = smov (%p29_p1, %s27_s18), 0  ;;  %p190_p3 = pnand %p4002_p0, %p189_p2 }
   0x7   : > { %193 = sbr.rel (%p190_p3) target bundleno = 597 (0x255), region = 28 }
   0xc   : > { %v4963_v0 = vld [vmem:[%s6518_s1 + $0x78] sm:$0xff]   ;;  %p234_p4 = scmp.lt.s32.totalorder %s5261_s15, 1  ;;  %v4965_v2 = vld [vmem:[%s6518_s1 + $0x70] sm:$0xff]   ;;  %v4967_v4 = vld [vmem:[%s6518_s1 + $0x68] sm:$0xff]   ;;  %vm849_vm0 = vcmask 1042432   ;;  %vm850_vm1 = vcmask 1046532  }
   0xd   : > { %v4964_v1 = vld [vmem:[%s6518_s1 + $0x38] sm:$0xff]   ;;  %4402 = vmatprep.subr.bf16.mxu0 %v4963_v0  ;;  %4922 = vmatprep.subr.bf16.mxu1 %v4963_v0  ;;  %v4966_v3 = vld [vmem:[%s6518_s1 + $0x30] sm:$0xff]   ;;  %v4968_v5 = vld [vmem:[%s6518_s1 + $0x28] sm:$0xff]   ;;  %vm350_vm2 = vsmask.f32 3328 }
   0xe   : > { %4403 = vmatpush3.bf16.msra.mxu0 %v4964_v1  ;;  %4930 = vmatpush3.bf16.msra.mxu1 %v4964_v1  ;;  %s6561_s15 = smov (!%p234_p4, %s5261_s15), 1  ;;  %v4969_v6 = vld [vmem:[%s6518_s1 + $0x60] sm:$0xff]   ;;  %v4971_v8 = vld [vmem:[%s6518_s1 + $0x58] sm:$0xff]   ;;  %v4973_v10 = vld [vmem:[%s6518_s1 + $0x50] sm:$0xff]   ;;  %vm351_vm3 = vsmask.f32 7440 }
   0xf   : > { %4404 = vmatprep.subr.bf16.mxu0 %v4965_v2  ;;  %4923 = vmatprep.subr.bf16.mxu1 %v4965_v2  ;;  %s4938_s7 = smul.u32 216, %s6561_s15  ;;  %v4970_v7 = vld [vmem:[%s6518_s1 + $0x20] sm:$0xff]   ;;  %v4972_v9 = vld [vmem:[%s6518_s1 + $0x18] sm:$0xff]   ;;  %v4974_v14 = vld [vmem:[%s6518_s1 + $0x10] sm:$0xff]   ;;  %s256_s24 = scalar_lea.vmem %s6520_s3, %s6561_s15 }
  0x10   : > { %v4975_v17 = vld [vmem:[%s6518_s1 + $0x48] sm:$0xff]   ;;  %vm5390_vm4 = vmor %vm849_vm0, %vm850_vm1  ;;  %v4977_v38 = vld [vmem:[%s6518_s1 + $0x40] sm:$0xff]   ;;  %s262_s27 = scalar_lea.vmem %s6521_s4, %s6561_s15 }
  0x11   : > { %s5347_s14 = scalar_lea.vmem %s6517_s0, %s4938_s7  ;;  %v4976_v32 = vld [vmem:[%s6518_s1 + $0x8] sm:$0xff]   ;;  %vm5399_vm5 = vmor %vm350_vm2, %vm351_vm3  ;;  %v4978_v55 = vld [vmem:[%s6518_s1] sm:$0xff]  }
  0x12   : > { %4405 = vmatpush3.bf16.msra.mxu0 %v4966_v3  ;;  %4931 = vmatpush3.bf16.msra.mxu1 %v4966_v3  ;;  %v264_v11 = vld [vmem:[%s5347_s14] sm:$0xf]  ;;  %v265_v12 = vld [vmem:[%s5347_s14 + $0x4] sm:$0xf]  ;;  %v5358_v13 = vld [vmem:[%s5347_s14 + $0x8] sm:$0x1] }
  0x13   : > { %4406 = vmatprep.subr.bf16.mxu0 %v4967_v4  ;;  %4924 = vmatprep.subr.bf16.mxu1 %v4967_v4  ;;  %318 = vst [vmem:[#allocation2] sm:$0xf] %v264_v11  ;;  %319 = vst [vmem:[#allocation2 + $0x24] sm:$0xf] %v265_v12  ;;  %v354_v15 = vshrl.u32 %v264_v11, 16  ;;  %v357_v16 = vshll.u32 %v264_v11, 16 }
  0x14   : > { %v363_v18 = vshll.u32 %v265_v12, 16  ;;  %v367_v19 = vshrl.u32 %v265_v12, 16  ;;  %v373_v20 = vshll.u32 %v5358_v13, 16  ;;  %v5368_v21 = vld [vmem:[%s5347_s14 + $0x90] sm:$0xf]  ;;  %v4006_v24 = vrot.slane %v264_v11, 9 }
  0x15   : > { %v356_v22 = vrot.slane %v354_v15, 4  ;;  %v359_v23 = vrot.slane %v357_v16, 5  ;;  %v854_v25 = vrot.slane %v265_v12, 5  ;;  %v5371_v26 = vld [vmem:[%s5347_s14 + $0x94] sm:$0xf]  ;;  %v857_v29 = vrot.slane %v5358_v13, 5 }
  0x16   : > { %4407 = vmatpush3.bf16.msra.mxu0 %v4968_v5  ;;  %4932 = vmatpush3.bf16.msra.mxu1 %v4968_v5  ;;  %342 = vst [vmem:[#allocation2 + $0x360] sm:$0xf] %v5368_v21  ;;  %1050 = vst [vmem:[#allocation2 + $0x324] sm:$0xf] %v5368_v21  ;;  %v365_v27 = vrot.slane %v363_v18, 5  ;;  %v369_v28 = vrot.slane %v367_v19, 4 }
  0x17   : > { %4408 = vmatprep.subr.bf16.mxu0 %v4969_v6  ;;  %4925 = vmatprep.subr.bf16.mxu1 %v4969_v6  ;;  %1182 = vst [vmem:[#allocation2 + $0x2e8] sm:$0xf] %v5368_v21  ;;  %v302_v30 = vld [vmem:[%s5347_s14 + $0x98] sm:$0x1]  ;;  %343 = vst [vmem:[#allocation2 + $0x384] sm:$0xf] %v5371_v26  ;;  %v360_v33 = vor.u32 %v359_v23, %v356_v22  ;;  %v855_v50 = vsel %vm5390_vm4, %v4006_v24, %v854_v25 }
  0x18   : > { %v642_v31 = vshrl.u32 %v5368_v21, 16  ;;  %1051 = vst [vmem:[#allocation2 + $0x348] sm:$0xf] %v5371_v26  ;;  %1183 = vst [vmem:[#allocation2 + $0x30c] sm:$0xf] %v5371_v26  ;;  %v645_v34 = vshll.u32 %v5368_v21, 16  ;;  %v370_v40 = vor.u32 %v369_v28, %v365_v27 }
  0x19   : > { %v651_v35 = vshll.u32 %v5371_v26, 16  ;;  %v655_v36 = vshrl.u32 %v5371_v26, 16  ;;  %v375_v41 = vrot.slane %v373_v20, 5  ;;  %v661_v43 = vshll.u32 %v302_v30, 16  ;;  %996 = vst [vmem:[#allocation2 + $0x8] sm:$0xf] %v855_v50 }
  0x1a   : > { %4409 = vmatpush3.bf16.msra.mxu0 %v4970_v7  ;;  %4933 = vmatpush3.bf16.msra.mxu1 %v4970_v7  ;;  %v644_v42 = vrot.slane %v642_v31, 4  ;;  %v361_v44 = vrot.slane %v360_v33, 4  ;;  %v647_v45 = vrot.slane %v645_v34, 5  ;;  %v371_v48 = vrot.slane %v370_v40, 4  ;;  %v4985_v59 = vld [vmem:[%s6518_s1 + $0xf8] sm:$0xff]  }
  0x1b   : > { %4410 = vmatprep.subr.bf16.mxu0 %v4971_v8  ;;  %4926 = vmatprep.subr.bf16.mxu1 %v4971_v8  ;;  %v653_v46 = vrot.slane %v651_v35, 5  ;;  %v657_v47 = vrot.slane %v655_v36, 4  ;;  %v663_v49 = vrot.slane %v661_v43, 5  ;;  %v856_v54 = vrot.slane %v854_v25, 4  ;;  %v4986_v60 = vld [vmem:[%s6518_s1 + $0x178] sm:$0xff]   ;;  %v4989_v36 = vld [vmem:[%s6518_s1 + $0xf0] sm:$0xff]  }
  0x1c   : > { %v366_v51 = vsel %vm5399_vm5, %v361_v44, %v365_v27  ;;  %v648_v52 = vor.u32 %v647_v45, %v644_v42  ;;  %v376_v56 = vsel %vm5399_vm5, %v371_v48, %v375_v41  ;;  %v5421_v62 = vld [vmem:[%s5347_s14 + $0xc] sm:$0xf]  ;;  %v5428_v1 = vld [vmem:[%s5347_s14 + $0x10] sm:$0xf]  ;;  %v5431_v2 = vld [vmem:[%s5347_s14 + $0x14] sm:$0x1] }
  0x1d   : > { %v658_v53 = vor.u32 %v657_v47, %v653_v46  ;;  %769 = vst [vmem:[#allocation2 + $0x4] sm:$0xf] %v366_v51  ;;  %770 = vst [vmem:[#allocation2 + $0x28] sm:$0xf] %v376_v56  ;;  %v858_v61 = vsel %vm5390_vm4, %v856_v54, %v857_v29  ;;  %v378_v3 = vshrl.u32 %v5421_v62, 16  ;;  %v381_v4 = vshll.u32 %v5421_v62, 16 }
  0x1e   : > { %4411 = vmatpush3.bf16.msra.mxu0 %v4972_v9  ;;  %4934 = vmatpush3.bf16.msra.mxu1 %v4972_v9  ;;  %v649_v57 = vrot.slane %v648_v52, 4  ;;  %997 = vst [vmem:[#allocation2 + $0x2c] sm:$0xf] %v858_v61  ;;  %320 = vst [vmem:[#allocation2 + $0x48] sm:$0xf] %v5421_v62  ;;  %v387_v5 = vshll.u32 %v5428_v1, 16 }
  0x1f   : > { %4412 = vmatprep.subr.bf16.mxu0 %v4973_v10  ;;  %4927 = vmatprep.subr.bf16.mxu1 %v4973_v10  ;;  %v659_v58 = vrot.slane %v658_v53, 4  ;;  %1028 = vst [vmem:[#allocation2 + $0xc] sm:$0xf] %v5421_v62  ;;  %321 = vst [vmem:[#allocation2 + $0x6c] sm:$0xf] %v5428_v1  ;;  %v391_v6 = vshrl.u32 %v5428_v1, 16 }
  0x20   : > { %v654_v63 = vsel %vm5399_vm5, %v649_v57, %v653_v46  ;;  %v397_v7 = vshll.u32 %v5431_v2, 16  ;;  %1029 = vst [vmem:[#allocation2 + $0x30] sm:$0xf] %v5428_v1  ;;  %v5443_v8 = vld [vmem:[%s5347_s14 + $0x9c] sm:$0xf]  ;;  %v380_v9 = vrot.slane %v378_v3, 4 }
  0x21   : > { %v664_v0 = vsel %vm5399_vm5, %v659_v58, %v663_v49  ;;  %793 = vst [vmem:[#allocation2 + $0x364] sm:$0xf] %v654_v63  ;;  %1108 = vst [vmem:[#allocation2 + $0x328] sm:$0xf] %v654_v63  ;;  %v383_v10 = vrot.slane %v381_v4, 5  ;;  %v4988_v13 = vld [vmem:[%s6518_s1 + $0x138] sm:$0xff]  }
  0x22   : > { %4413 = vmatpush3.bf16.msra.mxu0 %v4974_v14  ;;  %4935 = vmatpush3.bf16.msra.mxu1 %v4974_v14  ;;  %794 = vst [vmem:[#allocation2 + $0x388] sm:$0xf] %v664_v0  ;;  %1109 = vst [vmem:[#allocation2 + $0x34c] sm:$0xf] %v664_v0  ;;  %v5446_v11 = vld [vmem:[%s5347_s14 + $0xa0] sm:$0xf] }
  0x23   : > { %4414 = vmatprep.subr.bf16.mxu0 %v4975_v17  ;;  %4928 = vmatprep.subr.bf16.mxu1 %v4975_v17  ;;  %1240 = vst [vmem:[#allocation2 + $0x2ec] sm:$0xf] %v654_v63  ;;  %1241 = vst [vmem:[#allocation2 + $0x310] sm:$0xf] %v664_v0  ;;  %v305_v12 = vld [vmem:[%s5347_s14 + $0xa4] sm:$0x1]  ;;  %v384_v18 = vor.u32 %v383_v10, %v380_v9 }
  0x24   : > { %344 = vst [vmem:[#allocation2 + $0x3a8] sm:$0xf] %v5443_v8  ;;  %1052 = vst [vmem:[#allocation2 + $0x36c] sm:$0xf] %v5443_v8  ;;  %v389_v14 = vrot.slane %v387_v5, 5  ;;  %v393_v15 = vrot.slane %v391_v6, 4 }
  0x25   : > { %1184 = vst [vmem:[#allocation2 + $0x330] sm:$0xf] %v5443_v8  ;;  %v399_v16 = vrot.slane %v397_v7, 5  ;;  %345 = vst [vmem:[#allocation2 + $0x3cc] sm:$0xf] %v5446_v11  ;;  %v666_v17 = vshrl.u32 %v5443_v8, 16 }
  0x26   : > { %4415 = vmatpush3.bf16.msra.mxu0 %v4976_v32  ;;  %4936 = vmatpush3.bf16.msra.mxu1 %v4976_v32  ;;  %1053 = vst [vmem:[#allocation2 + $0x390] sm:$0xf] %v5446_v11  ;;  %1185 = vst [vmem:[#allocation2 + $0x354] sm:$0xf] %v5446_v11  ;;  %v669_v19 = vshll.u32 %v5443_v8, 16  ;;  %v675_v20 = vshll.u32 %v5446_v11, 16  ;;  %v394_v25 = vor.u32 %v393_v15, %v389_v14 }
  0x27   : > { %4416 = vmatprep.subr.bf16.mxu0 %v4977_v38  ;;  %4929 = vmatprep.subr.bf16.mxu1 %v4977_v38  ;;  %v679_v22 = vshrl.u32 %v5446_v11, 16  ;;  %v4979_v23 = vld [vmem:[#allocation2] ss:$36 sps:$4 sm:$0xff]   ;;  %v668_v27 = vrot.slane %v666_v17, 4  ;;  %v385_v28 = vrot.slane %v384_v18, 4  ;;  %v4987_v32 = vld [vmem:[%s6518_s1 + $0xb8] sm:$0xff]  }
  0x28   : > { %v4981_v24 = vld [vmem:[#allocation2 + $0x4] ss:$36 sps:$4 sm:$0xff]   ;;  %v671_v29 = vrot.slane %v669_v19, 5  ;;  %v677_v30 = vrot.slane %v675_v20, 5  ;;  %v395_v33 = vrot.slane %v394_v25, 4  ;;  %v685_v34 = vshll.u32 %v305_v12, 16 }
  0x29   : > { %v681_v31 = vrot.slane %v679_v22, 4  ;;  %2800 = vmatprep.mubr.bf16.mxu0 %v4981_v24  ;;  %v4982_v35 = vld [vmem:[#allocation2 + $0x360] ss:$36 sps:$4 sm:$0xff]   ;;  %v390_v38 = vsel %vm5399_vm5, %v385_v28, %v389_v14  ;;  %v4007_v42 = vrot.slane %v5421_v62, 9  ;;  %v5000_v46 = vld [vmem:[%s6518_s1 + $0x170] sm:$0xff]   ;;  %v4997_v52 = vld [vmem:[%s6518_s1 + $0xe8] sm:$0xff]  }
  0x2a   : > { %4417 = vmatpush3.bf16.msra.mxu0 %v4978_v55  ;;  %4937 = vmatpush3.bf16.msra.mxu1 %v4978_v55  ;;  %v672_v40 = vor.u32 %v671_v29, %v668_v27  ;;  %v4984_v43 = vld [vmem:[#allocation2 + $0x364] ss:$36 sps:$4 sm:$0xff]   ;;  %v400_v44 = vsel %vm5399_vm5, %v395_v33, %v399_v16  ;;  %771 = vst [vmem:[#allocation2 + $0x4c] sm:$0xf] %v390_v38  ;;  %1086 = vst [vmem:[#allocation2 + $0x10] sm:$0xf] %v390_v38 }
  0x2b   : > { %4514 = vmatprep.subr.bf16.mxu1 %v4985_v59  ;;  %4626 = vmatprep.subr.bf16.mxu0 %v4986_v60  ;;  %v682_v41 = vor.u32 %v681_v31, %v677_v30  ;;  %v687_v45 = vrot.slane %v685_v34, 5  ;;  %772 = vst [vmem:[#allocation2 + $0x70] sm:$0xf] %v400_v44  ;;  %1087 = vst [vmem:[#allocation2 + $0x34] sm:$0xf] %v400_v44  ;;  %v4990_v49 = vld [vmem:[%s6518_s1 + $0xb0] sm:$0xff]  }
  0x2c   : > { %v673_v47 = vrot.slane %v672_v40, 4  ;;  %2896 = vmatprep.mubr.bf16.mxu1 %v4984_v43  ;;  %v5002_v53 = vld [vmem:[%s6518_s1 + $0x130] sm:$0xff]   ;;  %v5490_v54 = vld [vmem:[%s5347_s14 + $0x18] sm:$0xf]  ;;  %v5493_v55 = vld [vmem:[%s5347_s14 + $0x1c] sm:$0xf] }
  0x2d   : > { %2801 = vmatmul.mubr.bf16.vlgmr.msra.gmra.mxu0 %v4979_v23  ;;  %v683_v48 = vrot.slane %v682_v41, 4  ;;  %2897 = vmatmul.mubr.bf16.vlgmr.msra.gmra.mxu1 %v4982_v35  ;;  %v861_v56 = vrot.slane %v5428_v1, 5  ;;  %v5497_v57 = vld [vmem:[%s5347_s14 + $0x20] sm:$0x1]  ;;  %322 = vst [vmem:[#allocation2 + $0x90] sm:$0xf] %v5490_v54 }
  0x2e   : > { %4627 = vmatpush3.bf16.msra.mxu0 %v4988_v13  ;;  %v678_v50 = vsel %vm5399_vm5, %v673_v47, %v677_v30  ;;  %4515 = vmatpush3.bf16.msra.mxu1 %v4987_v32  ;;  %323 = vst [vmem:[#allocation2 + $0xb4] sm:$0xf] %v5493_v55  ;;  %v402_v58 = vshrl.u32 %v5490_v54, 16  ;;  %v405_v59 = vshll.u32 %v5490_v54, 16  ;;  %v411_v60 = vshll.u32 %v5493_v55, 16  ;;  %v4998_v62 = vld [vmem:[%s6518_s1 + $0xa8] sm:$0xff]  }
  0x2f   : > { %4628 = vmatprep.subr.bf16.mxu0 %v5000_v46  ;;  %v688_v51 = vsel %vm5399_vm5, %v683_v48, %v687_v45  ;;  %795 = vst [vmem:[#allocation2 + $0x3ac] sm:$0xf] %v678_v50  ;;  %1110 = vst [vmem:[#allocation2 + $0x370] sm:$0xf] %v678_v50  ;;  %4516 = vmatprep.subr.bf16.mxu1 %v4989_v36  ;;  %v415_v61 = vshrl.u32 %v5493_v55, 16  ;;  %v421_v63 = vshll.u32 %v5497_v57, 16 }
  0x30   : > { %796 = vst [vmem:[#allocation2 + $0x3d0] sm:$0xf] %v688_v51  ;;  %1111 = vst [vmem:[#allocation2 + $0x394] sm:$0xf] %v688_v51  ;;  %v5514_v0 = vld [vmem:[%s5347_s14 + $0xa8] sm:$0xf]  ;;  %v862_v4 = vsel %vm5390_vm4, %v4007_v42, %v861_v56 }
  0x31   : > { %1242 = vst [vmem:[#allocation2 + $0x334] sm:$0xf] %v678_v50  ;;  %1243 = vst [vmem:[#allocation2 + $0x358] sm:$0xf] %v688_v51  ;;  %v5517_v3 = vld [vmem:[%s5347_s14 + $0xac] sm:$0xf] }
  0x32   : > { %1030 = vst [vmem:[#allocation2 + $0x54] sm:$0xf] %v5490_v54  ;;  %1031 = vst [vmem:[#allocation2 + $0x78] sm:$0xf] %v5493_v55  ;;  %4629 = vmatpush3.bf16.msra.mxu0 %v5002_v53  ;;  %v4999_v5 = vld [vmem:[%s6518_s1 + $0xe0] sm:$0xff]   ;;  %v404_v6 = vrot.slane %v402_v58, 4  ;;  %4517 = vmatpush3.bf16.msra.mxu1 %v4990_v49 }
  0x33   : > { %1162 = vst [vmem:[#allocation2 + $0x18] sm:$0xf] %v5490_v54  ;;  %1163 = vst [vmem:[#allocation2 + $0x3c] sm:$0xf] %v5493_v55  ;;  %v407_v7 = vrot.slane %v405_v59, 5  ;;  %v413_v9 = vrot.slane %v411_v60, 5  ;;  %4518 = vmatprep.subr.bf16.mxu1 %v4997_v52 }
  0x34   : > { %v417_v10 = vrot.slane %v415_v61, 4  ;;  %346 = vst [vmem:[#allocation2 + $0x3f0] sm:$0xf] %v5514_v0  ;;  %347 = vst [vmem:[#allocation2 + $0x414] sm:$0xf] %v5517_v3  ;;  %v423_v14 = vrot.slane %v421_v63, 5 }
  0x35   : > { %1054 = vst [vmem:[#allocation2 + $0x3b4] sm:$0xf] %v5514_v0  ;;  %1055 = vst [vmem:[#allocation2 + $0x3d8] sm:$0xf] %v5517_v3  ;;  %v4991_v12 = vld [vmem:[#allocation2 + $0x4c] ss:$36 sps:$4 sm:$0xff]   ;;  %v408_v15 = vor.u32 %v407_v7, %v404_v6 }
  0x36   : > { %1186 = vst [vmem:[#allocation2 + $0x378] sm:$0xf] %v5514_v0  ;;  %1187 = vst [vmem:[#allocation2 + $0x39c] sm:$0xf] %v5517_v3  ;;  %v4995_v13 = vld [vmem:[#allocation2 + $0x48] ss:$36 sps:$4 sm:$0xff]   ;;  %v418_v16 = vor.u32 %v417_v10, %v413_v9  ;;  %2808 = vmatprep.mubr.bf16.mxu0 %v4991_v12  ;;  %4519 = vmatpush3.bf16.msra.mxu1 %v4998_v62 }
  0x37   : > { %998 = vst [vmem:[#allocation2 + $0x50] sm:$0xf] %v862_v4  ;;  %1130 = vst [vmem:[#allocation2 + $0x14] sm:$0xf] %v862_v4  ;;  %v308_v17 = vld [vmem:[%s5347_s14 + $0xb0] sm:$0x1]  ;;  %2809 = vmatmul.mubr.bf16.gmra.mxu0 %v4995_v13  ;;  %4520 = vmatprep.subr.bf16.mxu1 %v4999_v5 }
  0x38   : > { %v690_v18 = vshrl.u32 %v5514_v0, 16  ;;  %v693_v19 = vshll.u32 %v5514_v0, 16  ;;  %v5001_v20 = vld [vmem:[%s6518_s1 + $0xa0] sm:$0xff]   ;;  %v699_v22 = vshll.u32 %v5517_v3, 16  ;;  %v703_v23 = vshrl.u32 %v5517_v3, 16  ;;  %v5009_v40 = vld [vmem:[%s6518_s1 + $0xd8] sm:$0xff]  }
  0x39   : > { %v709_v24 = vshll.u32 %v308_v17, 16  ;;  %v864_v25 = vrot.slane %v5431_v2, 5  ;;  %v4993_v27 = vld [vmem:[#allocation2 + $0x3ac] ss:$36 sps:$4 sm:$0xff]   ;;  %v409_v28 = vrot.slane %v408_v15, 4  ;;  %v419_v29 = vrot.slane %v418_v16, 4 }
  0x3a   : > { %v4996_v30 = vld [vmem:[#allocation2 + $0x3a8] ss:$36 sps:$4 sm:$0xff]   ;;  %v692_v31 = vrot.slane %v690_v18, 4  ;;  %v695_v32 = vrot.slane %v693_v19, 5  ;;  %v701_v33 = vrot.slane %v699_v22, 5  ;;  %v705_v34 = vrot.slane %v703_v23, 4  ;;  %2904 = vmatprep.mubr.bf16.mxu1 %v4993_v27  ;;  %4521 = vmatpush3.bf16.msra.mxu1 %v5001_v20 }
  0x3b   : > { %v414_v35 = vsel %vm5399_vm5, %v409_v28, %v413_v9  ;;  %v424_v36 = vsel %vm5399_vm5, %v419_v29, %v423_v14  ;;  %v711_v38 = vrot.slane %v709_v24, 5  ;;  %2905 = vmatmul.mubr.bf16.gmra.mxu1 %v4996_v30  ;;  %v5010_v43 = vld [vmem:[%s6518_s1 + $0x98] sm:$0xff]   ;;  %v5552_v44 = vld [vmem:[%s5347_s14 + $0x24] sm:$0xf]  ;;  %v5555_v45 = vld [vmem:[%s5347_s14 + $0x28] sm:$0xf]  ;;  %4522 = vmatprep.subr.bf16.mxu1 %v5009_v40 }
  0x3c   : > { %773 = vst [vmem:[#allocation2 + $0x94] sm:$0xf] %v414_v35  ;;  %774 = vst [vmem:[#allocation2 + $0xb8] sm:$0xf] %v424_v36  ;;  %v696_v41 = vor.u32 %v695_v32, %v692_v31  ;;  %v706_v42 = vor.u32 %v705_v34, %v701_v33  ;;  %v5558_v48 = vld [vmem:[%s5347_s14 + $0x2c] sm:$0x1] }
  0x3d   : > { %1088 = vst [vmem:[#allocation2 + $0x58] sm:$0xf] %v414_v35  ;;  %1089 = vst [vmem:[#allocation2 + $0x7c] sm:$0xf] %v424_v36  ;;  %v426_v49 = vshrl.u32 %v5552_v44, 16  ;;  %v429_v50 = vshll.u32 %v5552_v44, 16 }
  0x3e   : > { %1220 = vst [vmem:[#allocation2 + $0x1c] sm:$0xf] %v414_v35  ;;  %1221 = vst [vmem:[#allocation2 + $0x40] sm:$0xf] %v424_v36  ;;  %v697_v46 = vrot.slane %v696_v41, 4  ;;  %v707_v47 = vrot.slane %v706_v42, 4  ;;  %4523 = vmatpush3.bf16.msra.mxu1 %v5010_v43 }
  0x3f   : > { %324 = vst [vmem:[#allocation2 + $0xd8] sm:$0xf] %v5552_v44  ;;  %325 = vst [vmem:[#allocation2 + $0xfc] sm:$0xf] %v5555_v45  ;;  %v5011_v51 = vld [vmem:[%s6518_s1 + $0xd0] sm:$0xff]   ;;  %v435_v52 = vshll.u32 %v5555_v45, 16 }
  0x40   : > { %1032 = vst [vmem:[#allocation2 + $0x9c] sm:$0xf] %v5552_v44  ;;  %1033 = vst [vmem:[#allocation2 + $0xc0] sm:$0xf] %v5555_v45  ;;  %v439_v53 = vshrl.u32 %v5555_v45, 16  ;;  %v445_v58 = vshll.u32 %v5558_v48, 16  ;;  %v702_v60 = vsel %vm5399_vm5, %v697_v46, %v701_v33  ;;  %v712_v61 = vsel %vm5399_vm5, %v707_v47, %v711_v38  ;;  %4524 = vmatprep.subr.bf16.mxu1 %v5011_v51 }
  0x41   : > { %1164 = vst [vmem:[#allocation2 + $0x60] sm:$0xf] %v5552_v44  ;;  %1165 = vst [vmem:[#allocation2 + $0x84] sm:$0xf] %v5555_v45  ;;  %v5575_v59 = vld [vmem:[%s5347_s14 + $0xb4] sm:$0xf] }
  0x42   : > { %v5012_v62 = vld [vmem:[%s6518_s1 + $0x90] sm:$0xff]   ;;  %v428_v63 = vrot.slane %v426_v49, 4  ;;  %v431_v4 = vrot.slane %v429_v50, 5  ;;  %v5585_v5 = vld [vmem:[%s5347_s14 + $0xb8] sm:$0xf]  ;;  %v437_v7 = vrot.slane %v435_v52, 5 }
  0x43   : > { %v311_v6 = vld [vmem:[%s5347_s14 + $0xbc] sm:$0x1]  ;;  %348 = vst [vmem:[#allocation2 + $0x438] sm:$0xf] %v5575_v59  ;;  %1056 = vst [vmem:[#allocation2 + $0x3fc] sm:$0xf] %v5575_v59  ;;  %4525 = vmatpush3.bf16.msra.mxu1 %v5012_v62 }
  0x44   : > { %1188 = vst [vmem:[#allocation2 + $0x3c0] sm:$0xf] %v5575_v59  ;;  %797 = vst [vmem:[#allocation2 + $0x3f4] sm:$0xf] %v702_v60  ;;  %v441_v9 = vrot.slane %v439_v53, 4  ;;  %v447_v10 = vrot.slane %v445_v58, 5  ;;  %v432_v14 = vor.u32 %v431_v4, %v428_v63 }
  0x45   : > { %798 = vst [vmem:[#allocation2 + $0x418] sm:$0xf] %v712_v61  ;;  %1112 = vst [vmem:[#allocation2 + $0x3b8] sm:$0xf] %v702_v60  ;;  %v714_v12 = vshrl.u32 %v5575_v59, 16  ;;  %v5019_v13 = vld [vmem:[%s6518_s1 + $0xc8] sm:$0xff]  }
  0x46   : > { %1113 = vst [vmem:[#allocation2 + $0x3dc] sm:$0xf] %v712_v61  ;;  %1244 = vst [vmem:[#allocation2 + $0x37c] sm:$0xf] %v702_v60  ;;  %v717_v15 = vshll.u32 %v5575_v59, 16  ;;  %v723_v16 = vshll.u32 %v5585_v5, 16  ;;  %v442_v20 = vor.u32 %v441_v9, %v437_v7  ;;  %4526 = vmatprep.subr.bf16.mxu1 %v5019_v13 }
  0x47   : > { %1245 = vst [vmem:[#allocation2 + $0x3a0] sm:$0xf] %v712_v61  ;;  %349 = vst [vmem:[#allocation2 + $0x45c] sm:$0xf] %v5585_v5  ;;  %v727_v17 = vshrl.u32 %v5585_v5, 16  ;;  %v5020_v18 = vld [vmem:[%s6518_s1 + $0x168] sm:$0xff]  }
  0x48   : > { %1057 = vst [vmem:[#allocation2 + $0x420] sm:$0xf] %v5585_v5  ;;  %1189 = vst [vmem:[#allocation2 + $0x3e4] sm:$0xf] %v5585_v5  ;;  %v5003_v19 = vld [vmem:[#allocation2 + $0x94] ss:$36 sps:$4 sm:$0xff]   ;;  %4630 = vmatprep.subr.bf16.mxu0 %v5020_v18 }
  0x49   : > { %v716_v22 = vrot.slane %v714_v12, 4  ;;  %v733_v23 = vshll.u32 %v311_v6, 16  ;;  %v5007_v24 = vld [vmem:[#allocation2 + $0x90] ss:$36 sps:$4 sm:$0xff]   ;;  %v433_v27 = vrot.slane %v432_v14, 4  ;;  %v719_v28 = vrot.slane %v717_v15, 5  ;;  %2816 = vmatprep.mubr.bf16.mxu0 %v5003_v19 }
  0x4a   : > { %v725_v29 = vrot.slane %v723_v16, 5  ;;  %v729_v30 = vrot.slane %v727_v17, 4  ;;  %v443_v31 = vrot.slane %v442_v20, 4  ;;  %2817 = vmatmul.mubr.bf16.gmra.mxu0 %v5007_v24  ;;  %v5021_v36 = vld [vmem:[%s6518_s1 + $0x88] sm:$0xff]   ;;  %v863_v38 = vrot.slane %v861_v56, 4  ;;  %v5023_v2 = vld [vmem:[%s6518_s1 + $0xc0] sm:$0xff]  }
  0x4b   : > { %v735_v32 = vrot.slane %v733_v23, 5  ;;  %v438_v33 = vsel %vm5399_vm5, %v433_v27, %v437_v7  ;;  %v720_v34 = vor.u32 %v719_v28, %v716_v22  ;;  %v5022_v41 = vld [vmem:[%s6518_s1 + $0x128] sm:$0xff]   ;;  %v4008_v42 = vrot.slane %v5490_v54, 9  ;;  %v5008_v47 = vld [vmem:[#allocation2 + $0x3f0] ss:$36 sps:$4 sm:$0xff]   ;;  %4527 = vmatpush3.bf16.msra.mxu1 %v5021_v36  ;;  %v5024_v50 = vld [vmem:[%s6518_s1 + $0x80] sm:$0xff]  }
  0x4c   : > { %v730_v35 = vor.u32 %v729_v30, %v725_v29  ;;  %v448_v40 = vsel %vm5399_vm5, %v443_v31, %v447_v10  ;;  %775 = vst [vmem:[#allocation2 + $0xdc] sm:$0xf] %v438_v33  ;;  %1090 = vst [vmem:[#allocation2 + $0xa0] sm:$0xf] %v438_v33  ;;  %v5005_v43 = vld [vmem:[#allocation2 + $0x3f4] ss:$36 sps:$4 sm:$0xff]   ;;  %v865_v56 = vsel %vm5390_vm4, %v863_v38, %v864_v25  ;;  %4631 = vmatpush3.bf16.msra.mxu0 %v5022_v41 }
  0x4d   : > { %1222 = vst [vmem:[#allocation2 + $0x64] sm:$0xf] %v438_v33  ;;  %776 = vst [vmem:[#allocation2 + $0x100] sm:$0xf] %v448_v40  ;;  %v721_v46 = vrot.slane %v720_v34, 4  ;;  %2912 = vmatprep.mubr.bf16.mxu1 %v5005_v43  ;;  %v868_v25 = vrot.slane %v5493_v55, 5  ;;  %4528 = vmatprep.subr.bf16.mxu1 %v5023_v2 }
  0x4e   : > { %1091 = vst [vmem:[#allocation2 + $0xc4] sm:$0xf] %v448_v40  ;;  %1223 = vst [vmem:[#allocation2 + $0x88] sm:$0xf] %v448_v40  ;;  %v731_v1 = vrot.slane %v730_v35, 4  ;;  %2913 = vmatmul.mubr.bf16.gmra.mxu1 %v5008_v47  ;;  %v871_v53 = vrot.slane %v5497_v57, 5 }
  0x4f   : > { %999 = vst [vmem:[#allocation2 + $0x74] sm:$0xf] %v865_v56  ;;  %1131 = vst [vmem:[#allocation2 + $0x38] sm:$0xf] %v865_v56  ;;  %v726_v54 = vsel %vm5399_vm5, %v721_v46, %v725_v29  ;;  %v5633_v51 = vld [vmem:[%s5347_s14 + $0x30] sm:$0xf]  ;;  %v869_v63 = vsel %vm5390_vm4, %v4008_v42, %v868_v25  ;;  %4529 = vmatpush3.bf16.msra.mxu1 %v5024_v50 }
  0x50   : > { %v736_v49 = vsel %vm5399_vm5, %v731_v1, %v735_v32  ;;  %799 = vst [vmem:[#allocation2 + $0x43c] sm:$0xf] %v726_v54  ;;  %1114 = vst [vmem:[#allocation2 + $0x400] sm:$0xf] %v726_v54  ;;  %v5636_v52 = vld [vmem:[%s5347_s14 + $0x34] sm:$0xf] }
  0x51   : > { %800 = vst [vmem:[#allocation2 + $0x460] sm:$0xf] %v736_v49  ;;  %1115 = vst [vmem:[#allocation2 + $0x424] sm:$0xf] %v736_v49  ;;  %v5640_v58 = vld [vmem:[%s5347_s14 + $0x38] sm:$0x1] }
  0x52   : > { %1246 = vst [vmem:[#allocation2 + $0x3c4] sm:$0xf] %v726_v54  ;;  %1247 = vst [vmem:[#allocation2 + $0x3e8] sm:$0xf] %v736_v49  ;;  %v450_v55 = vshrl.u32 %v5633_v51, 16  ;;  %v453_v60 = vshll.u32 %v5633_v51, 16 }
  0x53   : > { %326 = vst [vmem:[#allocation2 + $0x120] sm:$0xf] %v5633_v51  ;;  %327 = vst [vmem:[#allocation2 + $0x144] sm:$0xf] %v5636_v52  ;;  %v459_v61 = vshll.u32 %v5636_v52, 16  ;;  %v463_v62 = vshrl.u32 %v5636_v52, 16 }
  0x54   : > { %1034 = vst [vmem:[#allocation2 + $0xe4] sm:$0xf] %v5633_v51  ;;  %1035 = vst [vmem:[#allocation2 + $0x108] sm:$0xf] %v5636_v52  ;;  %v469_v57 = vshll.u32 %v5640_v58, 16  ;;  %v870_v4 = vrot.slane %v868_v25, 4 }
  0x55   : > { %1166 = vst [vmem:[#allocation2 + $0xa8] sm:$0xf] %v5633_v51  ;;  %1167 = vst [vmem:[#allocation2 + $0xcc] sm:$0xf] %v5636_v52  ;;  %v452_v6 = vrot.slane %v450_v55, 4  ;;  %v455_v7 = vrot.slane %v453_v60, 5 }
  0x56   : > { %v461_v9 = vrot.slane %v459_v61, 5  ;;  %v465_v10 = vrot.slane %v463_v62, 4  ;;  %v5031_v12 = vld [vmem:[%s6518_s1 + $0x1f8] sm:$0xff]   ;;  %1000 = vst [vmem:[#allocation2 + $0x98] sm:$0xf] %v869_v63  ;;  %v471_v15 = vrot.slane %v469_v57, 5  ;;  %v872_v16 = vsel %vm5390_vm4, %v870_v4, %v871_v53 }
  0x57   : > { %1132 = vst [vmem:[#allocation2 + $0x5c] sm:$0xf] %v869_v63  ;;  %1264 = vst [vmem:[#allocation2 + $0x20] sm:$0xf] %v869_v63  ;;  %v5013_v13 = vld [vmem:[#allocation2 + $0xdc] ss:$36 sps:$4 sm:$0xff]   ;;  %v456_v17 = vor.u32 %v455_v7, %v452_v6  ;;  %4738 = vmatprep.subr.bf16.mxu1 %v5031_v12 }
  0x58   : > { %v5017_v14 = vld [vmem:[#allocation2 + $0xd8] ss:$36 sps:$4 sm:$0xff]   ;;  %v466_v18 = vor.u32 %v465_v10, %v461_v9  ;;  %v5029_v19 = vld [vmem:[#allocation2 + $0xc] ss:$36 sps:$4 sm:$0xff]   ;;  %1001 = vst [vmem:[#allocation2 + $0xbc] sm:$0xf] %v872_v16  ;;  %2824 = vmatprep.mubr.bf16.mxu0 %v5013_v13 }
  0x59   : > { %1133 = vst [vmem:[#allocation2 + $0x80] sm:$0xf] %v872_v16  ;;  %1265 = vst [vmem:[#allocation2 + $0x44] sm:$0xf] %v872_v16  ;;  %v4009_v20 = vrot.slane %v5552_v44, 9  ;;  %2825 = vmatmul.mubr.bf16.gmra.mxu0 %v5017_v14  ;;  %v457_v23 = vrot.slane %v456_v17, 4 }
  0x5a   : > { %v5015_v22 = vld [vmem:[#allocation2 + $0x43c] ss:$36 sps:$4 sm:$0xff]   ;;  %v467_v24 = vrot.slane %v466_v18, 4  ;;  %v875_v44 = vrot.slane %v5555_v45, 5  ;;  %v878_v34 = vrot.slane %v5558_v48, 5 }
  0x5b   : > { %v5018_v27 = vld [vmem:[#allocation2 + $0x438] ss:$36 sps:$4 sm:$0xff]   ;;  %2920 = vmatprep.mubr.bf16.mxu1 %v5015_v22  ;;  %v462_v28 = vsel %vm5399_vm5, %v457_v23, %v461_v9  ;;  %v5033_v30 = vld [vmem:[%s6518_s1 + $0x160] sm:$0xff]   ;;  %v5027_v48 = vld [vmem:[#allocation2 + $0x8] ss:$36 sps:$4 sm:$0xff]  }
  0x5c   : > { %v472_v29 = vsel %vm5399_vm5, %v467_v24, %v471_v15  ;;  %2921 = vmatmul.mubr.bf16.gmra.mxu1 %v5018_v27  ;;  %777 = vst [vmem:[#allocation2 + $0x124] sm:$0xf] %v462_v28  ;;  %1092 = vst [vmem:[#allocation2 + $0xe8] sm:$0xf] %v462_v28  ;;  %v5034_v31 = vld [vmem:[%s6518_s1 + $0x120] sm:$0xff]   ;;  %4632 = vmatprep.subr.bf16.mxu0 %v5033_v30  ;;  %v876_v42 = vsel %vm5390_vm4, %v4009_v20, %v875_v44  ;;  %v877_v43 = vrot.slane %v875_v44, 4 }
  0x5d   : > { %778 = vst [vmem:[#allocation2 + $0x148] sm:$0xf] %v472_v29  ;;  %1093 = vst [vmem:[#allocation2 + $0x10c] sm:$0xf] %v472_v29  ;;  %v5673_v32 = vld [vmem:[%s5347_s14 + $0x3c] sm:$0xf]  ;;  %2961 = vmatprep.mubr.bf16.mxu1 %v5029_v19  ;;  %4633 = vmatpush3.bf16.msra.mxu0 %v5034_v31 }
  0x5e   : > { %1224 = vst [vmem:[#allocation2 + $0xac] sm:$0xf] %v462_v28  ;;  %1225 = vst [vmem:[#allocation2 + $0xd0] sm:$0xf] %v472_v29  ;;  %v5676_v33 = vld [vmem:[%s5347_s14 + $0x40] sm:$0xf]  ;;  %v879_v50 = vsel %vm5390_vm4, %v877_v43, %v878_v34 }
  0x5f   : > { %v5680_v45 = vld [vmem:[%s5347_s14 + $0x44] sm:$0x1]  ;;  %328 = vst [vmem:[#allocation2 + $0x168] sm:$0xf] %v5673_v32  ;;  %329 = vst [vmem:[#allocation2 + $0x18c] sm:$0xf] %v5676_v33 }
  0x60   : > { %v474_v35 = vshrl.u32 %v5673_v32, 16  ;;  %v477_v36 = vshll.u32 %v5673_v32, 16  ;;  %v483_v38 = vshll.u32 %v5676_v33, 16  ;;  %v487_v40 = vshrl.u32 %v5676_v33, 16  ;;  %1036 = vst [vmem:[#allocation2 + $0x12c] sm:$0xf] %v5673_v32 }
  0x61   : > { %1037 = vst [vmem:[#allocation2 + $0x150] sm:$0xf] %v5676_v33  ;;  %1168 = vst [vmem:[#allocation2 + $0xf0] sm:$0xf] %v5673_v32  ;;  %v493_v41 = vshll.u32 %v5680_v45, 16  ;;  %v5032_v46 = vld [vmem:[%s6518_s1 + $0x1b8] sm:$0xff]  }
  0x62   : > { %1169 = vst [vmem:[#allocation2 + $0x114] sm:$0xf] %v5676_v33  ;;  %v476_v1 = vrot.slane %v474_v35, 4  ;;  %v479_v56 = vrot.slane %v477_v36, 5  ;;  %v485_v47 = vrot.slane %v483_v38, 5  ;;  %v489_v54 = vrot.slane %v487_v40, 4 }
  0x63   : > { %1002 = vst [vmem:[#allocation2 + $0xe0] sm:$0xf] %v876_v42  ;;  %1266 = vst [vmem:[#allocation2 + $0x68] sm:$0xf] %v876_v42  ;;  %v495_v49 = vrot.slane %v493_v41, 5  ;;  %v5047_v57 = vld [vmem:[%s6518_s1 + $0x158] sm:$0xff]  }
  0x64   : > { %1134 = vst [vmem:[#allocation2 + $0xa4] sm:$0xf] %v876_v42  ;;  %v5699_v2 = vld [vmem:[%s5347_s14 + $0x48] sm:$0xf]  ;;  %v5702_v25 = vld [vmem:[%s5347_s14 + $0x4c] sm:$0xf]  ;;  %v480_v53 = vor.u32 %v479_v56, %v476_v1  ;;  %v490_v55 = vor.u32 %v489_v54, %v485_v47  ;;  %4634 = vmatprep.subr.bf16.mxu0 %v5047_v57  ;;  %2962 = vmatmul.mubr.bf16.vlgmr.msra.gmra.mxu1 %v5027_v48 }
  0x65   : > { %v5707_v60 = vld [vmem:[%s5347_s14 + $0x50] sm:$0x1]  ;;  %330 = vst [vmem:[#allocation2 + $0x1b0] sm:$0xf] %v5699_v2  ;;  %331 = vst [vmem:[#allocation2 + $0x1d4] sm:$0xf] %v5702_v25  ;;  %4739 = vmatpush3.bf16.msra.mxu1 %v5032_v46 }
  0x66   : > { %v498_v61 = vshrl.u32 %v5699_v2, 16  ;;  %v501_v62 = vshll.u32 %v5699_v2, 16  ;;  %1038 = vst [vmem:[#allocation2 + $0x174] sm:$0xf] %v5699_v2  ;;  %1039 = vst [vmem:[#allocation2 + $0x198] sm:$0xf] %v5702_v25 }
  0x67   : > { %1170 = vst [vmem:[#allocation2 + $0x138] sm:$0xf] %v5699_v2  ;;  %1171 = vst [vmem:[#allocation2 + $0x15c] sm:$0xf] %v5702_v25  ;;  %v5037_v63 = vld [vmem:[#allocation2 + $0x54] ss:$36 sps:$4 sm:$0xff]  }
  0x68   : > { %1003 = vst [vmem:[#allocation2 + $0x104] sm:$0xf] %v879_v50  ;;  %1267 = vst [vmem:[#allocation2 + $0x8c] sm:$0xf] %v879_v50  ;;  %v507_v4 = vshll.u32 %v5702_v25, 16  ;;  %v511_v6 = vshrl.u32 %v5702_v25, 16  ;;  %2969 = vmatprep.mubr.bf16.mxu1 %v5037_v63 }
  0x69   : > { %1135 = vst [vmem:[#allocation2 + $0xc8] sm:$0xf] %v879_v50  ;;  %v517_v7 = vshll.u32 %v5707_v60, 16  ;;  %v5048_v9 = vld [vmem:[%s6518_s1 + $0x1f0] sm:$0xff]   ;;  %v5025_v10 = vld [vmem:[#allocation2 + $0x124] ss:$36 sps:$4 sm:$0xff]  }
  0x6a   : > { %v481_v12 = vrot.slane %v480_v53, 4  ;;  %v491_v13 = vrot.slane %v490_v55, 4  ;;  %v5030_v14 = vld [vmem:[#allocation2 + $0x120] ss:$36 sps:$4 sm:$0xff]   ;;  %v500_v15 = vrot.slane %v498_v61, 4  ;;  %v503_v16 = vrot.slane %v501_v62, 5  ;;  %2832 = vmatprep.mubr.bf16.mxu0 %v5025_v10  ;;  %4740 = vmatprep.subr.bf16.mxu1 %v5048_v9 }
  0x6b   : > { %v509_v17 = vrot.slane %v507_v4, 5  ;;  %v513_v18 = vrot.slane %v511_v6, 4  ;;  %v519_v22 = vrot.slane %v517_v7, 5  ;;  %v5049_v23 = vld [vmem:[%s6518_s1 + $0x118] sm:$0xff]   ;;  %2833 = vmatmul.mubr.bf16.gmra.mxu0 %v5030_v14  ;;  %v5040_v24 = vld [vmem:[#allocation2 + $0x50] ss:$36 sps:$4 sm:$0xff]  }
  0x6c   : > { %v486_v19 = vsel %vm5399_vm5, %v481_v12, %v485_v47  ;;  %v496_v20 = vsel %vm5399_vm5, %v491_v13, %v495_v49  ;;  %v504_v27 = vor.u32 %v503_v16, %v500_v15  ;;  %v5043_v29 = vld [vmem:[#allocation2 + $0x9c] ss:$36 sps:$4 sm:$0xff]   ;;  %4635 = vmatpush3.bf16.msra.mxu0 %v5049_v23  ;;  %v5050_v31 = vld [vmem:[%s6518_s1 + $0x1b0] sm:$0xff]   ;;  %v5740_v35 = vld [vmem:[%s5347_s14 + $0x58] sm:$0xf]  ;;  %2970 = vmatmul.mubr.bf16.gmra.mxu1 %v5040_v24  ;;  %v4010_v63 = vrot.slane %v5633_v51, 9 }
  0x6d   : > { %779 = vst [vmem:[#allocation2 + $0x16c] sm:$0xf] %v486_v19  ;;  %780 = vst [vmem:[#allocation2 + $0x190] sm:$0xf] %v496_v20  ;;  %v514_v28 = vor.u32 %v513_v18, %v509_v17  ;;  %v5737_v34 = vld [vmem:[%s5347_s14 + $0x54] sm:$0xf]  ;;  %4741 = vmatpush3.bf16.msra.mxu1 %v5050_v31  ;;  %2977 = vmatprep.mubr.bf16.mxu1 %v5043_v29 }
  0x6e   : > { %1094 = vst [vmem:[#allocation2 + $0x130] sm:$0xf] %v486_v19  ;;  %1095 = vst [vmem:[#allocation2 + $0x154] sm:$0xf] %v496_v20  ;;  %v505_v30 = vrot.slane %v504_v27, 4  ;;  %v522_v48 = vshrl.u32 %v5737_v34, 16 }
  0x6f   : > { %1226 = vst [vmem:[#allocation2 + $0xf4] sm:$0xf] %v486_v19  ;;  %1227 = vst [vmem:[#allocation2 + $0x118] sm:$0xf] %v496_v20  ;;  %v515_v44 = vrot.slane %v514_v28, 4  ;;  %v525_v41 = vshll.u32 %v5737_v34, 16 }
  0x70   : > { %v5743_v36 = vld [vmem:[%s5347_s14 + $0x5c] sm:$0x1]  ;;  %v510_v38 = vsel %vm5399_vm5, %v505_v30, %v509_v17  ;;  %332 = vst [vmem:[#allocation2 + $0x1f8] sm:$0xf] %v5737_v34  ;;  %333 = vst [vmem:[#allocation2 + $0x21c] sm:$0xf] %v5740_v35 }
  0x71   : > { %v520_v40 = vsel %vm5399_vm5, %v515_v44, %v519_v22  ;;  %1040 = vst [vmem:[#allocation2 + $0x1bc] sm:$0xf] %v5737_v34  ;;  %1041 = vst [vmem:[#allocation2 + $0x1e0] sm:$0xf] %v5740_v35  ;;  %v5057_v42 = vld [vmem:[%s6518_s1 + $0x150] sm:$0xff]   ;;  %v531_v43 = vshll.u32 %v5740_v35, 16 }
  0x72   : > { %1172 = vst [vmem:[#allocation2 + $0x180] sm:$0xf] %v5737_v34  ;;  %1173 = vst [vmem:[#allocation2 + $0x1a4] sm:$0xf] %v5740_v35  ;;  %v535_v46 = vshrl.u32 %v5740_v35, 16  ;;  %v541_v1 = vshll.u32 %v5743_v36, 16  ;;  %4636 = vmatprep.subr.bf16.mxu0 %v5057_v42 }
  0x73   : > { %781 = vst [vmem:[#allocation2 + $0x1b4] sm:$0xf] %v510_v38  ;;  %782 = vst [vmem:[#allocation2 + $0x1d8] sm:$0xf] %v520_v40  ;;  %v5058_v56 = vld [vmem:[%s6518_s1 + $0x110] sm:$0xff]   ;;  %v524_v47 = vrot.slane %v522_v48, 4 }
  0x74   : > { %1096 = vst [vmem:[#allocation2 + $0x178] sm:$0xf] %v510_v38  ;;  %1097 = vst [vmem:[#allocation2 + $0x19c] sm:$0xf] %v520_v40  ;;  %v527_v54 = vrot.slane %v525_v41, 5  ;;  %v533_v50 = vrot.slane %v531_v43, 5  ;;  %4637 = vmatpush3.bf16.msra.mxu0 %v5058_v56 }
  0x75   : > { %1228 = vst [vmem:[#allocation2 + $0x13c] sm:$0xf] %v510_v38  ;;  %1229 = vst [vmem:[#allocation2 + $0x160] sm:$0xf] %v520_v40  ;;  %v5035_v49 = vld [vmem:[#allocation2 + $0x16c] ss:$36 sps:$4 sm:$0xff]  }
  0x76   : > { %v537_v53 = vrot.slane %v535_v46, 4  ;;  %v5039_v55 = vld [vmem:[#allocation2 + $0x168] ss:$36 sps:$4 sm:$0xff]   ;;  %v5046_v61 = vld [vmem:[#allocation2 + $0x98] ss:$36 sps:$4 sm:$0xff]   ;;  %v528_v62 = vor.u32 %v527_v54, %v524_v47  ;;  %v543_v57 = vrot.slane %v541_v1, 5  ;;  %2840 = vmatprep.mubr.bf16.mxu0 %v5035_v49 }
  0x77   : > { %v5053_v6 = vld [vmem:[#allocation2 + $0xe4] ss:$36 sps:$4 sm:$0xff]   ;;  %v5768_v7 = vld [vmem:[%s5347_s14 + $0x60] sm:$0xf]  ;;  %2841 = vmatmul.mubr.bf16.gmra.mxu0 %v5039_v55  ;;  %v882_v18 = vrot.slane %v5636_v52, 5  ;;  %2978 = vmatmul.mubr.bf16.gmra.mxu1 %v5046_v61  ;;  %v885_v40 = vrot.slane %v5640_v58, 5 }
  0x78   : > { %v538_v4 = vor.u32 %v537_v53, %v533_v50  ;;  %v5771_v9 = vld [vmem:[%s5347_s14 + $0x64] sm:$0xf]  ;;  %v529_v10 = vrot.slane %v528_v62, 4  ;;  %v5774_v12 = vld [vmem:[%s5347_s14 + $0x68] sm:$0x1]  ;;  %v546_v13 = vshrl.u32 %v5768_v7, 16  ;;  %2985 = vmatprep.mubr.bf16.mxu1 %v5053_v6 }
  0x79   : > { %334 = vst [vmem:[#allocation2 + $0x240] sm:$0xf] %v5768_v7  ;;  %335 = vst [vmem:[#allocation2 + $0x264] sm:$0xf] %v5771_v9  ;;  %v549_v14 = vshll.u32 %v5768_v7, 16  ;;  %v555_v51 = vshll.u32 %v5771_v9, 16  ;;  %v883_v31 = vsel %vm5390_vm4, %v4010_v63, %v882_v18 }
  0x7a   : > { %1042 = vst [vmem:[#allocation2 + $0x204] sm:$0xf] %v5768_v7  ;;  %1043 = vst [vmem:[#allocation2 + $0x228] sm:$0xf] %v5771_v9  ;;  %v539_v15 = vrot.slane %v538_v4, 4  ;;  %v559_v16 = vshrl.u32 %v5771_v9, 16  ;;  %v534_v20 = vsel %vm5399_vm5, %v529_v10, %v533_v50 }
  0x7b   : > { %1174 = vst [vmem:[#allocation2 + $0x1c8] sm:$0xf] %v5768_v7  ;;  %1175 = vst [vmem:[#allocation2 + $0x1ec] sm:$0xf] %v5771_v9  ;;  %v565_v17 = vshll.u32 %v5774_v12, 16  ;;  %v548_v22 = vrot.slane %v546_v13, 4 }
  0x7c   : > { %v5041_v19 = vld [vmem:[#allocation2 + $0x1b4] ss:$36 sps:$4 sm:$0xff]   ;;  %v551_v23 = vrot.slane %v549_v14, 5  ;;  %v544_v27 = vsel %vm5399_vm5, %v539_v15, %v543_v57  ;;  %783 = vst [vmem:[#allocation2 + $0x1fc] sm:$0xf] %v534_v20  ;;  %v557_v28 = vrot.slane %v555_v51, 5 }
  0x7d   : > { %v5045_v24 = vld [vmem:[#allocation2 + $0x1b0] ss:$36 sps:$4 sm:$0xff]   ;;  %1098 = vst [vmem:[#allocation2 + $0x1c0] sm:$0xf] %v534_v20  ;;  %1230 = vst [vmem:[#allocation2 + $0x184] sm:$0xf] %v534_v20  ;;  %2848 = vmatprep.mubr.bf16.mxu0 %v5041_v19 }
  0x7e   : > { %v561_v29 = vrot.slane %v559_v16, 4  ;;  %v567_v30 = vrot.slane %v565_v17, 5  ;;  %v5065_v52 = vld [vmem:[%s6518_s1 + $0x1e8] sm:$0xff]   ;;  %784 = vst [vmem:[#allocation2 + $0x220] sm:$0xf] %v544_v27  ;;  %v552_v44 = vor.u32 %v551_v23, %v548_v22  ;;  %v884_v38 = vrot.slane %v882_v18, 4 }
  0x7f   : > { %1099 = vst [vmem:[#allocation2 + $0x1e4] sm:$0xf] %v544_v27  ;;  %1231 = vst [vmem:[#allocation2 + $0x1a8] sm:$0xf] %v544_v27  ;;  %4742 = vmatprep.subr.bf16.mxu1 %v5065_v52  ;;  %v5066_v41 = vld [vmem:[%s6518_s1 + $0x1a8] sm:$0xff]   ;;  %v4011_v43 = vrot.slane %v5673_v32, 9  ;;  %2849 = vmatmul.mubr.bf16.gmra.mxu0 %v5045_v24 }
  0x80   : > { %v562_v48 = vor.u32 %v561_v29, %v557_v28  ;;  %1004 = vst [vmem:[#allocation2 + $0x128] sm:$0xf] %v883_v31  ;;  %1136 = vst [vmem:[#allocation2 + $0xec] sm:$0xf] %v883_v31  ;;  %v5802_v42 = vld [vmem:[%s5347_s14 + $0x6c] sm:$0xf]  ;;  %v886_v56 = vsel %vm5390_vm4, %v884_v38, %v885_v40  ;;  %4743 = vmatpush3.bf16.msra.mxu1 %v5066_v41 }
  0x81   : > { %1268 = vst [vmem:[#allocation2 + $0xb0] sm:$0xf] %v883_v31  ;;  %v5056_v46 = vld [vmem:[#allocation2 + $0xe0] ss:$36 sps:$4 sm:$0xff]   ;;  %v553_v1 = vrot.slane %v552_v44, 4  ;;  %v570_v54 = vshrl.u32 %v5802_v42, 16 }
  0x82   : > { %v5808_v58 = vld [vmem:[%s5347_s14 + $0x70] sm:$0xf]  ;;  %v5811_v47 = vld [vmem:[%s5347_s14 + $0x74] sm:$0x1]  ;;  %336 = vst [vmem:[#allocation2 + $0x288] sm:$0xf] %v5802_v42  ;;  %2986 = vmatmul.mubr.bf16.gmra.mxu1 %v5056_v46 }
  0x83   : > { %1044 = vst [vmem:[#allocation2 + $0x24c] sm:$0xf] %v5802_v42  ;;  %1176 = vst [vmem:[#allocation2 + $0x210] sm:$0xf] %v5802_v42  ;;  %v563_v49 = vrot.slane %v562_v48, 4  ;;  %v573_v32 = vshll.u32 %v5802_v42, 16  ;;  %v558_v55 = vsel %vm5399_vm5, %v553_v1, %v557_v28 }
  0x84   : > { %1005 = vst [vmem:[#allocation2 + $0x14c] sm:$0xf] %v886_v56  ;;  %1137 = vst [vmem:[#allocation2 + $0x110] sm:$0xf] %v886_v56  ;;  %v579_v50 = vshll.u32 %v5808_v58, 16  ;;  %v583_v53 = vshrl.u32 %v5808_v58, 16 }
  0x85   : > { %1269 = vst [vmem:[#allocation2 + $0xd4] sm:$0xf] %v886_v56  ;;  %337 = vst [vmem:[#allocation2 + $0x2ac] sm:$0xf] %v5808_v58  ;;  %v572_v61 = vrot.slane %v570_v54, 4  ;;  %v589_v62 = vshll.u32 %v5811_v47, 16  ;;  %v568_v4 = vsel %vm5399_vm5, %v563_v49, %v567_v30 }
  0x86   : > { %1045 = vst [vmem:[#allocation2 + $0x270] sm:$0xf] %v5808_v58  ;;  %1177 = vst [vmem:[#allocation2 + $0x234] sm:$0xf] %v5808_v58  ;;  %v889_v57 = vrot.slane %v5676_v33, 5  ;;  %v5073_v63 = vld [vmem:[%s6518_s1 + $0x148] sm:$0xff]  }
  0x87   : > { %785 = vst [vmem:[#allocation2 + $0x244] sm:$0xf] %v558_v55  ;;  %1100 = vst [vmem:[#allocation2 + $0x208] sm:$0xf] %v558_v55  ;;  %v575_v6 = vrot.slane %v573_v32, 5  ;;  %v581_v10 = vrot.slane %v579_v50, 5  ;;  %4638 = vmatprep.subr.bf16.mxu0 %v5073_v63 }
  0x88   : > { %1232 = vst [vmem:[#allocation2 + $0x1cc] sm:$0xf] %v558_v55  ;;  %v585_v13 = vrot.slane %v583_v53, 4  ;;  %v5074_v14 = vld [vmem:[%s6518_s1 + $0x108] sm:$0xff]   ;;  %786 = vst [vmem:[#allocation2 + $0x268] sm:$0xf] %v568_v4  ;;  %v890_v51 = vsel %vm5390_vm4, %v4011_v43, %v889_v57 }
  0x89   : > { %1101 = vst [vmem:[#allocation2 + $0x22c] sm:$0xf] %v568_v4  ;;  %1233 = vst [vmem:[#allocation2 + $0x1f0] sm:$0xf] %v568_v4  ;;  %v591_v33 = vrot.slane %v589_v62, 5  ;;  %v891_v15 = vrot.slane %v889_v57, 4  ;;  %v576_v19 = vor.u32 %v575_v6, %v572_v61  ;;  %4639 = vmatpush3.bf16.msra.mxu0 %v5074_v14 }
  0x8a   : > { %v892_v16 = vrot.slane %v5680_v45, 5  ;;  %v5051_v17 = vld [vmem:[#allocation2 + $0x1fc] ss:$36 sps:$4 sm:$0xff]   ;;  %v586_v20 = vor.u32 %v585_v13, %v581_v10  ;;  %1006 = vst [vmem:[#allocation2 + $0x170] sm:$0xf] %v890_v51  ;;  %v4012_v22 = vrot.slane %v5699_v2, 9 }
  0x8b   : > { %v5055_v18 = vld [vmem:[#allocation2 + $0x1f8] ss:$36 sps:$4 sm:$0xff]   ;;  %1138 = vst [vmem:[#allocation2 + $0x134] sm:$0xf] %v890_v51  ;;  %1270 = vst [vmem:[#allocation2 + $0xf8] sm:$0xf] %v890_v51  ;;  %2856 = vmatprep.mubr.bf16.mxu0 %v5051_v17 }
  0x8c   : > { %v893_v23 = vsel %vm5390_vm4, %v891_v15, %v892_v16  ;;  %v5842_v24 = vld [vmem:[%s5347_s14 + $0x78] sm:$0xf]  ;;  %v5845_v27 = vld [vmem:[%s5347_s14 + $0x7c] sm:$0xf]  ;;  %v896_v45 = vrot.slane %v5702_v25, 5  ;;  %v577_v28 = vrot.slane %v576_v19, 4  ;;  %2857 = vmatmul.mubr.bf16.gmra.mxu0 %v5055_v18 }
  0x8d   : > { %v587_v29 = vrot.slane %v586_v20, 4  ;;  %1007 = vst [vmem:[#allocation2 + $0x194] sm:$0xf] %v893_v23  ;;  %1139 = vst [vmem:[#allocation2 + $0x158] sm:$0xf] %v893_v23  ;;  %v594_v2 = vshrl.u32 %v5842_v24, 16 }
  0x8e   : > { %1271 = vst [vmem:[#allocation2 + $0x11c] sm:$0xf] %v893_v23  ;;  %v5849_v30 = vld [vmem:[%s5347_s14 + $0x80] sm:$0x1]  ;;  %338 = vst [vmem:[#allocation2 + $0x2d0] sm:$0xf] %v5842_v24  ;;  %v897_v38 = vsel %vm5390_vm4, %v4012_v22, %v896_v45  ;;  %v582_v40 = vsel %vm5399_vm5, %v577_v28, %v581_v10 }
  0x8f   : > { %339 = vst [vmem:[#allocation2 + $0x2f4] sm:$0xf] %v5845_v27  ;;  %v597_v52 = vshll.u32 %v5842_v24, 16  ;;  %1046 = vst [vmem:[#allocation2 + $0x294] sm:$0xf] %v5842_v24  ;;  %v603_v31 = vshll.u32 %v5845_v27, 16  ;;  %v592_v48 = vsel %vm5399_vm5, %v587_v29, %v591_v33 }
  0x90   : > { %1047 = vst [vmem:[#allocation2 + $0x2b8] sm:$0xf] %v5845_v27  ;;  %1178 = vst [vmem:[#allocation2 + $0x258] sm:$0xf] %v5842_v24  ;;  %v5061_v25 = vld [vmem:[#allocation2 + $0x12c] ss:$36 sps:$4 sm:$0xff]  }
  0x91   : > { %1179 = vst [vmem:[#allocation2 + $0x27c] sm:$0xf] %v5845_v27  ;;  %v5064_v44 = vld [vmem:[#allocation2 + $0x128] ss:$36 sps:$4 sm:$0xff]   ;;  %v596_v41 = vrot.slane %v594_v2, 4  ;;  %v599_v43 = vrot.slane %v597_v52, 5  ;;  %2993 = vmatprep.mubr.bf16.mxu1 %v5061_v25 }
  0x92   : > { %1008 = vst [vmem:[#allocation2 + $0x1b8] sm:$0xf] %v897_v38  ;;  %1140 = vst [vmem:[#allocation2 + $0x17c] sm:$0xf] %v897_v38  ;;  %v605_v46 = vrot.slane %v603_v31, 5  ;;  %v607_v1 = vshrl.u32 %v5845_v27, 16  ;;  %2994 = vmatmul.mubr.bf16.gmra.mxu1 %v5064_v44 }
  0x93   : > { %1272 = vst [vmem:[#allocation2 + $0x140] sm:$0xf] %v897_v38  ;;  %787 = vst [vmem:[#allocation2 + $0x28c] sm:$0xf] %v582_v40  ;;  %v613_v56 = vshll.u32 %v5849_v30, 16  ;;  %v898_v54 = vrot.slane %v896_v45, 4  ;;  %v600_v50 = vor.u32 %v599_v43, %v596_v41 }
  0x94   : > { %788 = vst [vmem:[#allocation2 + $0x2b0] sm:$0xf] %v592_v48  ;;  %1102 = vst [vmem:[#allocation2 + $0x250] sm:$0xf] %v582_v40  ;;  %v5081_v49 = vld [vmem:[%s6518_s1 + $0x1e0] sm:$0xff]   ;;  %v899_v53 = vrot.slane %v5707_v60, 5 }
  0x95   : > { %1103 = vst [vmem:[#allocation2 + $0x274] sm:$0xf] %v592_v48  ;;  %1234 = vst [vmem:[#allocation2 + $0x214] sm:$0xf] %v582_v40  ;;  %v5059_v32 = vld [vmem:[#allocation2 + $0x244] ss:$36 sps:$4 sm:$0xff]   ;;  %4744 = vmatprep.subr.bf16.mxu1 %v5081_v49 }
  0x96   : > { %1235 = vst [vmem:[#allocation2 + $0x238] sm:$0xf] %v592_v48  ;;  %v5063_v55 = vld [vmem:[#allocation2 + $0x240] ss:$36 sps:$4 sm:$0xff]   ;;  %v609_v61 = vrot.slane %v607_v1, 4  ;;  %2864 = vmatprep.mubr.bf16.mxu0 %v5059_v32  ;;  %v601_v57 = vrot.slane %v600_v50, 4  ;;  %v900_v63 = vsel %vm5390_vm4, %v898_v54, %v899_v53 }
  0x97   : > { %v5082_v62 = vld [vmem:[%s6518_s1 + $0x1a0] sm:$0xff]   ;;  %v5069_v6 = vld [vmem:[#allocation2 + $0x174] ss:$36 sps:$4 sm:$0xff]   ;;  %v615_v10 = vrot.slane %v613_v56, 5  ;;  %1009 = vst [vmem:[#allocation2 + $0x1dc] sm:$0xf] %v900_v63  ;;  %2865 = vmatmul.mubr.bf16.gmra.mxu0 %v5063_v55 }
  0x98   : > { %v5083_v4 = vld [vmem:[%s6518_s1 + $0x140] sm:$0xff]   ;;  %v610_v60 = vor.u32 %v609_v61, %v605_v46  ;;  %1141 = vst [vmem:[#allocation2 + $0x1a0] sm:$0xf] %v900_v63  ;;  %1273 = vst [vmem:[#allocation2 + $0x164] sm:$0xf] %v900_v63  ;;  %v4013_v13 = vrot.slane %v5737_v34, 9  ;;  %v606_v14 = vsel %vm5399_vm5, %v601_v57, %v605_v46  ;;  %4745 = vmatpush3.bf16.msra.mxu1 %v5082_v62  ;;  %3001 = vmatprep.mubr.bf16.mxu1 %v5069_v6 }
  0x99   : > { %4640 = vmatprep.subr.bf16.mxu0 %v5083_v4  ;;  %789 = vst [vmem:[#allocation2 + $0x2d4] sm:$0xf] %v606_v14  ;;  %1104 = vst [vmem:[#allocation2 + $0x298] sm:$0xf] %v606_v14  ;;  %v5084_v51 = vld [vmem:[%s6518_s1 + $0x100] sm:$0xff]   ;;  %v903_v34 = vrot.slane %v5740_v35, 5 }
  0x9a   : > { %v611_v33 = vrot.slane %v610_v60, 4  ;;  %1236 = vst [vmem:[#allocation2 + $0x25c] sm:$0xf] %v606_v14  ;;  %v5887_v15 = vld [vmem:[%s5347_s14 + $0x84] sm:$0xf]  ;;  %4641 = vmatpush3.bf16.msra.mxu0 %v5084_v51  ;;  %v906_v44 = vrot.slane %v5743_v36, 5 }
  0x9b   : > { %v5067_v16 = vld [vmem:[#allocation2 + $0x28c] ss:$36 sps:$4 sm:$0xff]   ;;  %340 = vst [vmem:[#allocation2 + $0x318] sm:$0xf] %v5887_v15  ;;  %v618_v17 = vshrl.u32 %v5887_v15, 16  ;;  %v621_v18 = vshll.u32 %v5887_v15, 16  ;;  %v904_v35 = vsel %vm5390_vm4, %v4013_v13, %v903_v34 }
  0x9c   : > { %1048 = vst [vmem:[#allocation2 + $0x2dc] sm:$0xf] %v5887_v15  ;;  %1180 = vst [vmem:[#allocation2 + $0x2a0] sm:$0xf] %v5887_v15  ;;  %v5072_v19 = vld [vmem:[#allocation2 + $0x170] ss:$36 sps:$4 sm:$0xff]   ;;  %v616_v20 = vsel %vm5399_vm5, %v611_v33, %v615_v10  ;;  %2872 = vmatprep.mubr.bf16.mxu0 %v5067_v16 }
  0x9d   : > { %v5898_v22 = vld [vmem:[%s5347_s14 + $0x88] sm:$0xf]  ;;  %v5901_v23 = vld [vmem:[%s5347_s14 + $0x8c] sm:$0x1]  ;;  %790 = vst [vmem:[#allocation2 + $0x2f8] sm:$0xf] %v616_v20  ;;  %3002 = vmatmul.mubr.bf16.gmra.mxu1 %v5072_v19 }
  0x9e   : > { %1105 = vst [vmem:[#allocation2 + $0x2bc] sm:$0xf] %v616_v20  ;;  %1237 = vst [vmem:[#allocation2 + $0x280] sm:$0xf] %v616_v20  ;;  %v620_v45 = vrot.slane %v618_v17, 4  ;;  %v623_v28 = vrot.slane %v621_v18, 5 }
  0x9f   : > { %341 = vst [vmem:[#allocation2 + $0x33c] sm:$0xf] %v5898_v22  ;;  %v627_v29 = vshll.u32 %v5898_v22, 16  ;;  %v631_v2 = vshrl.u32 %v5898_v22, 16  ;;  %1049 = vst [vmem:[#allocation2 + $0x300] sm:$0xf] %v5898_v22 }
  0xa0   : > { %1181 = vst [vmem:[#allocation2 + $0x2c4] sm:$0xf] %v5898_v22  ;;  %1010 = vst [vmem:[#allocation2 + $0x200] sm:$0xf] %v904_v35  ;;  %v637_v52 = vshll.u32 %v5901_v23, 16  ;;  %v905_v25 = vrot.slane %v903_v34, 4  ;;  %v624_v40 = vor.u32 %v623_v28, %v620_v45 }
  0xa1   : > { %1142 = vst [vmem:[#allocation2 + $0x1c4] sm:$0xf] %v904_v35  ;;  %1274 = vst [vmem:[#allocation2 + $0x188] sm:$0xf] %v904_v35  ;;  %v4014_v31 = vrot.slane %v5768_v7, 9  ;;  %v629_v48 = vrot.slane %v627_v29, 5 }
  0xa2   : > { %v5077_v38 = vld [vmem:[#allocation2 + $0x1bc] ss:$36 sps:$4 sm:$0xff]   ;;  %v5071_v41 = vld [vmem:[#allocation2 + $0x288] ss:$36 sps:$4 sm:$0xff]   ;;  %v633_v43 = vrot.slane %v631_v2, 4  ;;  %v639_v46 = vrot.slane %v637_v52, 5  ;;  %v907_v1 = vsel %vm5390_vm4, %v905_v25, %v906_v44 }
  0xa3   : > { %v910_v56 = vrot.slane %v5771_v9, 5  ;;  %v5097_v54 = vld [vmem:[%s6518_s1 + $0x1d8] sm:$0xff]   ;;  %3009 = vmatprep.mubr.bf16.mxu1 %v5077_v38  ;;  %v625_v36 = vrot.slane %v624_v40, 4  ;;  %1011 = vst [vmem:[#allocation2 + $0x224] sm:$0xf] %v907_v1  ;;  %v913_v7 = vrot.slane %v5774_v12, 5  ;;  %2873 = vmatmul.mubr.bf16.gmra.mxu0 %v5071_v41 }
  0xa4   : > { %1143 = vst [vmem:[#allocation2 + $0x1e8] sm:$0xf] %v907_v1  ;;  %1275 = vst [vmem:[#allocation2 + $0x1ac] sm:$0xf] %v907_v1  ;;  %v5923_v49 = vld [vmem:[%s6518_s1 + $0x238] sm:$0xff]   ;;  %v634_v32 = vor.u32 %v633_v43, %v629_v48  ;;  %4746 = vmatprep.subr.bf16.mxu1 %v5097_v54  ;;  %v4015_v63 = vrot.slane %v5802_v42, 9 }
  0xa5   : > { %v911_v9 = vsel %vm5390_vm4, %v4014_v31, %v910_v56  ;;  %v912_v50 = vrot.slane %v910_v56, 4  ;;  %v5099_v53 = vld [vmem:[%s6518_s1 + $0x198] sm:$0xff]   ;;  %v630_v55 = vsel %vm5399_vm5, %v625_v36, %v629_v48  ;;  %4874 = vmatprep.subr.bf16.mxu0 %v5923_v49  ;;  %v917_v4 = vrot.slane %v5808_v58, 5  ;;  %v5079_v58 = vld [vmem:[#allocation2 + $0x2d0] ss:$36 sps:$4 sm:$0xff]  }
  0xa6   : > { %1012 = vst [vmem:[#allocation2 + $0x248] sm:$0xf] %v911_v9  ;;  %1144 = vst [vmem:[#allocation2 + $0x20c] sm:$0xf] %v911_v9  ;;  %v5075_v12 = vld [vmem:[#allocation2 + $0x2d4] ss:$36 sps:$4 sm:$0xff]   ;;  %4747 = vmatpush3.bf16.msra.mxu1 %v5099_v53 }
  0xa7   : > { %1276 = vst [vmem:[#allocation2 + $0x1d0] sm:$0xf] %v911_v9  ;;  %v5080_v61 = vld [vmem:[#allocation2 + $0x1b8] ss:$36 sps:$4 sm:$0xff]   ;;  %v635_v62 = vrot.slane %v634_v32, 4  ;;  %v914_v57 = vsel %vm5390_vm4, %v912_v50, %v913_v7  ;;  %v920_v6 = vrot.slane %v5811_v47, 5  ;;  %2880 = vmatprep.mubr.bf16.mxu0 %v5075_v12  ;;  %v918_v14 = vsel %vm5390_vm4, %v4015_v63, %v917_v4 }
  0xa8   : > { %791 = vst [vmem:[#allocation2 + $0x31c] sm:$0xf] %v630_v55  ;;  %1106 = vst [vmem:[#allocation2 + $0x2e0] sm:$0xf] %v630_v55  ;;  %v4016_v10 = vrot.slane %v5842_v24, 9  ;;  %v924_v13 = vrot.slane %v5845_v27, 5  ;;  %3010 = vmatmul.mubr.bf16.gmra.mxu1 %v5080_v61 }
  0xa9   : > { %1238 = vst [vmem:[#allocation2 + $0x2a4] sm:$0xf] %v630_v55  ;;  %1013 = vst [vmem:[#allocation2 + $0x26c] sm:$0xf] %v914_v57  ;;  %v640_v60 = vsel %vm5399_vm5, %v635_v62, %v639_v46  ;;  %v919_v33 = vrot.slane %v917_v4, 4  ;;  %v927_v42 = vrot.slane %v5849_v30, 5 }
  0xaa   : > { %1145 = vst [vmem:[#allocation2 + $0x230] sm:$0xf] %v914_v57  ;;  %1277 = vst [vmem:[#allocation2 + $0x1f4] sm:$0xf] %v914_v57  ;;  %v5087_v47 = vld [vmem:[#allocation2 + $0x204] ss:$36 sps:$4 sm:$0xff]   ;;  %v925_v24 = vsel %vm5390_vm4, %v4016_v10, %v924_v13 }
  0xab   : > { %792 = vst [vmem:[#allocation2 + $0x340] sm:$0xf] %v640_v60  ;;  %1107 = vst [vmem:[#allocation2 + $0x304] sm:$0xf] %v640_v60  ;;  %v926_v27 = vrot.slane %v924_v13, 4  ;;  %v921_v51 = vsel %vm5390_vm4, %v919_v33, %v920_v6  ;;  %3017 = vmatprep.mubr.bf16.mxu1 %v5087_v47  ;;  %v5112_v34 = vld [vmem:[%s6518_s1 + $0x1d0] sm:$0xff]   ;;  %2881 = vmatmul.mubr.bf16.gmra.mxu0 %v5079_v58 }
  0xac   : > { %1239 = vst [vmem:[#allocation2 + $0x2c8] sm:$0xf] %v640_v60  ;;  %1014 = vst [vmem:[#allocation2 + $0x290] sm:$0xf] %v918_v14  ;;  %v4017_v16 = vrot.slane %v5887_v15, 9  ;;  %v931_v17 = vrot.slane %v5898_v22, 5  ;;  %4748 = vmatprep.subr.bf16.mxu1 %v5112_v34 }
  0xad   : > { %1146 = vst [vmem:[#allocation2 + $0x254] sm:$0xf] %v918_v14  ;;  %1278 = vst [vmem:[#allocation2 + $0x218] sm:$0xf] %v918_v14  ;;  %v928_v30 = vsel %vm5390_vm4, %v926_v27, %v927_v42  ;;  %v5243_v18 = vld [vmem:[%s5347_s14 + $0x98] sm:$0x1] }
  0xae   : > { %1016 = vst [vmem:[#allocation2 + $0x2d8] sm:$0xf] %v925_v24  ;;  %1148 = vst [vmem:[#allocation2 + $0x29c] sm:$0xf] %v925_v24  ;;  %v941_v19 = vrot.slane %v5243_v18, 5  ;;  %v934_v20 = vrot.slane %v5901_v23, 5  ;;  %v932_v29 = vsel %vm5390_vm4, %v4017_v16, %v931_v17 }
  0xaf   : > { %1280 = vst [vmem:[#allocation2 + $0x260] sm:$0xf] %v925_v24  ;;  %1015 = vst [vmem:[#allocation2 + $0x2b4] sm:$0xf] %v921_v51  ;;  %v4018_v35 = vrot.slane %v5368_v21, 9  ;;  %v933_v2 = vrot.slane %v931_v17, 4 }
  0xb0   : > { %1147 = vst [vmem:[#allocation2 + $0x278] sm:$0xf] %v921_v51  ;;  %1279 = vst [vmem:[#allocation2 + $0x23c] sm:$0xf] %v921_v51  ;;  %v5090_v45 = vld [vmem:[#allocation2 + $0x200] ss:$36 sps:$4 sm:$0xff]  }
  0xb1   : > { %1017 = vst [vmem:[#allocation2 + $0x2fc] sm:$0xf] %v928_v30  ;;  %1149 = vst [vmem:[#allocation2 + $0x2c0] sm:$0xf] %v928_v30  ;;  %v5091_v28 = vld [vmem:[#allocation2 + $0x24c] ss:$36 sps:$4 sm:$0xff]   ;;  %v935_v21 = vsel %vm5390_vm4, %v933_v2, %v934_v20  ;;  %3018 = vmatmul.mubr.bf16.gmra.mxu1 %v5090_v45 }
  0xb2   : > { %1281 = vst [vmem:[#allocation2 + $0x284] sm:$0xf] %v928_v30  ;;  %v5114_v15 = vld [vmem:[%s6518_s1 + $0x190] sm:$0xff]   ;;  %1018 = vst [vmem:[#allocation2 + $0x320] sm:$0xf] %v932_v29  ;;  %v938_v22 = vrot.slane %v5371_v26, 5  ;;  %3025 = vmatprep.mubr.bf16.mxu1 %v5091_v28 }
  0xb3   : > { %1150 = vst [vmem:[#allocation2 + $0x2e4] sm:$0xf] %v932_v29  ;;  %1282 = vst [vmem:[#allocation2 + $0x2a8] sm:$0xf] %v932_v29  ;;  %v5085_v23 = vld [vmem:[#allocation2 + $0x31c] ss:$36 sps:$4 sm:$0xff]   ;;  %4749 = vmatpush3.bf16.msra.mxu1 %v5114_v15 }
  0xb4   : > { %v4019_v52 = vrot.slane %v5443_v8, 9  ;;  %1019 = vst [vmem:[#allocation2 + $0x344] sm:$0xf] %v935_v21  ;;  %1151 = vst [vmem:[#allocation2 + $0x308] sm:$0xf] %v935_v21  ;;  %v939_v25 = vsel %vm5390_vm4, %v4018_v35, %v938_v22  ;;  %v940_v44 = vrot.slane %v938_v22, 4  ;;  %2888 = vmatprep.mubr.bf16.mxu0 %v5085_v23 }
  0xb5   : > { %1283 = vst [vmem:[#allocation2 + $0x2cc] sm:$0xf] %v935_v21  ;;  %v945_v31 = vrot.slane %v5446_v11, 5  ;;  %v5244_v38 = vld [vmem:[%s5347_s14 + $0xa4] sm:$0x1]  ;;  %v4020_v8 = vrot.slane %v5514_v0, 9 }
  0xb6   : > { %v948_v40 = vrot.slane %v5244_v38, 5  ;;  %v5089_v26 = vld [vmem:[#allocation2 + $0x318] ss:$36 sps:$4 sm:$0xff]   ;;  %1020 = vst [vmem:[#allocation2 + $0x368] sm:$0xf] %v939_v25  ;;  %v942_v41 = vsel %vm5390_vm4, %v940_v44, %v941_v19  ;;  %v952_v46 = vrot.slane %v5517_v3, 5 }
  0xb7   : > { %1152 = vst [vmem:[#allocation2 + $0x32c] sm:$0xf] %v939_v25  ;;  %1284 = vst [vmem:[#allocation2 + $0x2f0] sm:$0xf] %v939_v25  ;;  %v5095_v48 = vld [vmem:[#allocation2 + $0x14] ss:$36 sps:$4 sm:$0xff]   ;;  %v946_v43 = vsel %vm5390_vm4, %v4019_v52, %v945_v31  ;;  %2889 = vmatmul.mubr.bf16.gmra.mxu0 %v5089_v26 }
  0xb8   : > { %v947_v11 = vrot.slane %v945_v31, 4  ;;  %1021 = vst [vmem:[#allocation2 + $0x38c] sm:$0xf] %v942_v41  ;;  %1153 = vst [vmem:[#allocation2 + $0x350] sm:$0xf] %v942_v41  ;;  %v4021_v36 = vrot.slane %v5575_v59, 9  ;;  %v953_v32 = vsel %vm5390_vm4, %v4020_v8, %v952_v46  ;;  %3122 = vmatprep.mubr.bf16.mxu0 %v5095_v48 }
  0xb9   : > { %1285 = vst [vmem:[#allocation2 + $0x314] sm:$0xf] %v942_v41  ;;  %1022 = vst [vmem:[#allocation2 + $0x3b0] sm:$0xf] %v946_v43  ;;  %v5096_v1 = vld [vmem:[#allocation2 + $0x248] ss:$36 sps:$4 sm:$0xff]  }
  0xba   : > { %1154 = vst [vmem:[#allocation2 + $0x374] sm:$0xf] %v946_v43  ;;  %1286 = vst [vmem:[#allocation2 + $0x338] sm:$0xf] %v946_v43  ;;  %v949_v0 = vsel %vm5390_vm4, %v947_v11, %v948_v40  ;;  %v5245_v56 = vld [vmem:[%s5347_s14 + $0xb0] sm:$0x1]  ;;  %3026 = vmatmul.mubr.bf16.gmra.mxu1 %v5096_v1 }
  0xbb   : > { %v955_v54 = vrot.slane %v5245_v56, 5  ;;  %v5100_v7 = vld [vmem:[#allocation2 + $0x294] ss:$36 sps:$4 sm:$0xff]   ;;  %1023 = vst [vmem:[#allocation2 + $0x3d4] sm:$0xf] %v949_v0  ;;  %v954_v9 = vrot.slane %v952_v46, 4 }
  0xbc   : > { %1155 = vst [vmem:[#allocation2 + $0x398] sm:$0xf] %v949_v0  ;;  %1287 = vst [vmem:[#allocation2 + $0x35c] sm:$0xf] %v949_v0  ;;  %v5127_v3 = vld [vmem:[%s6518_s1 + $0x1c8] sm:$0xff]   ;;  %v959_v50 = vrot.slane %v5585_v5, 5  ;;  %3033 = vmatprep.mubr.bf16.mxu1 %v5100_v7 }
  0xbd   : > { %1024 = vst [vmem:[#allocation2 + $0x3f8] sm:$0xf] %v953_v32  ;;  %1156 = vst [vmem:[#allocation2 + $0x3bc] sm:$0xf] %v953_v32  ;;  %v956_v59 = vsel %vm5390_vm4, %v954_v9, %v955_v54  ;;  %v5246_v53 = vld [vmem:[%s5347_s14 + $0xbc] sm:$0x1]  ;;  %4750 = vmatprep.subr.bf16.mxu1 %v5127_v3 }
  0xbe   : > { %1288 = vst [vmem:[#allocation2 + $0x380] sm:$0xf] %v953_v32  ;;  %v962_v55 = vrot.slane %v5246_v53, 5  ;;  %v5093_v12 = vld [vmem:[#allocation2 + $0x10] ss:$36 sps:$4 sm:$0xff]   ;;  %v960_v61 = vsel %vm5390_vm4, %v4021_v36, %v959_v50  ;;  %v961_v62 = vrot.slane %v959_v50, 4 }
  0xbf   : > { %1025 = vst [vmem:[#allocation2 + $0x41c] sm:$0xf] %v956_v59  ;;  %1157 = vst [vmem:[#allocation2 + $0x3e0] sm:$0xf] %v956_v59  ;;  %v5129_v57 = vld [vmem:[%s6518_s1 + $0x188] sm:$0xff]   ;;  %v5113_v63 = vld [vmem:[%s6518_s1 + $0x230] sm:$0xff]   ;;  %3123 = vmatmul.mubr.bf16.vlgmr.msra.gmra.mxu0 %v5093_v12 }
  0xc0   : > { %1289 = vst [vmem:[#allocation2 + $0x3a4] sm:$0xf] %v956_v59  ;;  %1026 = vst [vmem:[#allocation2 + $0x440] sm:$0xf] %v960_v61  ;;  %v5102_v5 = vld [vmem:[#allocation2 + $0x5c] ss:$36 sps:$4 sm:$0xff]   ;;  %v963_v4 = vsel %vm5390_vm4, %v961_v62, %v962_v55  ;;  %4751 = vmatpush3.bf16.msra.mxu1 %v5129_v57  ;;  %4875 = vmatpush3.bf16.msra.mxu0 %v5923_v49 }
  0xc1   : > { %1158 = vst [vmem:[#allocation2 + $0x404] sm:$0xf] %v960_v61  ;;  %1290 = vst [vmem:[#allocation2 + $0x3c8] sm:$0xf] %v960_v61  ;;  %v5104_v6 = vld [vmem:[#allocation2 + $0x290] ss:$36 sps:$4 sm:$0xff]   ;;  %3130 = vmatprep.mubr.bf16.mxu0 %v5102_v5  ;;  %4876 = vmatprep.subr.bf16.mxu0 %v5113_v63 }
  0xc2   : > { %1027 = vst [vmem:[#allocation2 + $0x464] sm:$0xf] %v963_v4  ;;  %1159 = vst [vmem:[#allocation2 + $0x428] sm:$0xf] %v963_v4  ;;  %v5106_v60 = vld [vmem:[#allocation2 + $0x2dc] ss:$36 sps:$4 sm:$0xff]   ;;  %3034 = vmatmul.mubr.bf16.gmra.mxu1 %v5104_v6 }
  0xc3   : > { %1291 = vst [vmem:[#allocation2 + $0x3ec] sm:$0xf] %v963_v4  ;;  %v5105_v10 = vld [vmem:[#allocation2 + $0x58] ss:$36 sps:$4 sm:$0xff]   ;;  %v5128_v13 = vld [vmem:[%s6518_s1 + $0x228] sm:$0xff]   ;;  %v5142_v33 = vld [vmem:[%s6518_s1 + $0x1c0] sm:$0xff]   ;;  %3041 = vmatprep.mubr.bf16.mxu1 %v5106_v60 }
  0xc4   : > { %v5108_v14 = vld [vmem:[#allocation2 + $0xa4] ss:$36 sps:$4 sm:$0xff]   ;;  %4877 = vmatpush3.bf16.msra.mxu0 %v5113_v63  ;;  %4752 = vmatprep.subr.bf16.mxu1 %v5142_v33  ;;  %v312_v58 = vld [vmem:[%s5347_s14 + $0xc0] sm:$0xf]  ;;  %v5110_v24 = vld [vmem:[#allocation2 + $0x2d8] ss:$36 sps:$4 sm:$0xff]  }
  0xc5   : > { %v5143_v49 = vld [vmem:[%s6518_s1 + $0x220] sm:$0xff]   ;;  %4878 = vmatprep.subr.bf16.mxu0 %v5128_v13  ;;  %1058 = vst [vmem:[#allocation2 + $0x444] sm:$0xf] %v312_v58  ;;  %1190 = vst [vmem:[#allocation2 + $0x408] sm:$0xf] %v312_v58  ;;  %v1061_v27 = vshrl.u32 %v312_v58, 16 }
  0xc6   : > { %v5144_v42 = vld [vmem:[%s6518_s1 + $0x180] sm:$0xff]   ;;  %v1064_v51 = vshll.u32 %v312_v58, 16  ;;  %v5157_v19 = vld [vmem:[%s6518_s1 + $0x218] sm:$0xff]   ;;  %v5117_v35 = vld [vmem:[#allocation2 + $0xec] ss:$36 sps:$4 sm:$0xff]   ;;  %v4022_v45 = vrot.slane %v312_v58, 9 }
  0xc7   : > { %v6016_v47 = vld [vmem:[%s5347_s14 + $0xc4] sm:$0xf]  ;;  %3131 = vmatmul.mubr.bf16.gmra.mxu0 %v5105_v10  ;;  %4753 = vmatpush3.bf16.msra.mxu1 %v5144_v42  ;;  %v1063_v34 = vrot.slane %v1061_v27, 4  ;;  %v5121_v21 = vld [vmem:[#allocation2 + $0x36c] ss:$36 sps:$4 sm:$0xff]  }
  0xc8   : > { %1059 = vst [vmem:[#allocation2 + $0x468] sm:$0xf] %v6016_v47  ;;  %1191 = vst [vmem:[#allocation2 + $0x42c] sm:$0xf] %v6016_v47  ;;  %v5115_v30 = vld [vmem:[#allocation2 + $0x324] ss:$36 sps:$4 sm:$0xff]   ;;  %3138 = vmatprep.mubr.bf16.mxu0 %v5108_v14  ;;  %4879 = vmatpush3.bf16.msra.mxu0 %v5128_v13 }
  0xc9   : > { %v1066_v16 = vrot.slane %v1064_v51, 5  ;;  %v1070_v17 = vshll.u32 %v6016_v47, 16  ;;  %v5111_v18 = vld [vmem:[#allocation2 + $0xa0] ss:$36 sps:$4 sm:$0xff]   ;;  %4880 = vmatprep.subr.bf16.mxu0 %v5143_v49  ;;  %v1123_v2 = vrot.slane %v6016_v47, 5  ;;  %v5170_v52 = vld [vmem:[%s6518_s1 + $0x210] sm:$0xff]  }
  0xca   : > { %3042 = vmatmul.mubr.bf16.gmra.mxu1 %v5110_v24  ;;  %v5119_v23 = vld [vmem:[#allocation2 + $0x320] ss:$36 sps:$4 sm:$0xff]   ;;  %v5120_v25 = vld [vmem:[#allocation2 + $0xe8] ss:$36 sps:$4 sm:$0xff]   ;;  %v5123_v44 = vld [vmem:[#allocation2 + $0x134] ss:$36 sps:$4 sm:$0xff]  }
  0xcb   : > { %v1067_v20 = vor.u32 %v1066_v16, %v1063_v34  ;;  %3049 = vmatprep.mubr.bf16.mxu1 %v5115_v30  ;;  %v1072_v29 = vrot.slane %v1070_v17, 5  ;;  %v1124_v22 = vsel %vm5390_vm4, %v4022_v45, %v1123_v2  ;;  %v1074_v31 = vshrl.u32 %v6016_v47, 16  ;;  %v5125_v38 = vld [vmem:[#allocation2 + $0x368] ss:$36 sps:$4 sm:$0xff]   ;;  %v5130_v40 = vld [vmem:[#allocation2 + $0x3b4] ss:$36 sps:$4 sm:$0xff]  }
  0xcc   : > { %4881 = vmatpush3.bf16.msra.mxu0 %v5143_v49  ;;  %1160 = vst [vmem:[#allocation2 + $0x44c] sm:$0xf] %v1124_v22  ;;  %1292 = vst [vmem:[#allocation2 + $0x410] sm:$0xf] %v1124_v22  ;;  %v5183_v26 = vld [vmem:[%s6518_s1 + $0x208] sm:$0xff]   ;;  %v1125_v1 = vrot.slane %v1123_v2, 4 }
  0xcd   : > { %v1068_v28 = vrot.slane %v1067_v20, 4  ;;  %4882 = vmatprep.subr.bf16.mxu0 %v5157_v19  ;;  %v1076_v8 = vrot.slane %v1074_v31, 4  ;;  %v5126_v48 = vld [vmem:[#allocation2 + $0x130] ss:$36 sps:$4 sm:$0xff]   ;;  %v5132_v41 = vld [vmem:[#allocation2 + $0x17c] ss:$36 sps:$4 sm:$0xff]  }
  0xce   : > { %v5134_v11 = vld [vmem:[#allocation2 + $0x3b0] ss:$36 sps:$4 sm:$0xff]   ;;  %v5136_v46 = vld [vmem:[#allocation2 + $0x3fc] ss:$36 sps:$4 sm:$0xff]   ;;  %v314_v56 = vld [vmem:[%s5347_s14 + $0xc8] sm:$0x1] }
  0xcf   : > { %v1073_v15 = vsel %vm5399_vm5, %v1068_v28, %v1072_v29  ;;  %3139 = vmatmul.mubr.bf16.gmra.mxu0 %v5111_v18  ;;  %v1077_v43 = vor.u32 %v1076_v8, %v1072_v29  ;;  %v5196_v0 = vld [vmem:[%s6518_s1 + $0x200] sm:$0xff]   ;;  %v1080_v36 = vshll.u32 %v314_v56, 16  ;;  %v1126_v7 = vrot.slane %v314_v56, 5  ;;  %v5135_v3 = vld [vmem:[#allocation2 + $0x178] ss:$36 sps:$4 sm:$0xff]  }
  0xd0   : > { %1116 = vst [vmem:[#allocation2 + $0x448] sm:$0xf] %v1073_v15  ;;  %1248 = vst [vmem:[#allocation2 + $0x40c] sm:$0xf] %v1073_v15  ;;  %3146 = vmatprep.mubr.bf16.mxu0 %v5117_v35  ;;  %4883 = vmatpush3.bf16.msra.mxu0 %v5157_v19  ;;  %v5138_v50 = vld [vmem:[#allocation2 + $0x1c4] ss:$36 sps:$4 sm:$0xff]  }
  0xd1   : > { %4884 = vmatprep.subr.bf16.mxu0 %v5170_v52  ;;  %v1078_v54 = vrot.slane %v1077_v43, 4  ;;  %v1082_v32 = vrot.slane %v1080_v36, 5  ;;  %v1127_v9 = vsel %vm5390_vm4, %v1125_v1, %v1126_v7  ;;  %v5140_v53 = vld [vmem:[#allocation2 + $0x3f8] ss:$36 sps:$4 sm:$0xff]   ;;  %v5145_v55 = vld [vmem:[#allocation2 + $0x444] ss:$36 sps:$4 sm:$0xff]  }
  0xd2   : > { %3050 = vmatmul.mubr.bf16.gmra.mxu1 %v5119_v23  ;;  %1161 = vst [vmem:[#allocation2 + $0x470] sm:$0xf] %v1127_v9  ;;  %1293 = vst [vmem:[#allocation2 + $0x434] sm:$0xf] %v1127_v9  ;;  %v5141_v12 = vld [vmem:[#allocation2 + $0x1c0] ss:$36 sps:$4 sm:$0xff]  }
  0xd3   : > { %3057 = vmatprep.mubr.bf16.mxu1 %v5121_v21  ;;  %v1083_v59 = vsel %vm5399_vm5, %v1078_v54, %v1082_v32  ;;  %v5147_v61 = vld [vmem:[#allocation2 + $0x20c] ss:$36 sps:$4 sm:$0xff]   ;;  %v5149_v62 = vld [vmem:[#allocation2 + $0x440] ss:$36 sps:$4 sm:$0xff]   ;;  %v5151_v63 = vld [vmem:[#allocation2 + $0x254] ss:$36 sps:$4 sm:$0xff]  }
  0xd4   : > { %4885 = vmatpush3.bf16.msra.mxu0 %v5170_v52  ;;  %1117 = vst [vmem:[#allocation2 + $0x46c] sm:$0xf] %v1083_v59  ;;  %1249 = vst [vmem:[#allocation2 + $0x430] sm:$0xf] %v1083_v59  ;;  %v5155_v57 = vld [vmem:[#allocation2 + $0x1c] ss:$36 sps:$4 sm:$0xff]  }
  0xd5   : > { %4886 = vmatprep.subr.bf16.mxu0 %v5183_v26  ;;  %v5150_v5 = vld [vmem:[#allocation2 + $0x208] ss:$36 sps:$4 sm:$0xff]   ;;  %v5153_v4 = vld [vmem:[#allocation2 + $0x18] ss:$36 sps:$4 sm:$0xff]   ;;  %v5156_v60 = vld [vmem:[#allocation2 + $0x250] ss:$36 sps:$4 sm:$0xff]  }
  0xd6   : > { %v5160_v6 = vld [vmem:[#allocation2 + $0x64] ss:$36 sps:$4 sm:$0xff]   ;;  %v315_v10 = vld [vmem:[%s5347_s14 + $0xcc] sm:$0xf]  ;;  %v5158_v13 = vld [vmem:[#allocation2 + $0x29c] ss:$36 sps:$4 sm:$0xff]  }
  0xd7   : > { %3147 = vmatmul.mubr.bf16.gmra.mxu0 %v5120_v25  ;;  %v316_v14 = vld [vmem:[%s5347_s14 + $0xd0] sm:$0xf]  ;;  %v317_v33 = vld [vmem:[%s5347_s14 + $0xd4] sm:$0x1]  ;;  %1192 = vst [vmem:[#allocation2 + $0x450] sm:$0xf] %v315_v10 }
  0xd8   : > { %3154 = vmatprep.mubr.bf16.mxu0 %v5123_v44  ;;  %4887 = vmatpush3.bf16.msra.mxu0 %v5183_v26  ;;  %v1195_v49 = vshrl.u32 %v315_v10, 16  ;;  %v1198_v42 = vshll.u32 %v315_v10, 16  ;;  %1193 = vst [vmem:[#allocation2 + $0x474] sm:$0xf] %v316_v14  ;;  %v1204_v58 = vshll.u32 %v316_v14, 16  ;;  %v1208_v47 = vshrl.u32 %v316_v14, 16 }
  0xd9   : > { %4888 = vmatprep.subr.bf16.mxu0 %v5196_v0  ;;  %v1214_v24 = vshll.u32 %v317_v33, 16  ;;  %v4023_v27 = vrot.slane %v315_v10, 9  ;;  %v1257_v34 = vrot.slane %v316_v14, 5  ;;  %v1260_v16 = vrot.slane %v317_v33, 5  ;;  %v5163_v45 = vld [vmem:[#allocation2 + $0x60] ss:$36 sps:$4 sm:$0xff]  }
  0xda   : > { %3058 = vmatmul.mubr.bf16.gmra.mxu1 %v5125_v38  ;;  %v1197_v51 = vrot.slane %v1195_v49, 4  ;;  %v1200_v30 = vrot.slane %v1198_v42, 5  ;;  %v1206_v17 = vrot.slane %v1204_v58, 5  ;;  %v1210_v18 = vrot.slane %v1208_v47, 4  ;;  %v5166_v2 = vld [vmem:[#allocation2 + $0xac] ss:$36 sps:$4 sm:$0xff]  }
  0xdb   : > { %3065 = vmatprep.mubr.bf16.mxu1 %v5130_v40  ;;  %v1258_v20 = vsel %vm5390_vm4, %v4023_v27, %v1257_v34  ;;  %v1259_v35 = vrot.slane %v1257_v34, 4  ;;  %v1216_v29 = vrot.slane %v1214_v24, 5  ;;  %v5162_v52 = vld [vmem:[#allocation2 + $0x298] ss:$36 sps:$4 sm:$0xff]   ;;  %v5164_v44 = vld [vmem:[#allocation2 + $0x2e4] ss:$36 sps:$4 sm:$0xff]  }
  0xdc   : > { %4889 = vmatpush3.bf16.msra.mxu0 %v5196_v0  ;;  %v1201_v19 = vor.u32 %v1200_v30, %v1197_v51  ;;  %v1211_v28 = vor.u32 %v1210_v18, %v1206_v17  ;;  %1294 = vst [vmem:[#allocation2 + $0x458] sm:$0xf] %v1258_v20  ;;  %v5169_v31 = vld [vmem:[#allocation2 + $0xa8] ss:$36 sps:$4 sm:$0xff]   ;;  %v5173_v38 = vld [vmem:[#allocation2 + $0xf4] ss:$36 sps:$4 sm:$0xff]  }
  0xdd   : > { %v1261_v22 = vsel %vm5390_vm4, %v1259_v35, %v1260_v16  ;;  %v5168_v37 = vld [vmem:[#allocation2 + $0x2e0] ss:$36 sps:$4 sm:$0xff]   ;;  %v5171_v26 = vld [vmem:[#allocation2 + $0x32c] ss:$36 sps:$4 sm:$0xff]   ;;  %v5177_v7 = vld [vmem:[#allocation2 + $0x374] ss:$36 sps:$4 sm:$0xff]  }
  0xde   : > { %v1202_v15 = vrot.slane %v1201_v19, 4  ;;  %v1212_v23 = vrot.slane %v1211_v28, 4  ;;  %1295 = vst [vmem:[#allocation2 + $0x47c] sm:$0xf] %v1261_v22  ;;  %v5175_v54 = vld [vmem:[#allocation2 + $0x328] ss:$36 sps:$4 sm:$0xff]  }
  0xdf   : > { %3155 = vmatmul.mubr.bf16.gmra.mxu0 %v5126_v48  ;;  %v5186_v59 = vld [vmem:[#allocation2 + $0x184] ss:$36 sps:$4 sm:$0xff]   ;;  %v5192_v14 = vld [vmem:[#allocation2 + $0x1cc] ss:$36 sps:$4 sm:$0xff]   ;;  %v5188_v49 = vld [vmem:[#allocation2 + $0x3b8] ss:$36 sps:$4 sm:$0xff]  }
  0xe0   : > { %3162 = vmatprep.mubr.bf16.mxu0 %v5132_v41  ;;  %v1207_v21 = vsel %vm5399_vm5, %v1202_v15, %v1206_v17  ;;  %v1217_v25 = vsel %vm5399_vm5, %v1212_v23, %v1216_v29  ;;  %v5176_v41 = vld [vmem:[#allocation2 + $0xf0] ss:$36 sps:$4 sm:$0xff]   ;;  %v5189_v10 = vld [vmem:[#allocation2 + $0x180] ss:$36 sps:$4 sm:$0xff]   ;;  %v5195_v24 = vld [vmem:[#allocation2 + $0x1c8] ss:$36 sps:$4 sm:$0xff]  }
  0xe1   : > { %1250 = vst [vmem:[#allocation2 + $0x454] sm:$0xf] %v1207_v21  ;;  %1251 = vst [vmem:[#allocation2 + $0x478] sm:$0xf] %v1217_v25  ;;  %v5190_v42 = vld [vmem:[#allocation2 + $0x404] ss:$36 sps:$4 sm:$0xff]  }
  0xe2   : > { %3066 = vmatmul.mubr.bf16.gmra.mxu1 %v5134_v11  ;;  %v5179_v11 = vld [vmem:[#allocation2 + $0x13c] ss:$36 sps:$4 sm:$0xff]   ;;  %v5199_v30 = vld [vmem:[#allocation2 + $0x214] ss:$36 sps:$4 sm:$0xff]   ;;  %v5197_v35 = vld [vmem:[#allocation2 + $0x44c] ss:$36 sps:$4 sm:$0xff]  }
  0xe3   : > { %3073 = vmatprep.mubr.bf16.mxu1 %v5136_v46  ;;  %v5194_v17 = vld [vmem:[#allocation2 + $0x400] ss:$36 sps:$4 sm:$0xff]   ;;  %v5202_v29 = vld [vmem:[#allocation2 + $0x210] ss:$36 sps:$4 sm:$0xff]   ;;  %s4274_s14 = sshll.u32 %s6561_s15, 7 }
  0xe4   : > { %v5205_v22 = vld [vmem:[#allocation2 + $0x25c] ss:$36 sps:$4 sm:$0xff]   ;;  %s6386_s21 = scalar_lea.vmem %s6519_s2, %s4274_s14 }
  0xe7   : > { %3163 = vmatmul.mubr.bf16.gmra.mxu0 %v5135_v3  ;;  %v5182_v3 = vld [vmem:[#allocation2 + $0x138] ss:$36 sps:$4 sm:$0xff]  }
  0xe8   : > { %3170 = vmatprep.mubr.bf16.mxu0 %v5138_v50 }
  0xea   : > { %3074 = vmatmul.mubr.bf16.gmra.mxu1 %v5140_v53 }
  0xeb   : > { %3081 = vmatprep.mubr.bf16.mxu1 %v5145_v55 }
  0xed   : > { %v4418_v40 = vpop.f32.mrf.mxu0  ;;  %v4490_v39 = vpop.f32.mrf.mxu1 }
  0xef   : > { %3171 = vmatmul.mubr.bf16.gmra.mxu0 %v5141_v12  ;;  %v4419_v8 = vpop.f32.mrf.mxu0  ;;  %v4491_v46 = vpop.f32.mrf.mxu1 }
  0xf0   : > { %3178 = vmatprep.mubr.bf16.mxu0 %v5147_v61  ;;  %v6055_v48 = vadd.f32 %v4419_v8, %v4418_v40  ;;  %v6057_v0 = vadd.f32 %v4491_v46, %v4490_v39  ;;  %v5181_v61 = vld [vmem:[#allocation2 + $0x370] ss:$36 sps:$4 sm:$0xff]   ;;  %v5210_v39 = vld [vmem:[#allocation2 + $0x2a4] ss:$36 sps:$4 sm:$0xff]  }
  0xf1   : > { %v4421_v43 = vpop.f32.mrf.mxu0  ;;  %v4493_v36 = vpop.f32.mrf.mxu1 }
  0xf2   : > { %3082 = vmatmul.mubr.bf16.gmra.mxu1 %v5149_v62 }
  0xf3   : > { %3283 = vmatprep.mubr.bf16.mxu1 %v5155_v57  ;;  %v4422_v1 = vpop.f32.mrf.mxu0  ;;  %v4494_v32 = vpop.f32.mrf.mxu1  ;;  %v5184_v57 = vld [vmem:[#allocation2 + $0x3bc] ss:$36 sps:$4 sm:$0xff]  }
  0xf4   : > { %v6059_v56 = vadd.f32 %v4422_v1, %v4421_v43  ;;  %v6061_v9 = vadd.f32 %v4494_v32, %v4493_v36  ;;  %v5207_v1 = vld [vmem:[#allocation2 + $0x68] ss:$36 sps:$4 sm:$0xff]  }
  0xf7   : > { %3179 = vmatmul.mubr.bf16.gmra.mxu0 %v5150_v5  ;;  %v4424_v50 = vpop.f32.mrf.mxu0 }
  0xf8   : > { %3186 = vmatprep.mubr.bf16.mxu0 %v5151_v63 }
  0xf9   : > { %v4425_v53 = vpop.f32.mrf.mxu0 }
  0xfa   : > { %3284 = vmatmul.mubr.bf16.vlgmr.msra.gmra.mxu1 %v5153_v4  ;;  %v6063_v12 = vadd.f32 %v4425_v53, %v4424_v50 }
  0xfb   : > { %3291 = vmatprep.mubr.bf16.mxu1 %v5160_v6  ;;  %v4496_v55 = vpop.f32.mrf.mxu1  ;;  %v4427_v62 = vpop.f32.mrf.mxu0 }
  0xfd   : > { %v4497_v5 = vpop.f32.mrf.mxu1  ;;  %v4428_v4 = vpop.f32.mrf.mxu0 }
  0xfe   : > { %v6065_v63 = vadd.f32 %v4497_v5, %v4496_v55 }
  0xff   : > { %3187 = vmatmul.mubr.bf16.gmra.mxu0 %v5156_v60  ;;  %v4499_v6 = vpop.f32.mrf.mxu1  ;;  %v6067_v60 = vadd.f32 %v4428_v4, %v4427_v62 }
 0x100   : > { %3194 = vmatprep.mubr.bf16.mxu0 %v5158_v13 }
 0x101   : > { %v4500_v13 = vpop.f32.mrf.mxu1 }
 0x102   : > { %3292 = vmatmul.mubr.bf16.gmra.mxu1 %v5163_v45  ;;  %v6069_v33 = vadd.f32 %v4500_v13, %v4499_v6 }
 0x103   : > { %3299 = vmatprep.mubr.bf16.mxu1 %v5166_v2 }
 0x107   : > { %3195 = vmatmul.mubr.bf16.gmra.mxu0 %v5162_v52  ;;  %v5201_v52 = vld [vmem:[#allocation2 + $0x448] ss:$36 sps:$4 sm:$0xff]  }
 0x108   : > { %3202 = vmatprep.mubr.bf16.mxu0 %v5164_v44 }
 0x10a   : > { %3300 = vmatmul.mubr.bf16.gmra.mxu1 %v5169_v31  ;;  %v4430_v58 = vpop.f32.mrf.mxu0  ;;  %v5206_v31 = vld [vmem:[#allocation2 + $0x20] ss:$36 sps:$4 sm:$0xff]  }
 0x10b   : > { %3307 = vmatprep.mubr.bf16.mxu1 %v5173_v38 }
 0x10c   : > { %v4431_v47 = vpop.f32.mrf.mxu0 }
 0x10d   : > { %v6071_v27 = vadd.f32 %v4431_v47, %v4430_v58 }
 0x10e   : > { %v4433_v51 = vpop.f32.mrf.mxu0  ;;  %v4502_v34 = vpop.f32.mrf.mxu1 }
 0x10f   : > { %3203 = vmatmul.mubr.bf16.gmra.mxu0 %v5168_v37 }
 0x110   : > { %3210 = vmatprep.mubr.bf16.mxu0 %v5171_v26  ;;  %v4434_v16 = vpop.f32.mrf.mxu0  ;;  %v4503_v18 = vpop.f32.mrf.mxu1 }
 0x111   : > { %v6073_v19 = vadd.f32 %v4434_v16, %v4433_v51  ;;  %v6075_v20 = vadd.f32 %v4503_v18, %v4502_v34 }
 0x112   : > { %3308 = vmatmul.mubr.bf16.gmra.mxu1 %v5176_v41  ;;  %v4505_v45 = vpop.f32.mrf.mxu1  ;;  %v5203_v41 = vld [vmem:[#allocation2 + $0x258] ss:$36 sps:$4 sm:$0xff]  }
 0x113   : > { %3315 = vmatprep.mubr.bf16.mxu1 %v5179_v11 }
 0x114   : > { %v4506_v28 = vpop.f32.mrf.mxu1 }
 0x115   : > { %v6077_v2 = vadd.f32 %v4506_v28, %v4505_v45  ;;  %v5217_v45 = vld [vmem:[#allocation2 + $0x188] ss:$36 sps:$4 sm:$0xff]  }
 0x117   : > { %3211 = vmatmul.mubr.bf16.gmra.mxu0 %v5175_v54  ;;  %v5211_v54 = vld [vmem:[#allocation2 + $0xb0] ss:$36 sps:$4 sm:$0xff]  }
 0x118   : > { %3218 = vmatprep.mubr.bf16.mxu0 %v5177_v7 }
 0x119   : > { %v4436_v15 = vpop.f32.mrf.mxu0 }
 0x11a   : > { %3316 = vmatmul.mubr.bf16.gmra.mxu1 %v5182_v3 }
 0x11b   : > { %3323 = vmatprep.mubr.bf16.mxu1 %v5186_v59  ;;  %v4437_v23 = vpop.f32.mrf.mxu0  ;;  %v5208_v59 = vld [vmem:[#allocation2 + $0x2a0] ss:$36 sps:$4 sm:$0xff]  }
 0x11c   : > { %v4508_v21 = vpop.f32.mrf.mxu1  ;;  %v6079_v25 = vadd.f32 %v4437_v23, %v4436_v15 }
 0x11d   : > { %v4439_v44 = vpop.f32.mrf.mxu0 }
 0x11e   : > { %v4509_v38 = vpop.f32.mrf.mxu1 }
 0x11f   : > { %3219 = vmatmul.mubr.bf16.gmra.mxu0 %v5181_v61  ;;  %v6081_v37 = vadd.f32 %v4509_v38, %v4508_v21  ;;  %v4440_v40 = vpop.f32.mrf.mxu0  ;;  %v5215_v61 = vld [vmem:[#allocation2 + $0x2ec] ss:$36 sps:$4 sm:$0xff]   ;;  %v5225_v38 = vld [vmem:[#allocation2 + $0x37c] ss:$36 sps:$4 sm:$0xff]  }
 0x120   : > { %3226 = vmatprep.mubr.bf16.mxu0 %v5184_v57  ;;  %v4511_v26 = vpop.f32.mrf.mxu1  ;;  %v6083_v8 = vadd.f32 %v4440_v40, %v4439_v44  ;;  %v5218_v44 = vld [vmem:[#allocation2 + $0x330] ss:$36 sps:$4 sm:$0xff]  }
 0x122   : > { %3324 = vmatmul.mubr.bf16.gmra.mxu1 %v5189_v10  ;;  %v4512_v43 = vpop.f32.mrf.mxu1  ;;  %v5212_v10 = vld [vmem:[#allocation2 + $0xf8] ss:$36 sps:$4 sm:$0xff]  }
 0x123   : > { %3331 = vmatprep.mubr.bf16.mxu1 %v5192_v14  ;;  %v6085_v11 = vadd.f32 %v4512_v43, %v4511_v26 }
 0x124   : > { %v4530_v46 = vpop.f32.mrf.mxu1 }
 0x126   : > { %v4531_v7 = vpop.f32.mrf.mxu1 }
 0x127   : > { %3227 = vmatmul.mubr.bf16.gmra.mxu0 %v5188_v49  ;;  %v4532_v32 = vadd.f32 %v4531_v7, %v4530_v46  ;;  %v5216_v49 = vld [vmem:[#allocation2 + $0x140] ss:$36 sps:$4 sm:$0xff]   ;;  %v5222_v46 = vld [vmem:[#allocation2 + $0x218] ss:$36 sps:$4 sm:$0xff]  }
 0x128   : > { %3234 = vmatprep.mubr.bf16.mxu0 %v5190_v42  ;;  %v4533_v50 = vpop.f32.mrf.mxu1 }
 0x129   : > { %v6090_v55 = vadd.f32 %v4532_v32, %v6055_v48 }
 0x12a   : > { %3332 = vmatmul.mubr.bf16.gmra.mxu1 %v5195_v24  ;;  %v4534_v57 = vpop.f32.mrf.mxu1  ;;  %v5213_v24 = vld [vmem:[#allocation2 + $0x2e8] ss:$36 sps:$4 sm:$0xff]  }
 0x12b   : > { %3339 = vmatprep.mubr.bf16.mxu1 %v5199_v30  ;;  %v4442_v36 = vpop.f32.mrf.mxu0  ;;  %v4535_v5 = vadd.f32 %v4534_v57, %v4533_v50  ;;  %v5220_v30 = vld [vmem:[#allocation2 + $0x334] ss:$36 sps:$4 sm:$0xff]  }
 0x12c   : > { %v4536_v6 = vpop.f32.mrf.mxu1 }
 0x12d   : > { %v4443_v3 = vpop.f32.mrf.mxu0  ;;  %v6095_v14 = vadd.f32 %v4535_v5, %v6059_v56 }
 0x12e   : > { %v6087_v53 = vadd.f32 %v4443_v3, %v4442_v36  ;;  %v4537_v42 = vpop.f32.mrf.mxu1 }
 0x12f   : > { %3235 = vmatmul.mubr.bf16.gmra.mxu0 %v5194_v17  ;;  %v4445_v62 = vpop.f32.mrf.mxu0  ;;  %v4538_v58 = vadd.f32 %v4537_v42, %v4536_v6 }
 0x130   : > { %3242 = vmatprep.mubr.bf16.mxu0 %v5197_v35  ;;  %v4539_v47 = vpop.f32.mrf.mxu1 }
 0x131   : > { %v4446_v4 = vpop.f32.mrf.mxu0  ;;  %v6098_v51 = vadd.f32 %v4538_v58, %v6063_v12  ;;  %v5231_v58 = vld [vmem:[#allocation2 + $0x2f0] ss:$36 sps:$4 sm:$0xff]  }
 0x132   : > { %3340 = vmatmul.mubr.bf16.gmra.mxu1 %v5202_v29  ;;  %v6092_v13 = vadd.f32 %v4446_v4, %v4445_v62  ;;  %v4540_v16 = vpop.f32.mrf.mxu1  ;;  %v5221_v29 = vld [vmem:[#allocation2 + $0x1d0] ss:$36 sps:$4 sm:$0xff]   ;;  %v5230_v62 = vld [vmem:[#allocation2 + $0x3c4] ss:$36 sps:$4 sm:$0xff]  }
 0x133   : > { %3347 = vmatprep.mubr.bf16.mxu1 %v5205_v22  ;;  %v4541_v18 = vadd.f32 %v4540_v16, %v4539_v47  ;;  %v5228_v16 = vld [vmem:[#allocation2 + $0x3c0] ss:$36 sps:$4 sm:$0xff]  }
 0x135   : > { %v6103_v28 = vadd.f32 %v4541_v18, %v6067_v60 }
 0x137   : > { %3243 = vmatmul.mubr.bf16.gmra.mxu0 %v5201_v52  ;;  %v4448_v48 = vpop.f32.mrf.mxu0  ;;  %v4542_v35 = vpop.f32.mrf.mxu1 }
 0x138   : > { %4890 = vmatprep.mubr.bf16.mxu0 %v5206_v31 }
 0x139   : > { %v4449_v34 = vpop.f32.mrf.mxu0  ;;  %v4543_v22 = vpop.f32.mrf.mxu1 }
 0x13a   : > { %3348 = vmatmul.mubr.bf16.gmra.mxu1 %v5203_v41  ;;  %v6100_v17 = vadd.f32 %v4449_v34, %v4448_v48  ;;  %v4544_v23 = vadd.f32 %v4543_v22, %v4542_v35 }
 0x13b   : > { %3355 = vmatprep.mubr.bf16.mxu1 %v5210_v39  ;;  %v4451_v56 = vpop.f32.mrf.mxu0  ;;  %v4545_v52 = vpop.f32.mrf.mxu1 }
 0x13c   : > { %v6108_v31 = vadd.f32 %v4544_v23, %v6071_v27  ;;  %v5232_v23 = vld [vmem:[#allocation2 + $0x338] ss:$36 sps:$4 sm:$0xff]  }
 0x13d   : > { %v4452_v15 = vpop.f32.mrf.mxu0  ;;  %v4546_v26 = vpop.f32.mrf.mxu1 }
 0x13e   : > { %v6105_v12 = vadd.f32 %v4452_v15, %v4451_v56  ;;  %v4547_v41 = vadd.f32 %v4546_v26, %v4545_v52  ;;  %v5235_v56 = vld [vmem:[#allocation2 + $0x40c] ss:$36 sps:$4 sm:$0xff]   ;;  %v5236_v52 = vld [vmem:[#allocation2 + $0x380] ss:$36 sps:$4 sm:$0xff]  }
 0x13f   : > { %4891 = vmatmul.mubr.bf16.vlgmr.msra.gmra.mxu0 %v5207_v1  ;;  %v4454_v21 = vpop.f32.mrf.mxu0 }
 0x140   : > { %4894 = vmatprep.mubr.bf16.mxu0 %v5211_v54  ;;  %v6113_v1 = vadd.f32 %v4547_v41, %v6073_v19  ;;  %v5226_v54 = vld [vmem:[#allocation2 + $0x260] ss:$36 sps:$4 sm:$0xff]  }
 0x141   : > { %v4455_v40 = vpop.f32.mrf.mxu0 }
 0x142   : > { %3356 = vmatmul.mubr.bf16.gmra.mxu1 %v5208_v59  ;;  %v6110_v60 = vadd.f32 %v4455_v40, %v4454_v21  ;;  %v4548_v43 = vpop.f32.mrf.mxu1  ;;  %v5223_v59 = vld [vmem:[#allocation2 + $0x378] ss:$36 sps:$4 sm:$0xff]  }
 0x143   : > { %3363 = vmatprep.mubr.bf16.mxu1 %v5215_v61  ;;  %v4457_v39 = vpop.f32.mrf.mxu0 }
 0x144   : > { %v4549_v7 = vpop.f32.mrf.mxu1 }
 0x145   : > { %v4458_v36 = vpop.f32.mrf.mxu0  ;;  %v4550_v32 = vadd.f32 %v4549_v7, %v4548_v43 }
 0x146   : > { %v6115_v27 = vadd.f32 %v4458_v36, %v4457_v39  ;;  %v4551_v50 = vpop.f32.mrf.mxu1  ;;  %v5233_v39 = vld [vmem:[#allocation2 + $0x408] ss:$36 sps:$4 sm:$0xff]  }
 0x147   : > { %4895 = vmatmul.mubr.bf16.gmra.mxu0 %v5212_v10  ;;  %v6118_v61 = vadd.f32 %v4550_v32, %v6079_v25 }
 0x148   : > { %4898 = vmatprep.mubr.bf16.mxu0 %v5216_v49  ;;  %v4552_v5 = vpop.f32.mrf.mxu1  ;;  %v5227_v49 = vld [vmem:[#allocation2 + $0x2a8] ss:$36 sps:$4 sm:$0xff]  }
 0x149   : > { %v4553_v4 = vadd.f32 %v4552_v5, %v4551_v50  ;;  %v5237_v50 = vld [vmem:[#allocation2 + $0x3c8] ss:$36 sps:$4 sm:$0xff]  }
 0x14a   : > { %3364 = vmatmul.mubr.bf16.gmra.mxu1 %v5213_v24 }
 0x14b   : > { %3371 = vmatprep.mubr.bf16.mxu1 %v5220_v30  ;;  %v6123_v42 = vadd.f32 %v4553_v4, %v6083_v8 }
 0x14c   : > { %v4460_v3 = vpop.f32.mrf.mxu0 }
 0x14e   : > { %v4461_v57 = vpop.f32.mrf.mxu0 }
 0x14f   : > { %4899 = vmatmul.mubr.bf16.gmra.mxu0 %v5217_v45  ;;  %v6120_v19 = vadd.f32 %v4461_v57, %v4460_v3 }
 0x150   : > { %4902 = vmatprep.mubr.bf16.mxu0 %v5221_v29  ;;  %v4463_v6 = vpop.f32.mrf.mxu0 }
 0x152   : > { %3372 = vmatmul.mubr.bf16.gmra.mxu1 %v5218_v44  ;;  %v4554_v10 = vpop.f32.mrf.mxu1  ;;  %v4464_v48 = vpop.f32.mrf.mxu0 }
 0x153   : > { %3379 = vmatprep.mubr.bf16.mxu1 %v5225_v38  ;;  %v6125_v25 = vadd.f32 %v4464_v48, %v4463_v6 }
 0x154   : > { %v4555_v47 = vpop.f32.mrf.mxu1 }
 0x155   : > { %v4556_v24 = vadd.f32 %v4555_v47, %v4554_v10 }
 0x156   : > { %v4557_v34 = vpop.f32.mrf.mxu1 }
 0x157   : > { %4903 = vmatmul.mubr.bf16.gmra.mxu0 %v5222_v46  ;;  %v4466_v30 = vpop.f32.mrf.mxu0  ;;  %v6128_v18 = vadd.f32 %v4556_v24, %v6087_v53  ;;  %v5240_v46 = vld [vmem:[#allocation2 + $0x454] ss:$36 sps:$4 sm:$0xff]  }
 0x158   : > { %4906 = vmatprep.mubr.bf16.mxu0 %v5226_v54  ;;  %v4558_v45 = vpop.f32.mrf.mxu1 }
 0x159   : > { %v4467_v35 = vpop.f32.mrf.mxu0  ;;  %v4559_v29 = vadd.f32 %v4558_v45, %v4557_v34 }
 0x15a   : > { %3380 = vmatmul.mubr.bf16.gmra.mxu1 %v5223_v59  ;;  %v6130_v8 = vadd.f32 %v4467_v35, %v4466_v30 }
 0x15b   : > { %3387 = vmatprep.mubr.bf16.mxu1 %v5230_v62  ;;  %v4469_v15 = vpop.f32.mrf.mxu0  ;;  %v6133_v21 = vadd.f32 %v4559_v29, %v6092_v13  ;;  %v5241_v62 = vld [vmem:[#allocation2 + $0x410] ss:$36 sps:$4 sm:$0xff]  }
 0x15d   : > { %v4560_v22 = vpop.f32.mrf.mxu1  ;;  %v4470_v44 = vpop.f32.mrf.mxu0 }
 0x15e   : > { %v6135_v53 = vadd.f32 %v4470_v44, %v4469_v15 }
 0x15f   : > { %4907 = vmatmul.mubr.bf16.gmra.mxu0 %v5227_v49  ;;  %v4561_v38 = vpop.f32.mrf.mxu1  ;;  %v5238_v49 = vld [vmem:[#allocation2 + $0x450] ss:$36 sps:$4 sm:$0xff]  }
 0x160   : > { %4910 = vmatprep.mubr.bf16.mxu0 %v5231_v58  ;;  %v4562_v40 = vadd.f32 %v4561_v38, %v4560_v22 }
 0x161   : > { %v4563_v41 = vpop.f32.mrf.mxu1 }
 0x162   : > { %3388 = vmatmul.mubr.bf16.gmra.mxu1 %v5228_v16  ;;  %v6138_v43 = vadd.f32 %v4562_v40, %v6100_v17  ;;  %v5242_v16 = vld [vmem:[#allocation2 + $0x458] ss:$36 sps:$4 sm:$0xff]  }
 0x163   : > { %3395 = vmatprep.mubr.bf16.mxu1 %v5235_v56  ;;  %v4472_v26 = vpop.f32.mrf.mxu0  ;;  %v4564_v36 = vpop.f32.mrf.mxu1 }
 0x164   : > { %v4565_v7 = vadd.f32 %v4564_v36, %v4563_v41 }
 0x165   : > { %v4473_v54 = vpop.f32.mrf.mxu0 }
 0x166   : > { %v6140_v13 = vadd.f32 %v4473_v54, %v4472_v26  ;;  %v6143_v59 = vadd.f32 %v4565_v7, %v6105_v12 }
 0x167   : > { %4911 = vmatmul.mubr.bf16.gmra.mxu0 %v5232_v23  ;;  %v4475_v32 = vpop.f32.mrf.mxu0 }
 0x168   : > { %4914 = vmatprep.mubr.bf16.mxu0 %v5236_v52  ;;  %v4566_v3 = vpop.f32.mrf.mxu1 }
 0x169   : > { %v4476_v57 = vpop.f32.mrf.mxu0 }
 0x16a   : > { %3396 = vmatmul.mubr.bf16.gmra.mxu1 %v5233_v39  ;;  %v4567_v5 = vpop.f32.mrf.mxu1  ;;  %v4477_v17 = vadd.f32 %v4476_v57, %v4475_v32 }
 0x16b   : > { %3403 = vmatprep.mubr.bf16.mxu1 %v5240_v46  ;;  %v4568_v4 = vadd.f32 %v4567_v5, %v4566_v3  ;;  %v4478_v6 = vpop.f32.mrf.mxu0 }
 0x16c   : > { %v4569_v10 = vpop.f32.mrf.mxu1 }
 0x16d   : > { %v6146_v58 = vadd.f32 %v4568_v4, %v6110_v60  ;;  %v4479_v48 = vpop.f32.mrf.mxu0 }
 0x16e   : > { %v4570_v47 = vpop.f32.mrf.mxu1  ;;  %v4480_v24 = vadd.f32 %v4479_v48, %v4478_v6 }
 0x16f   : > { %4915 = vmatmul.mubr.bf16.gmra.mxu0 %v5237_v50  ;;  %v4571_v30 = vadd.f32 %v4570_v47, %v4569_v10  ;;  %v4481_v12 = vpop.f32.mrf.mxu0 }
 0x170   : > { %4918 = vmatprep.mubr.bf16.mxu0 %v5241_v62 }
 0x171   : > { %v4572_v34 = vpop.f32.mrf.mxu1  ;;  %v6149_v56 = vadd.f32 %v4571_v30, %v6115_v27  ;;  %v4482_v35 = vpop.f32.mrf.mxu0 }
 0x172   : > { %3404 = vmatmul.mubr.bf16.gmra.mxu1 %v5238_v49  ;;  %v4483_v29 = vadd.f32 %v4482_v35, %v4481_v12 }
 0x173   : > { %v4573_v45 = vpop.f32.mrf.mxu1 }
 0x174   : > { %v4574_v15 = vadd.f32 %v4573_v45, %v4572_v34 }
 0x175   : > { %v4575_v60 = vpop.f32.mrf.mxu1 }
 0x176   : > { %v6152_v23 = vadd.f32 %v4574_v15, %v6120_v19 }
 0x177   : > { %v4484_v22 = vpop.f32.mrf.mxu0  ;;  %4919 = vmatmul.mubr.bf16.gmra.mxu0 %v5242_v16  ;;  %v4576_v44 = vpop.f32.mrf.mxu1 }
 0x178   : > { %v4577_v40 = vadd.f32 %v4576_v44, %v4575_v60 }
 0x179   : > { %v4485_v52 = vpop.f32.mrf.mxu0 }
 0x17a   : > { %v4486_v38 = vadd.f32 %v4485_v52, %v4484_v22  ;;  %v4578_v41 = vpop.f32.mrf.mxu1  ;;  %v6155_v39 = vadd.f32 %v4577_v40, %v6125_v25 }
 0x17b   : > { %v4487_v26 = vpop.f32.mrf.mxu0 }
 0x17c   : > { %v4579_v46 = vpop.f32.mrf.mxu1 }
 0x17d   : > { %v4488_v27 = vpop.f32.mrf.mxu0  ;;  %v4580_v36 = vadd.f32 %v4579_v46, %v4578_v41 }
 0x17e   : > { %v4489_v54 = vadd.f32 %v4488_v27, %v4487_v26  ;;  %v4581_v32 = vpop.f32.mrf.mxu1 }
 0x17f   : > { %v4642_v7 = vpop.f32.mrf.mxu0  ;;  %v6158_v3 = vadd.f32 %v4580_v36, %v6130_v8 }
 0x180   : > { %v4582_v50 = vpop.f32.mrf.mxu1 }
 0x181   : > { %v4643_v19 = vpop.f32.mrf.mxu0  ;;  %v4583_v57 = vadd.f32 %v4582_v50, %v4581_v32 }
 0x182   : > { %v4644_v62 = vadd.f32 %v4643_v19, %v4642_v7  ;;  %v4584_v4 = vpop.f32.mrf.mxu1 }
 0x183   : > { %v4645_v5 = vpop.f32.mrf.mxu0  ;;  %v6164_v25 = vadd.f32 %v4583_v57, %v6135_v53 }
 0x184   : > { %v6161_v6 = vadd.f32 %v4644_v62, %v6090_v55  ;;  %v4585_v49 = vpop.f32.mrf.mxu1 }
 0x185   : > { %v4646_v10 = vpop.f32.mrf.mxu0  ;;  %v4586_v47 = vadd.f32 %v4585_v49, %v4584_v4 }
 0x186   : > { %v4647_v48 = vadd.f32 %v4646_v10, %v4645_v5  ;;  %v4587_v12 = vpop.f32.mrf.mxu1 }
 0x187   : > { %v4648_v30 = vpop.f32.mrf.mxu0  ;;  %v6170_v34 = vadd.f32 %v4586_v47, %v6140_v13 }
 0x188   : > { %v6167_v8 = vadd.f32 %v4647_v48, %v6095_v14  ;;  %v4588_v35 = vpop.f32.mrf.mxu1 }
 0x189   : > { %v4649_v16 = vpop.f32.mrf.mxu0  ;;  %v4589_v55 = vadd.f32 %v4588_v35, %v4587_v12 }
 0x18a   : > { %v4650_v45 = vadd.f32 %v4649_v16, %v4648_v30  ;;  %v4590_v22 = vpop.f32.mrf.mxu1 }
 0x18b   : > { %v4651_v15 = vpop.f32.mrf.mxu0  ;;  %v6175_v60 = vadd.f32 %v4589_v55, %v4477_v17 }
 0x18c   : > { %v6173_v53 = vadd.f32 %v4650_v45, %v6098_v51  ;;  %v4591_v44 = vpop.f32.mrf.mxu1 }
 0x18d   : > { %v4652_v52 = vpop.f32.mrf.mxu0  ;;  %v4592_v26 = vadd.f32 %v4591_v44, %v4590_v22 }
 0x18e   : > { %v4653_v40 = vadd.f32 %v4652_v52, %v4651_v15  ;;  %v4593_v41 = vpop.f32.mrf.mxu1 }
 0x18f   : > { %v4654_v14 = vpop.f32.mrf.mxu0  ;;  %v6180_v27 = vadd.f32 %v4592_v26, %v4480_v24 }
 0x190   : > { %v6178_v13 = vadd.f32 %v4653_v40, %v6103_v28  ;;  %v4594_v36 = vpop.f32.mrf.mxu1 }
 0x191   : > { %v4655_v46 = vpop.f32.mrf.mxu0  ;;  %v4595_v32 = vadd.f32 %v4594_v36, %v4593_v41 }
 0x192   : > { %v4656_v7 = vadd.f32 %v4655_v46, %v4654_v14  ;;  %v4596_v51 = vpop.f32.mrf.mxu1 }
 0x193   : > { %v4657_v19 = vpop.f32.mrf.mxu0  ;;  %v6185_v50 = vadd.f32 %v4595_v32, %v4483_v29 }
 0x194   : > { %v6183_v17 = vadd.f32 %v4656_v7, %v6108_v31  ;;  %v4597_v57 = vpop.f32.mrf.mxu1 }
 0x195   : > { %v4658_v62 = vpop.f32.mrf.mxu0  ;;  %v4598_v4 = vadd.f32 %v4597_v57, %v4596_v51 }
 0x196   : > { %v4659_v5 = vadd.f32 %v4658_v62, %v4657_v19  ;;  %v4599_v28 = vpop.f32.mrf.mxu1 }
 0x197   : > { %v4660_v10 = vpop.f32.mrf.mxu0  ;;  %v6190_v49 = vadd.f32 %v4598_v4, %v4486_v38 }
 0x198   : > { %v6188_v24 = vadd.f32 %v4659_v5, %v6113_v1  ;;  %v4600_v47 = vpop.f32.mrf.mxu1 }
 0x199   : > { %v4661_v48 = vpop.f32.mrf.mxu0  ;;  %v4601_v12 = vadd.f32 %v4600_v47, %v4599_v28 }
 0x19a   : > { %v4662_v30 = vadd.f32 %v4661_v48, %v4660_v10  ;;  %v4602_v31 = vpop.f32.mrf.mxu1 }
 0x19b   : > { %v4663_v16 = vpop.f32.mrf.mxu0  ;;  %v6195_v35 = vadd.f32 %v4601_v12, %v4489_v54 }
 0x19c   : > { %v6193_v29 = vadd.f32 %v4662_v30, %v6118_v61  ;;  %v4603_v55 = vpop.f32.mrf.mxu1 }
 0x19d   : > { %v4664_v45 = vpop.f32.mrf.mxu0  ;;  %v4604_v22 = vadd.f32 %v4603_v55, %v4602_v31 }
 0x19e   : > { %v4665_v15 = vadd.f32 %v4664_v45, %v4663_v16  ;;  %v4605_v1 = vpop.f32.mrf.mxu1 }
 0x19f   : > { %v4666_v52 = vpop.f32.mrf.mxu0  ;;  %v6201_v44 = vadd.f32 %v4604_v22, %v6057_v0 }
 0x1a0   : > { %v6198_v38 = vadd.f32 %v4665_v15, %v6123_v42  ;;  %v4606_v26 = vpop.f32.mrf.mxu1 }
 0x1a1   : > { %v4667_v40 = vpop.f32.mrf.mxu0  ;;  %v4607_v41 = vadd.f32 %v4606_v26, %v4605_v1 }
 0x1a2   : > { %v4668_v14 = vadd.f32 %v4667_v40, %v4666_v52  ;;  %v4608_v46 = vpop.f32.mrf.mxu1 }
 0x1a3   : > { %v4669_v61 = vpop.f32.mrf.mxu0  ;;  %v6207_v36 = vadd.f32 %v4607_v41, %v6061_v9 }
 0x1a4   : > { %v6204_v54 = vadd.f32 %v4668_v14, %v6128_v18  ;;  %v4609_v32 = vpop.f32.mrf.mxu1 }
 0x1a5   : > { %v4670_v7 = vpop.f32.mrf.mxu0  ;;  %v4610_v42 = vadd.f32 %v4609_v32, %v4608_v46 }
 0x1a6   : > { %v4671_v19 = vadd.f32 %v4670_v7, %v4669_v61  ;;  %v4611_v62 = vpop.f32.mrf.mxu1 }
 0x1a7   : > { %v4672_v51 = vpop.f32.mrf.mxu0  ;;  %v6213_v57 = vadd.f32 %v4610_v42, %v6065_v63 }
 0x1a8   : > { %v6210_v0 = vadd.f32 %v4671_v19, %v6133_v21  ;;  %v4612_v4 = vpop.f32.mrf.mxu1 }
 0x1a9   : > { %v4673_v5 = vpop.f32.mrf.mxu0  ;;  %v4613_v18 = vadd.f32 %v4612_v4, %v4611_v62 }
 0x1aa   : > { %v4674_v10 = vadd.f32 %v4673_v5, %v4672_v51  ;;  %v4614_v48 = vpop.f32.mrf.mxu1 }
 0x1ab   : > { %v4675_v28 = vpop.f32.mrf.mxu0  ;;  %v6219_v47 = vadd.f32 %v4613_v18, %v6069_v33 }
 0x1ac   : > { %v6216_v9 = vadd.f32 %v4674_v10, %v6138_v43  ;;  %v4615_v12 = vpop.f32.mrf.mxu1 }
 0x1ad   : > { %v4676_v30 = vpop.f32.mrf.mxu0  ;;  %v4616_v21 = vadd.f32 %v4615_v12, %v4614_v48 }
 0x1ae   : > { %v4677_v16 = vadd.f32 %v4676_v30, %v4675_v28  ;;  %v4617_v45 = vpop.f32.mrf.mxu1 }
 0x1af   : > { %v4678_v31 = vpop.f32.mrf.mxu0  ;;  %v6225_v55 = vadd.f32 %v4616_v21, %v6075_v20 }
 0x1b0   : > { %v6222_v63 = vadd.f32 %v4677_v16, %v6143_v59  ;;  %v4618_v22 = vpop.f32.mrf.mxu1 }
 0x1b1   : > { %v4679_v15 = vpop.f32.mrf.mxu0  ;;  %v4619_v43 = vadd.f32 %v4618_v22, %v4617_v45 }
 0x1b2   : > { %v4680_v52 = vadd.f32 %v4679_v15, %v4678_v31  ;;  %v4620_v40 = vpop.f32.mrf.mxu1 }
 0x1b3   : > { %v4681_v1 = vpop.f32.mrf.mxu0  ;;  %v6231_v26 = vadd.f32 %v4619_v43, %v6077_v2 }
 0x1b4   : > { %v6228_v33 = vadd.f32 %v4680_v52, %v6146_v58  ;;  %v4621_v41 = vpop.f32.mrf.mxu1 }
 0x1b5   : > { %v4682_v14 = vpop.f32.mrf.mxu0  ;;  %v4622_v59 = vadd.f32 %v4621_v41, %v4620_v40 }
 0x1b6   : > { %v4683_v61 = vadd.f32 %v4682_v14, %v4681_v1  ;;  %v4623_v7 = vpop.f32.mrf.mxu1 }
 0x1b7   : > { %v4684_v46 = vpop.f32.mrf.mxu0  ;;  %v6237_v32 = vadd.f32 %v4622_v59, %v6081_v37 }
 0x1b8   : > { %v6234_v20 = vadd.f32 %v4683_v61, %v6149_v56  ;;  %v4624_v42 = vpop.f32.mrf.mxu1 }
 0x1b9   : > { %v4685_v19 = vpop.f32.mrf.mxu0  ;;  %v4625_v58 = vadd.f32 %v4624_v42, %v4623_v7 }
 0x1ba   : > { %v4686_v51 = vadd.f32 %v4685_v19, %v4684_v46  ;;  %v4754_v5 = vpop.f32.mrf.mxu1 }
 0x1bb   : > { %v4687_v62 = vpop.f32.mrf.mxu0  ;;  %v6243_v4 = vadd.f32 %v4625_v58, %v6085_v11 }
 0x1bc   : > { %v6240_v2 = vadd.f32 %v4686_v51, %v6152_v23  ;;  %v4755_v18 = vpop.f32.mrf.mxu1 }
 0x1bd   : > { %6526 = vst [vmem:[#allocation3_spill] sm:$0xff] %v6243_v4  ;;  %v4688_v10 = vpop.f32.mrf.mxu0  ;;  %v4756_v56 = vadd.f32 %v4755_v18, %v4754_v5 }
 0x1be   : > { %v4689_v28 = vadd.f32 %v4688_v10, %v4687_v62  ;;  %v4757_v30 = vpop.f32.mrf.mxu1 }
 0x1bf   : > { %v4690_v48 = vpop.f32.mrf.mxu0  ;;  %v6249_v12 = vadd.f32 %v4756_v56, %v6161_v6 }
 0x1c0   : > { %v6246_v37 = vadd.f32 %v4689_v28, %v6155_v39  ;;  %v4758_v21 = vpop.f32.mrf.mxu1 }
 0x1c1   : > { %v4691_v16 = vpop.f32.mrf.mxu0  ;;  %v4759_v23 = vadd.f32 %v4758_v21, %v4757_v30 }
 0x1c2   : > { %v4692_v31 = vadd.f32 %v4691_v16, %v4690_v48  ;;  %v6251_v15 = vpop.f32.mrf.mxu1 }
 0x1c3   : > { %v4693_v45 = vpop.f32.mrf.mxu0  ;;  %v6257_v22 = vadd.f32 %v4759_v23, %v6167_v8 }
 0x1c4   : > { %v6254_v11 = vadd.f32 %v4692_v31, %v6158_v3  ;;  %v6259_v43 = vpop.f32.mrf.mxu1 }
 0x1c5   : > { %v4694_v52 = vpop.f32.mrf.mxu0 }
 0x1c6   : > { %v4695_v39 = vadd.f32 %v4694_v52, %v4693_v45  ;;  %v6261_v6 = vpop.f32.mrf.mxu1 }
 0x1c7   : > { %v4696_v1 = vpop.f32.mrf.mxu0 }
 0x1c8   : > { %v6264_v40 = vadd.f32 %v4695_v39, %v6164_v25  ;;  %v6266_v41 = vpop.f32.mrf.mxu1 }
 0x1c9   : > { %v4697_v14 = vpop.f32.mrf.mxu0 }
 0x1ca   : > { %6527 = vst [vmem:[#allocation4_spill] sm:$0xff] %v6264_v40  ;;  %v4698_v61 = vadd.f32 %v4697_v14, %v4696_v1  ;;  %v6268_v3 = vpop.f32.mrf.mxu1 }
 0x1cb   : > { %v4699_v59 = vpop.f32.mrf.mxu0 }
 0x1cc   : > { %v6271_v8 = vadd.f32 %v4698_v61, %v6170_v34  ;;  %v6273_v7 = vpop.f32.mrf.mxu1 }
 0x1cd   : > { %v4700_v46 = vpop.f32.mrf.mxu0 }
 0x1ce   : > { %v4701_v19 = vadd.f32 %v4700_v46, %v4699_v59  ;;  %v6275_v51 = vpop.f32.mrf.mxu1 }
 0x1cf   : > { %v4702_v42 = vpop.f32.mrf.mxu0 }
 0x1d0   : > { %v6278_v25 = vadd.f32 %v4701_v19, %v6175_v60  ;;  %v6280_v62 = vpop.f32.mrf.mxu1 }
 0x1d1   : > { %v4703_v58 = vpop.f32.mrf.mxu0 }
 0x1d2   : > { %v4704_v5 = vadd.f32 %v4703_v58, %v4702_v42  ;;  %v6282_v18 = vpop.f32.mrf.mxu1 }
 0x1d3   : > { %v4705_v10 = vpop.f32.mrf.mxu0 }
 0x1d4   : > { %v6285_v34 = vadd.f32 %v4704_v5, %v6180_v27  ;;  %v6287_v56 = vpop.f32.mrf.mxu1 }
 0x1d5   : > { %v4706_v28 = vpop.f32.mrf.mxu0 }
 0x1d6   : > { %6528 = vst [vmem:[#allocation5_spill] sm:$0xff] %v6285_v34  ;;  %v4707_v48 = vadd.f32 %v4706_v28, %v4705_v10  ;;  %v6289_v16 = vpop.f32.mrf.mxu1 }
 0x1d7   : > { %v4708_v30 = vpop.f32.mrf.mxu0 }
 0x1d8   : > { %v6292_v60 = vadd.f32 %v4707_v48, %v6185_v50  ;;  %v6294_v31 = vpop.f32.mrf.mxu1 }
 0x1d9   : > { %v4709_v21 = vpop.f32.mrf.mxu0 }
 0x1da   : > { %6529 = vst [vmem:[#allocation6_spill] sm:$0xff] %v6292_v60  ;;  %v4710_v23 = vadd.f32 %v4709_v21, %v4708_v30  ;;  %v6296_v52 = vpop.f32.mrf.mxu1 }
 0x1db   : > { %v4711_v45 = vpop.f32.mrf.mxu0 }
 0x1dc   : > { %v6299_v27 = vadd.f32 %v4710_v23, %v6190_v49  ;;  %v6301_v1 = vpop.f32.mrf.mxu1 }
 0x1dd   : > { %v4712_v39 = vpop.f32.mrf.mxu0 }
 0x1de   : > { %6530 = vst [vmem:[#allocation7_spill] sm:$0xff] %v6299_v27  ;;  %v4713_v14 = vadd.f32 %v4712_v39, %v4711_v45  ;;  %v6303_v59 = vpop.f32.mrf.mxu1 }
 0x1df   : > { %v4714_v61 = vpop.f32.mrf.mxu0 }
 0x1e0   : > { %v6306_v50 = vadd.f32 %v4713_v14, %v6195_v35  ;;  %v6308_v19 = vpop.f32.mrf.mxu1 }
 0x1e1   : > { %v4715_v46 = vpop.f32.mrf.mxu0 }
 0x1e2   : > { %6531 = vst [vmem:[#allocation8_spill] sm:$0xff] %v6306_v50  ;;  %v4716_v42 = vadd.f32 %v4715_v46, %v4714_v61  ;;  %v6310_v5 = vpop.f32.mrf.mxu1 }
 0x1e3   : > { %v4717_v58 = vpop.f32.mrf.mxu0 }
 0x1e4   : > { %v6313_v49 = vadd.f32 %v4716_v42, %v6201_v44  ;;  %v6315_v28 = vpop.f32.mrf.mxu1 }
 0x1e5   : > { %v4718_v10 = vpop.f32.mrf.mxu0 }
 0x1e6   : > { %6532 = vst [vmem:[#allocation9_spill] sm:$0xff] %v6313_v49  ;;  %v4719_v48 = vadd.f32 %v4718_v10, %v4717_v58  ;;  %v6317_v21 = vpop.f32.mrf.mxu1 }
 0x1e7   : > { %v4720_v30 = vpop.f32.mrf.mxu0 }
 0x1e8   : > { %v6320_v35 = vadd.f32 %v4719_v48, %v6207_v36  ;;  %v6322_v45 = vpop.f32.mrf.mxu1 }
 0x1e9   : > { %v4721_v23 = vpop.f32.mrf.mxu0 }
 0x1ea   : > { %6533 = vst [vmem:[#allocation10_spill] sm:$0xff] %v6320_v35  ;;  %v4722_v39 = vadd.f32 %v4721_v23, %v4720_v30  ;;  %v6324_v61 = vpop.f32.mrf.mxu1 }
 0x1eb   : > { %v4723_v14 = vpop.f32.mrf.mxu0 }
 0x1ec   : > { %v6327_v44 = vadd.f32 %v4722_v39, %v6213_v57  ;;  %v6329_v42 = vpop.f32.mrf.mxu1 }
 0x1ed   : > { %v4724_v46 = vpop.f32.mrf.mxu0 }
 0x1ee   : > { %6534 = vst [vmem:[#allocation11_spill] sm:$0xff] %v6327_v44  ;;  %v4725_v58 = vadd.f32 %v4724_v46, %v4723_v14  ;;  %v6331_v4 = vpop.f32.mrf.mxu1 }
 0x1ef   : > { %v4726_v10 = vpop.f32.mrf.mxu0 }
 0x1f0   : > { %v6334_v36 = vadd.f32 %v4725_v58, %v6219_v47  ;;  %v6336_v35 = vpop.f32.mrf.mxu1 }
 0x1f1   : > { %v4727_v48 = vpop.f32.mrf.mxu0 }
 0x1f2   : > { %6535 = vst [vmem:[#allocation12_spill] sm:$0xff] %v6334_v36  ;;  %v4728_v30 = vadd.f32 %v4727_v48, %v4726_v10  ;;  %v6338_v49 = vpop.f32.mrf.mxu1 }
 0x1f3   : > { %v4729_v23 = vpop.f32.mrf.mxu0 }
 0x1f4   : > { %v6341_v57 = vadd.f32 %v4728_v30, %v6225_v55  ;;  %v6343_v44 = vpop.f32.mrf.mxu1 }
 0x1f5   : > { %v4730_v39 = vpop.f32.mrf.mxu0 }
 0x1f6   : > { %6536 = vst [vmem:[#allocation13_spill] sm:$0xff] %v6341_v57  ;;  %v4731_v14 = vadd.f32 %v4730_v39, %v4729_v23  ;;  %v6345_v60 = vpop.f32.mrf.mxu1  ;;  %v4765_v39 = vadd.f32 %v6266_v41, %v6261_v6  ;;  %v4774_v41 = vadd.f32 %v6287_v56, %v6282_v18 }
 0x1f7   : > { %v4732_v46 = vpop.f32.mrf.mxu0 }
 0x1f8   : > { %v6348_v47 = vadd.f32 %v4731_v14, %v6231_v26  ;;  %v6350_v36 = vpop.f32.mrf.mxu1  ;;  %v4762_v26 = vadd.f32 %v6259_v43, %v6251_v15 }
 0x1f9   : > { %v4733_v58 = vpop.f32.mrf.mxu0 }
 0x1fa   : > { %6537 = vst [vmem:[#allocation14_spill] sm:$0xff] %v6348_v47  ;;  %v4734_v10 = vadd.f32 %v4733_v58, %v4732_v46  ;;  %v6354_v50 = vpop.f32.mrf.mxu1  ;;  %v3294_v57 = vadd.f32 %v4762_v26, %v6173_v53  ;;  %v4771_v26 = vadd.f32 %v6280_v62, %v6275_v51  ;;  %v4789_v62 = vadd.f32 %v6322_v45, %v6317_v21 }
 0x1fb   : > { %v6352_v48 = vpop.f32.mrf.mxu0 }
 0x1fc   : > { %6538 = vst [vmem:[#allocation15_spill] sm:$0xff] %v6352_v48  ;;  %v6357_v55 = vadd.f32 %v4734_v10, %v6237_v32  ;;  %v6361_v23 = vpop.f32.mrf.mxu1  ;;  %v3297_v32 = vadd.f32 %v4765_v39, %v6178_v13  ;;  %v4768_v10 = vadd.f32 %v6273_v7, %v6268_v3  ;;  %v4777_v48 = vadd.f32 %v6294_v31, %v6289_v16 }
 0x1fd   : > { %v6359_v30 = vpop.f32.mrf.mxu0  ;;  %v3310_v39 = vadd.f32 %v4774_v41, %v6193_v29  ;;  %v4780_v29 = vadd.f32 %v6301_v1, %v6296_v52  ;;  %v4783_v52 = vadd.f32 %v6308_v19, %v6303_v59 }
 0x1fe   : > { %6539 = vst [vmem:[#allocation16_spill] sm:$0xff] %v6357_v55  ;;  %6540 = vst [vmem:[#allocation17_spill] sm:$0xff] %v6359_v30  ;;  %v6367_v47 = vpop.f32.mrf.mxu1 }
 0x1ff   : > { %v4892_v14 = vpop.f32.mrf.mxu0  ;;  %v3318_v21 = vadd.f32 %v4780_v29, %v6204_v54  ;;  %v4792_v54 = vadd.f32 %v6329_v42, %v6324_v61 }
 0x200   : > { %v6369_v58 = vpop.f32.mrf.mxu1  ;;  %v3455_v15 = vadd.f32 %v4892_v14, %v3294_v57  ;;  %v3302_v57 = vadd.f32 %v4768_v10, %v6183_v17 }
 0x201   : > { %v3446_v46 = vpop.f32.mrf.mxu0 }
 0x202   : > { %v6376_v30 = vpop.f32.mrf.mxu1  ;;  %v3447_v43 = vadd.f32 %v3446_v46, %v6249_v12  ;;  %v3313_v46 = vadd.f32 %v4777_v48, %v6198_v38  ;;  %v4786_v38 = vadd.f32 %v6315_v28, %v6310_v5  ;;  %v3305_v48 = vadd.f32 %v4771_v26, %v6188_v24 }
 0x203   : > { %v4893_v55 = vpop.f32.mrf.mxu0  ;;  %v3329_v26 = vadd.f32 %v4789_v62, %v6222_v63 }
 0x204   : > { %v3458_v6 = vadd.f32 %v4893_v55, %v3297_v32  ;;  %v6388_v13 = vpop.f32.mrf.mxu1  ;;  %v3771_v56 = vmul.f32 %v3447_v43, %v3447_v43 }
 0x205   : > { %v3449_v53 = vpop.f32.mrf.mxu0 }
 0x206   : > { %v4315_v3 = vpack.c.bf16 %v3458_v6, %v3455_v15  ;;  %v3450_v12 = vadd.f32 %v3449_v53, %v6257_v22  ;;  %v6392_v18 = vpop.f32.mrf.mxu1  ;;  %v3773_v22 = vmul.f32 %v3455_v15, %v3455_v15  ;;  %v3774_v27 = vmul.f32 %v3458_v6, %v3458_v6 }
 0x207   : > { %v4896_v7 = vpop.f32.mrf.mxu0 }
 0x208   : > { %4387 = vst [vmem:[%s6386_s21 + $0x8] sm:$0xff] %v4315_v3   ;;  %v4310_v16 = vpack.c.bf16 %v3450_v12, %v3447_v43  ;;  %v3733_v31 = vadd.f32 %v3450_v12, %v3447_v43  ;;  %v3772_v55 = vmul.f32 %v3450_v12, %v3450_v12  ;;  %v6399_v32 = vpop.f32.mrf.mxu1  ;;  %v3471_v12 = vadd.f32 %v4896_v7, %v3310_v39 }
 0x209   : > { %v3462_v14 = vpop.f32.mrf.mxu0 }
 0x20a   : > { %4311 = vst [vmem:[%s6386_s21] sm:$0xff] %v4310_v16   ;;  %v3734_v17 = vadd.f32 %v3733_v31, %v3455_v15  ;;  %v3803_v10 = vadd.f32 %v3772_v55, %v3771_v56  ;;  %v3463_v53 = vadd.f32 %v3462_v14, %v3302_v57  ;;  %v6402_v34 = vpop.f32.mrf.mxu1  ;;  %v3777_v39 = vmul.f32 %v3471_v12, %v3471_v12 }
 0x20b   : > { %v4897_v3 = vpop.f32.mrf.mxu0 }
 0x20c   : > { %v3804_v43 = vadd.f32 %v3803_v10, %v3773_v22  ;;  %v3735_v40 = vadd.f32 %v3734_v17, %v3458_v6  ;;  %v3474_v51 = vadd.f32 %v4897_v3, %v3313_v46  ;;  %v6411_v41 = vpop.f32.mrf.mxu1  ;;  %v3775_v56 = vmul.f32 %v3463_v53, %v3463_v53 }
 0x20d   : > { %v3465_v15 = vpop.f32.mrf.mxu0 }
 0x20e   : > { %v3736_v57 = vadd.f32 %v3735_v40, %v3463_v53  ;;  %v3805_v7 = vadd.f32 %v3804_v43, %v3774_v27  ;;  %v4325_v6 = vpack.c.bf16 %v3474_v51, %v3471_v12  ;;  %v3466_v16 = vadd.f32 %v3465_v15, %v3305_v48  ;;  %v6413_v55 = vpop.f32.mrf.mxu1 }
 0x20f   : > { %v4900_v31 = vpop.f32.mrf.mxu0  ;;  %v3326_v27 = vadd.f32 %v4786_v38, %v6216_v9  ;;  %v3778_v3 = vmul.f32 %v3474_v51, %v3474_v51  ;;  %v4801_v38 = vadd.f32 %v6350_v36, %v6345_v60 }
 0x210   : > { %v3806_v1 = vadd.f32 %v3805_v7, %v3775_v56  ;;  %4389 = vst [vmem:[%s6386_s21 + $0x18] sm:$0xff] %v4325_v6   ;;  %v4320_v5 = vpack.c.bf16 %v3466_v16, %v3463_v53  ;;  %v3737_v28 = vadd.f32 %v3736_v57, %v3466_v16  ;;  %v3776_v24 = vmul.f32 %v3466_v16, %v3466_v16  ;;  %v6419_v40 = vpop.f32.mrf.mxu1 }
 0x211   : > { %v3478_v45 = vpop.f32.mrf.mxu0  ;;  %v3487_v17 = vadd.f32 %v4900_v31, %v3326_v27  ;;  %v3321_v53 = vadd.f32 %v4783_v52, %v6210_v0  ;;  %v3345_v31 = vadd.f32 %v4801_v38, %v6246_v37 }
 0x212   : > { %4388 = vst [vmem:[%s6386_s21 + $0x10] sm:$0xff] %v4320_v5   ;;  %v3738_v14 = vadd.f32 %v3737_v28, %v3471_v12  ;;  %v3807_v46 = vadd.f32 %v3806_v1, %v3776_v24  ;;  %v3479_v22 = vadd.f32 %v3478_v45, %v3318_v21  ;;  %v6424_v19 = vpop.f32.mrf.mxu1  ;;  %v4798_v12 = vadd.f32 %v6343_v44, %v6338_v49 }
 0x213   : > { %v4901_v59 = vpop.f32.mrf.mxu0  ;;  %v3334_v44 = vadd.f32 %v4792_v54, %v6228_v33  ;;  %v3781_v52 = vmul.f32 %v3487_v17, %v3487_v17  ;;  %v4804_v33 = vadd.f32 %v6361_v23, %v6354_v50 }
 0x214   : > { %v3490_v10 = vadd.f32 %v4901_v59, %v3329_v26  ;;  %v3808_v9 = vadd.f32 %v3807_v46, %v3777_v39  ;;  %v3739_v43 = vadd.f32 %v3738_v14, %v3474_v51  ;;  %v6429_v29 = vpop.f32.mrf.mxu1  ;;  %v3779_v15 = vmul.f32 %v3479_v22, %v3479_v22 }
 0x215   : > { %v3481_v63 = vpop.f32.mrf.mxu0  ;;  %v4795_v51 = vadd.f32 %v6336_v35, %v6331_v4  ;;  %v3342_v16 = vadd.f32 %v4798_v12, %v6240_v2  ;;  %v4810_v14 = vadd.f32 %v6388_v13, %v6376_v30  ;;  %v4813_v46 = vadd.f32 %v6399_v32, %v6392_v18 }
 0x216   : > { %v4335_v62 = vpack.c.bf16 %v3490_v10, %v3487_v17  ;;  %v3482_v48 = vadd.f32 %v3481_v63, %v3321_v53  ;;  %v3740_v0 = vadd.f32 %v3739_v43, %v3479_v22  ;;  %v3809_v57 = vadd.f32 %v3808_v9, %v3778_v3  ;;  %v6435_v42 = vpop.f32.mrf.mxu1 }
 0x217   : > { %v4904_v61 = vpop.f32.mrf.mxu0  ;;  %v3337_v45 = vadd.f32 %v4795_v51, %v6234_v20  ;;  %v3782_v27 = vmul.f32 %v3490_v10, %v3490_v10  ;;  %v3350_v13 = vadd.f32 %v4804_v33, %v6254_v11  ;;  %v3358_v43 = vadd.f32 %v4810_v14, %v6271_v8  ;;  %v6544_v33 = vld [vmem:[#allocation8_spill] sm:$0xff] }
 0x218   : > { %4391 = vst [vmem:[%s6386_s21 + $0x28] sm:$0xff] %v4335_v62   ;;  %v4330_v56 = vpack.c.bf16 %v3482_v48, %v3479_v22  ;;  %v3780_v7 = vmul.f32 %v3482_v48, %v3482_v48  ;;  %v3810_v6 = vadd.f32 %v3809_v57, %v3779_v15  ;;  %v3741_v49 = vadd.f32 %v3740_v0, %v3482_v48  ;;  %v4824_v36 = vpop.f32.mrf.mxu1  ;;  %v6541_v57 = vld [vmem:[#allocation4_spill] sm:$0xff] }
 0x219   : > { %v3494_v60 = vpop.f32.mrf.mxu0  ;;  %v3503_v35 = vadd.f32 %v4904_v61, %v3342_v16  ;;  %v3361_v63 = vadd.f32 %v4813_v46, %v6278_v25  ;;  %v4816_v11 = vadd.f32 %v6411_v41, %v6402_v34  ;;  %v4822_v25 = vadd.f32 %v6429_v29, %v6424_v19 }
 0x21a   : > { %4390 = vst [vmem:[%s6386_s21 + $0x20] sm:$0xff] %v4330_v56   ;;  %v3742_v1 = vadd.f32 %v3741_v49, %v3487_v17  ;;  %v3811_v5 = vadd.f32 %v3810_v6, %v3780_v7  ;;  %v3495_v28 = vadd.f32 %v3494_v60, %v3334_v44  ;;  %v6444_v4 = vpop.f32.mrf.mxu1  ;;  %v4825_v49 = vadd.f32 %v4824_v36, %v6435_v42  ;;  %v6543_v36 = vld [vmem:[#allocation7_spill] sm:$0xff] }
 0x21b   : > { %v4905_v24 = vpop.f32.mrf.mxu0  ;;  %v3785_v12 = vmul.f32 %v3503_v35, %v3503_v35  ;;  %v4819_v34 = vadd.f32 %v6419_v40, %v6413_v55 }
 0x21c   : > { %v3506_v21 = vadd.f32 %v4905_v24, %v3345_v31  ;;  %v3812_v26 = vadd.f32 %v3811_v5, %v3781_v52  ;;  %v3743_v2 = vadd.f32 %v3742_v1, %v3490_v10  ;;  %v6449_v37 = vpop.f32.mrf.mxu1  ;;  %v3783_v17 = vmul.f32 %v3495_v28, %v3495_v28 }
 0x21d   : > { %v3497_v39 = vpop.f32.mrf.mxu0  ;;  %v4807_v10 = vadd.f32 %v6369_v58, %v6367_v47 }
 0x21e   : > { %v4345_v22 = vpack.c.bf16 %v3506_v21, %v3503_v35  ;;  %v3498_v59 = vadd.f32 %v3497_v39, %v3337_v45  ;;  %v3744_v20 = vadd.f32 %v3743_v2, %v3495_v28  ;;  %v3813_v53 = vadd.f32 %v3812_v26, %v3782_v27  ;;  %v6455_v23 = vpop.f32.mrf.mxu1 }
 0x21f   : > { %v4908_v50 = vpop.f32.mrf.mxu0  ;;  %v3353_v61 = vadd.f32 %v4807_v10, %v6541_v57  ;;  %v3786_v51 = vmul.f32 %v3506_v21, %v3506_v21  ;;  %v3374_v45 = vadd.f32 %v4822_v25, %v6543_v36  ;;  %v3377_v27 = vadd.f32 %v4825_v49, %v6544_v33 }
 0x220   : > { %4393 = vst [vmem:[%s6386_s21 + $0x38] sm:$0xff] %v4345_v22   ;;  %v4340_v54 = vpack.c.bf16 %v3498_v59, %v3495_v28  ;;  %v3784_v3 = vmul.f32 %v3498_v59, %v3498_v59  ;;  %v3814_v9 = vadd.f32 %v3813_v53, %v3783_v17  ;;  %v3745_v30 = vadd.f32 %v3744_v20, %v3498_v59  ;;  %v6461_v32 = vpop.f32.mrf.mxu1  ;;  %v6545_v59 = vld [vmem:[#allocation6_spill] sm:$0xff] }
 0x221   : > { %v3510_v18 = vpop.f32.mrf.mxu0  ;;  %v3519_v0 = vadd.f32 %v4908_v50, %v3358_v43  ;;  %v3369_v20 = vadd.f32 %v4819_v34, %v6545_v59  ;;  %v4828_v17 = vadd.f32 %v6449_v37, %v6444_v4 }
 0x222   : > { %4392 = vst [vmem:[%s6386_s21 + $0x30] sm:$0xff] %v4340_v54   ;;  %v3746_v38 = vadd.f32 %v3745_v30, %v3503_v35  ;;  %v3815_v62 = vadd.f32 %v3814_v9, %v3784_v3  ;;  %v3511_v48 = vadd.f32 %v3510_v18, %v3350_v13  ;;  %v4832_v58 = vpop.f32.mrf.mxu1 }
 0x223   : > { %v4909_v47 = vpop.f32.mrf.mxu0  ;;  %v3789_v26 = vmul.f32 %v3519_v0, %v3519_v0 }
 0x224   : > { %v3522_v15 = vadd.f32 %v4909_v47, %v3361_v63  ;;  %v3816_v56 = vadd.f32 %v3815_v62, %v3785_v12  ;;  %v3747_v7 = vadd.f32 %v3746_v38, %v3506_v21  ;;  %v4833_v6 = vpop.f32.mrf.mxu1  ;;  %v3787_v31 = vmul.f32 %v3511_v48, %v3511_v48  ;;  %v6542_v21 = vld [vmem:[#allocation5_spill] sm:$0xff] }
 0x225   : > { %v3513_v8 = vpop.f32.mrf.mxu0  ;;  %v3366_v19 = vadd.f32 %v4816_v11, %v6542_v21  ;;  %v4834_v9 = vadd.f32 %v4833_v6, %v4832_v58  ;;  %v6547_v11 = vld [vmem:[#allocation11_spill] sm:$0xff] }
 0x226   : > { %v4355_v44 = vpack.c.bf16 %v3522_v15, %v3519_v0  ;;  %v3514_v60 = vadd.f32 %v3513_v8, %v3353_v61  ;;  %v3748_v16 = vadd.f32 %v3747_v7, %v3511_v48  ;;  %v3817_v52 = vadd.f32 %v3816_v56, %v3786_v51  ;;  %v4835_v5 = vpop.f32.mrf.mxu1  ;;  %v6548_v56 = vld [vmem:[#allocation12_spill] sm:$0xff] }
 0x227   : > { %v4912_v1 = vpop.f32.mrf.mxu0  ;;  %v3790_v53 = vmul.f32 %v3522_v15, %v3522_v15  ;;  %v3390_v51 = vadd.f32 %v4834_v9, %v6547_v11 }
 0x228   : > { %4395 = vst [vmem:[%s6386_s21 + $0x48] sm:$0xff] %v4355_v44   ;;  %v4350_v41 = vpack.c.bf16 %v3514_v60, %v3511_v48  ;;  %v3788_v28 = vmul.f32 %v3514_v60, %v3514_v60  ;;  %v3818_v24 = vadd.f32 %v3817_v52, %v3787_v31  ;;  %v3749_v35 = vadd.f32 %v3748_v16, %v3514_v60  ;;  %v4836_v42 = vpop.f32.mrf.mxu1  ;;  %v6549_v16 = vld [vmem:[#allocation10_spill] sm:$0xff] }
 0x229   : > { %v3526_v29 = vpop.f32.mrf.mxu0  ;;  %v3535_v40 = vadd.f32 %v4912_v1, %v3374_v45  ;;  %v4837_v13 = vadd.f32 %v4836_v42, %v4835_v5  ;;  %v4831_v48 = vadd.f32 %v6461_v32, %v6455_v23 }
 0x22a   : > { %4394 = vst [vmem:[%s6386_s21 + $0x40] sm:$0xff] %v4350_v41   ;;  %v3750_v2 = vadd.f32 %v3749_v35, %v3519_v0  ;;  %v3819_v39 = vadd.f32 %v3818_v24, %v3788_v28  ;;  %v3527_v14 = vadd.f32 %v3526_v29, %v3366_v19  ;;  %v4838_v55 = vpop.f32.mrf.mxu1  ;;  %v6550_v24 = vld [vmem:[#allocation15_spill] sm:$0xff]  ;;  %v6551_v35 = vld [vmem:[#allocation17_spill] sm:$0xff] }
 0x22b   : > { %v4913_v46 = vpop.f32.mrf.mxu0  ;;  %v3393_v7 = vadd.f32 %v4837_v13, %v6548_v56  ;;  %v3793_v8 = vmul.f32 %v3535_v40, %v3535_v40  ;;  %v3385_v31 = vadd.f32 %v4831_v48, %v6549_v16  ;;  %v4737_v21 = vadd.f32 %v6551_v35, %v6550_v24 }
 0x22c   : > { %v3538_v22 = vadd.f32 %v4913_v46, %v3377_v27  ;;  %v3820_v50 = vadd.f32 %v3819_v39, %v3789_v26  ;;  %v3751_v10 = vadd.f32 %v3750_v2, %v3522_v15  ;;  %v4839_v3 = vpop.f32.mrf.mxu1  ;;  %v3791_v63 = vmul.f32 %v3527_v14, %v3527_v14  ;;  %v6546_v15 = vld [vmem:[#allocation9_spill] sm:$0xff] }
 0x22d   : > { %v3529_v54 = vpop.f32.mrf.mxu0  ;;  %v3382_v57 = vadd.f32 %v4828_v17, %v6546_v15  ;;  %v4840_v5 = vadd.f32 %v4839_v3, %v4838_v55  ;;  %v6553_v17 = vld [vmem:[#allocation3_spill] sm:$0xff] }
 0x22e   : > { %v4365_v30 = vpack.c.bf16 %v3538_v22, %v3535_v40  ;;  %v3530_v18 = vadd.f32 %v3529_v54, %v3369_v20  ;;  %v3752_v43 = vadd.f32 %v3751_v10, %v3527_v14  ;;  %v3821_v12 = vadd.f32 %v3820_v50, %v3790_v53  ;;  %v4841_v62 = vpop.f32.mrf.mxu1  ;;  %v6554_v50 = vld [vmem:[#allocation16_spill] sm:$0xff] }
 0x22f   : > { %v4916_v38 = vpop.f32.mrf.mxu0  ;;  %v3794_v52 = vmul.f32 %v3538_v22, %v3538_v22  ;;  %v3248_v53 = vadd.f32 %v4737_v21, %v6553_v17 }
 0x230   : > { %4397 = vst [vmem:[%s6386_s21 + $0x58] sm:$0xff] %v4365_v30   ;;  %v4360_v4 = vpack.c.bf16 %v3530_v18, %v3527_v14  ;;  %v3792_v37 = vmul.f32 %v3530_v18, %v3530_v18  ;;  %v3822_v47 = vadd.f32 %v3821_v12, %v3791_v63  ;;  %v3753_v0 = vadd.f32 %v3752_v43, %v3530_v18  ;;  %v4842_v61 = vpop.f32.mrf.mxu1  ;;  %v6555_v63 = vld [vmem:[#allocation14_spill] sm:$0xff] }
 0x231   : > { %v3542_v58 = vpop.f32.mrf.mxu0  ;;  %v3551_v32 = vadd.f32 %v4916_v38, %v3390_v51  ;;  %v4843_v2 = vadd.f32 %v4842_v61, %v4841_v62 }
 0x232   : > { %4396 = vst [vmem:[%s6386_s21 + $0x50] sm:$0xff] %v4360_v4   ;;  %v3754_v6 = vadd.f32 %v3753_v0, %v3535_v40  ;;  %v3823_v25 = vadd.f32 %v3822_v47, %v3792_v37  ;;  %v3543_v49 = vadd.f32 %v3542_v58, %v3382_v57  ;;  %v4844_v23 = vpop.f32.mrf.mxu1  ;;  %v6552_v40 = vld [vmem:[#allocation13_spill] sm:$0xff] }
 0x233   : > { %v4917_v44 = vpop.f32.mrf.mxu0  ;;  %v3797_v3 = vmul.f32 %v3551_v32, %v3551_v32  ;;  %v3401_v12 = vadd.f32 %v4843_v2, %v6555_v63 }
 0x234   : > { %v3554_v60 = vadd.f32 %v4917_v44, %v3393_v7  ;;  %v3824_v1 = vadd.f32 %v3823_v25, %v3793_v8  ;;  %v3755_v34 = vadd.f32 %v3754_v6, %v3538_v22  ;;  %v4845_v28 = vpop.f32.mrf.mxu1  ;;  %v3795_v45 = vmul.f32 %v3543_v49, %v3543_v49 }
 0x235   : > { %v3545_v41 = vpop.f32.mrf.mxu0  ;;  %v4846_v42 = vadd.f32 %v4845_v28, %v4844_v23  ;;  %v3398_v22 = vadd.f32 %v4840_v5, %v6552_v40 }
 0x236   : > { %v4375_v19 = vpack.c.bf16 %v3554_v60, %v3551_v32  ;;  %v3546_v29 = vadd.f32 %v3545_v41, %v3385_v31  ;;  %v3756_v36 = vadd.f32 %v3755_v34, %v3543_v49  ;;  %v3825_v33 = vadd.f32 %v3824_v1, %v3794_v52  ;;  %v4847_v26 = vpop.f32.mrf.mxu1 }
 0x237   : > { %v4920_v27 = vpop.f32.mrf.mxu0  ;;  %v3406_v10 = vadd.f32 %v4846_v42, %v6554_v50  ;;  %v3798_v38 = vmul.f32 %v3554_v60, %v3554_v60 }
 0x238   : > { %4399 = vst [vmem:[%s6386_s21 + $0x68] sm:$0xff] %v4375_v19   ;;  %v4370_v39 = vpack.c.bf16 %v3546_v29, %v3543_v49  ;;  %v3796_v14 = vmul.f32 %v3546_v29, %v3546_v29  ;;  %v3826_v46 = vadd.f32 %v3825_v33, %v3795_v45  ;;  %v3757_v55 = vadd.f32 %v3756_v36, %v3546_v29  ;;  %v4848_v20 = vpop.f32.mrf.mxu1 }
 0x239   : > { %v3558_v59 = vpop.f32.mrf.mxu0  ;;  %v4849_v54 = vadd.f32 %v4848_v20, %v4847_v26  ;;  %v3567_v37 = vadd.f32 %v4920_v27, %v3406_v10 }
 0x23a   : > { %4398 = vst [vmem:[%s6386_s21 + $0x60] sm:$0xff] %v4370_v39   ;;  %v3758_v9 = vadd.f32 %v3757_v55, %v3551_v32  ;;  %v3827_v30 = vadd.f32 %v3826_v46, %v3796_v14  ;;  %v3559_v13 = vadd.f32 %v3558_v59, %v3398_v22 }
 0x23b   : > { %v4921_v18 = vpop.f32.mrf.mxu0  ;;  %v3409_v43 = vadd.f32 %v4849_v54, %v3248_v53  ;;  %v3801_v8 = vmul.f32 %v3567_v37, %v3567_v37 }
 0x23c   : > { %v3828_v62 = vadd.f32 %v3827_v30, %v3797_v3  ;;  %v3759_v48 = vadd.f32 %v3758_v9, %v3554_v60  ;;  %v3799_v57 = vmul.f32 %v3559_v13, %v3559_v13 }
 0x23d   : > { %v3561_v4 = vpop.f32.mrf.mxu0  ;;  %v3570_v47 = vadd.f32 %v4921_v18, %v3409_v43 }
 0x23e   : > { %v3562_v0 = vadd.f32 %v3561_v4, %v3401_v12  ;;  %v3760_v15 = vadd.f32 %v3759_v48, %v3559_v13  ;;  %v3829_v58 = vadd.f32 %v3828_v62, %v3798_v38 }
 0x23f   : > { %v4385_v61 = vpack.c.bf16 %v3570_v47, %v3567_v37  ;;  %v3802_v6 = vmul.f32 %v3570_v47, %v3570_v47 }
 0x240   : > { %v4380_v11 = vpack.c.bf16 %v3562_v0, %v3559_v13  ;;  %v3800_v51 = vmul.f32 %v3562_v0, %v3562_v0  ;;  %v3830_v56 = vadd.f32 %v3829_v58, %v3799_v57  ;;  %v3761_v7 = vadd.f32 %v3760_v15, %v3562_v0 }
 0x241   : > { %4401 = vst [vmem:[%s6386_s21 + $0x78] sm:$0xff] %v4385_v61  }
 0x242   : > { %4400 = vst [vmem:[%s6386_s21 + $0x70] sm:$0xff] %v4380_v11   ;;  %v3762_v25 = vadd.f32 %v3761_v7, %v3567_v37  ;;  %v3831_v49 = vadd.f32 %v3830_v56, %v3800_v51 }
 0x244   : > { %v3763_v44 = vadd.f32 %v3762_v25, %v3570_v47  ;;  %v3832_v23 = vadd.f32 %v3831_v49, %v3801_v8 }
 0x246   : > { %v3764_v32 = vrot.slane %v3763_v44, 4  ;;  %v3833_v60 = vadd.f32 %v3832_v23, %v3802_v6 }
 0x248   : > { %v3765_v16 = vadd.f32 %v3764_v32, %v3763_v44  ;;  %v3834_v31 = vrot.slane %v3833_v60, 4 }
 0x24a   : > { %v3766_v52 = vrot.slane %v3765_v16, 2  ;;  %v3835_v1 = vadd.f32 %v3834_v31, %v3833_v60 }
 0x24c   : > { %v3767_v5 = vadd.f32 %v3766_v52, %v3765_v16  ;;  %v3836_v34 = vrot.slane %v3835_v1, 2 }
 0x24e   : > { %v3768_v41 = vrot.slane %v3767_v5, 1  ;;  %v3837_v28 = vadd.f32 %v3836_v34, %v3835_v1 }
 0x250   : > { %v3769_v24 = vadd.f32 %v3768_v41, %v3767_v5  ;;  %v3838_v35 = vrot.slane %v3837_v28, 1 }
 0x252   : > { %3770 = vst [vmem:[%s256_s24] sm:$0x1] %v3769_v24  ;;  %v3839_v21 = vadd.f32 %v3838_v35, %v3837_v28 }
 0x254   : > { %3840 = vst [vmem:[%s262_s27] sm:$0x1] %v3839_v21 }
 0x255 PF: > { %s15_s17 = sadd.s32 1, %s5269_s17   ;;  %s6556_s15 = smov %s5265_s16 }
 0x256   : > { %p12_p5 = scmp.ge.s32.totalorder %s15_s17, 4   ;;  %s6557_s16 = smov %s6559_s18 }
 0x258   :  { %14 = sbr.rel (!%p12_p5) target bundleno = 2 (0x2), region = 82 }

</bundles_post_ra>
